<compile_context>
chip_gen: v7x
topology: tpu7x:2x2x1
jax: 0.10.0
libtpu: 0.0.40
codegen_flags: <defaults>
</compile_context>

<pallas_src>
import functools

import jax
import jax.numpy as jnp
from jax import lax
from jax.experimental import pallas as pl
from jax.experimental.pallas import tpu as pltpu


# =============================================================================
# Fused kernel: ConvTranspose2d(2,2) -> [implicit concat] -> Conv2d(3x3,p=1)
#               (+ bias) -> per-batch BatchNorm partial statistics.
# Grid: (N,), 'parallel'.  Everything stays in VMEM within a grid step.
# =============================================================================
def _fused_up_conv_kernel(
    x1_ref,      # (1, H*W, Cin)        bf16  input image, spatially flattened
    x2p_ref,     # (1, 4, H, W, Cskip)  f32   skip input, 2x2 sub-lattice planes
    wup_ref,     # (Cin, 4*Cup)         bf16  transposed-conv weight as matrix
    bup_ref,     # (1, 4*Cup)           f32
    wbig_ref,    # (9*Cm, Co)           bf16  3x3 conv weight as im2col matrix
    bconv_ref,   # (1, Co)              f32
    out_ref,     # (1, H*W, 4*Co)       f32   conv out, sub-planes packed on lanes
    stats_ref,   # (1, 2, Co)           f32   per-batch [mean, sum((x-mean)^2)]
    pad_ref,     # scratch (4, H+2, W+2, Cm) f32  merged padded concat planes
    *, H, W, Cup, Cskip, Co,
):
    HW = H * W
    Cm = Cup + Cskip

    # ---- ConvTranspose2d(k=2, s=2) as a single MXU matmul (bf16 -> f32) -----
    # Column block j = 2a+b of up_flat is sub-pixel plane (a, b): the values
    # landing at full-resolution output positions (2y+a, 2x+b).
    up_flat = (
        jnp.dot(x1_ref[0], wup_ref[...], preferred_element_type=jnp.float32)
        + bup_ref[...]
    )  # (HW, 4*Cup) f32

    # ---- merged padded sub-lattice planes of the *virtual* concat -----------
    # Zero only the 1-element border (every grid step); the interior is written
    # exactly once with real data (up part and skip part side by side).
    zrow = jnp.zeros((4, 1, W + 2, Cm), jnp.float32)
    pad_ref[:, 0:1, :, :] = zrow
    pad_ref[:, H + 1:H + 2, :, :] = zrow
    zcol = jnp.zeros((H, 1, Cm), jnp.float32)
    for j in range(4):
        interior = jnp.concatenate(
            [up_flat[:, j * Cup:(j + 1) * Cup].reshape(H, W, Cup),
             x2p_ref[0, j]],
            axis=2,
        )  # (H, W, Cm)
        pad_ref[j, 1:H + 1, :, :] = jnp.concatenate(
            [zcol, interior, zcol], axis=1)  # (H, W+2, Cm), incl. zero side cols

    # ---- 3x3 conv (pad=1) over the virtual concat, via ONE im2col matmul ----
    # Output position (2y+p, 2x+q), tap (ky,kx) reads full-res row 2y+(p-1+ky):
    # sub-lattice plane (dy&1, dx&1), shifted by (dy>>1, dx>>1) on the coarse grid.
    sub_rows = []
    for p in (0, 1):
        for q in (0, 1):
            taps = []
            for ky in range(3):
                for kx in range(3):
                    dy, dx = p - 1 + ky, q - 1 + kx
                    j = 2 * (dy & 1) + (dx & 1)
                    fy, fx = dy >> 1, dx >> 1          # in {-1, 0, 1}
                    taps.append(
                        pad_ref[j, 1 + fy:1 + fy + H, 1 + fx:1 + fx + W, :]
                        .reshape(HW, Cm)
                    )
            sub_rows.append(jnp.concatenate(taps, axis=1))   # (HW, 9*Cm)
    patch = jnp.concatenate(sub_rows, axis=0)                # (4*HW, 9*Cm) f32

    conv = (
        jnp.dot(patch.astype(jnp.bfloat16), wbig_ref[...],
                preferred_element_type=jnp.float32)
        + bconv_ref[...]
    )  # (4*HW, Co) f32

    # ---- pack the 4 sub-planes along lanes: 4x denser / fewer output stores -
    out_ref[0] = jnp.concatenate(
        [conv[j * HW:(j + 1) * HW, :] for j in range(4)], axis=1)  # (HW, 4*Co)

    # ---- fused BatchNorm partial statistics (mean-subtracted form) ----------
    m = jnp.sum(conv, axis=0, keepdims=True) * (1.0 / (4 * HW))    # (1, Co)
    d = conv - m
    m2 = jnp.sum(d * d, axis=0, keepdims=True)                     # (1, Co)
    stats_ref[0] = jnp.concatenate([m, m2], axis=0)                # (2, Co)


# =============================================================================
# Decoder forward: NCHW in -> NCHW out.
# =============================================================================
@jax.jit
def decoder_forward(x1, x2, w_up, b_up, w_conv, b_conv, gamma, beta, eps=1e-5):
    N, Cin, H, W = x1.shape
    Cup = w_up.shape[1]
    Cskip = x2.shape[1]
    Cm = Cup + Cskip
    Co = w_conv.shape[0]
    HW = H * W

    # ---- one-time layout / dtype prep (each input touched once) -------------
    x1f = (jnp.transpose(x1, (0, 2, 3, 1))
           .reshape(N, HW, Cin).astype(jnp.bfloat16))
    # skip input as its four 2x2 sub-lattice planes, NHWC per plane (f32)
    x2p = jnp.stack(
        [x2[:, :, p::2, q::2] for p in (0, 1) for q in (0, 1)], axis=1
    )                                            # (N, 4, Cskip, H, W)
    x2p = jnp.transpose(x2p, (0, 1, 3, 4, 2))    # (N, 4, H, W, Cskip)

    # torch ConvTranspose2d weight (Cin, Cup, 2, 2) -> (Cin, 4*Cup), cols (a,b,c)
    w_up_mat = (jnp.transpose(w_up, (0, 2, 3, 1))
                .reshape(Cin, 4 * Cup).astype(jnp.bfloat16))
    b_up4 = jnp.tile(b_up, 4).reshape(1, 4 * Cup)
    # torch Conv2d weight (Co, Cm, 3, 3) -> HWIO -> plain im2col matrix (9*Cm, Co)
    w_big = (jnp.transpose(w_conv, (2, 3, 1, 0))
             .reshape(9 * Cm, Co).astype(jnp.bfloat16))
    b_conv2 = b_conv.reshape(1, Co)

    kernel = functools.partial(
        _fused_up_conv_kernel, H=H, W=W, Cup=Cup, Cskip=Cskip, Co=Co)

    conv_out, stats = pl.pallas_call(
        kernel,
        out_shape=(
            jax.ShapeDtypeStruct((N, HW, 4 * Co), jnp.float32),
            jax.ShapeDtypeStruct((N, 2, Co), jnp.float32),
        ),
        grid=(N,),
        in_specs=[
            pl.BlockSpec((1, HW, Cin), lambda n: (n, 0, 0)),
            pl.BlockSpec((1, 4, H, W, Cskip), lambda n: (n, 0, 0, 0, 0)),
            pl.BlockSpec((Cin, 4 * Cup), lambda n: (0, 0)),
            pl.BlockSpec((1, 4 * Cup), lambda n: (0, 0)),
            pl.BlockSpec((9 * Cm, Co), lambda n: (0, 0)),
            pl.BlockSpec((1, Co), lambda n: (0, 0)),
        ],
        out_specs=(
            pl.BlockSpec((1, HW, 4 * Co), lambda n: (n, 0, 0)),
            pl.BlockSpec((1, 2, Co), lambda n: (n, 0, 0)),
        ),
        scratch_shapes=[
            pltpu.VMEM((4, H + 2, W + 2, Cm), jnp.float32),
        ],
        compiler_params=pltpu.CompilerParams(dimension_semantics=("parallel",)),
    )(x1f, x2p, w_up_mat, b_up4, w_big, b_conv2)

    # ---- finalize BN batch statistics (tiny (N,Co) math; Chan's combine) ----
    Mb = 4.0 * HW
    means = stats[:, 0, :]                                     # (N, Co)
    m2s = stats[:, 1, :]                                       # (N, Co)
    mean = jnp.mean(means, axis=0)
    var = (jnp.sum(m2s, axis=0)
           + Mb * jnp.sum((means - mean) ** 2, axis=0)) / (N * Mb)
    scale = gamma * lax.rsqrt(var + eps)
    shift = beta - mean * scale

    # ---- layout fix (transpose as producer) + ONE fused elementwise BN+ReLU -
    # conv_out[n, y*W+x, (2p+q)*Co + c] -> NCHW (n, c, 2y+p, 2x+q)
    y = conv_out.reshape(N, H, W, 2, 2, Co)          # (n, y, x, p, q, c)
    y = jnp.transpose(y, (0, 5, 1, 3, 2, 4))         # (n, c, y, p, x, q)
    y = y.reshape(N, Co, 2 * H, 2 * W)
    out = jnp.maximum(
        y * scale[None, :, None, None] + shift[None, :, None, None], 0.0)
    return out


# =============================================================================
# Pure-JAX reference (independent f32 path, NCHW throughout).
# =============================================================================
def decoder_reference(x1, x2, w_up, b_up, w_conv, b_conv, gamma, beta, eps=1e-5):
    N, Cin, H, W = x1.shape
    Cout = w_up.shape[1]
    up6 = jnp.einsum("ncij,coab->noiajb", x1, w_up)  # (N, Co, H, 2, W, 2)
    up = up6.reshape(N, Cout, 2 * H, 2 * W) + b_up[None, :, None, None]
    cat = jnp.concatenate([up, x2], axis=1)
    conv = jax.lax.conv_general_dilated(
        cat, w_conv, (1, 1), ((1, 1), (1, 1)),
        dimension_numbers=("NCHW", "OIHW", "NCHW"),
    ) + b_conv[None, :, None, None]
    mean = conv.mean(axis=(0, 2, 3), keepdims=True)
    var = ((conv - mean) ** 2).mean(axis=(0, 2, 3), keepdims=True)
    norm = (conv - mean) * jax.lax.rsqrt(var + eps)
    return jnp.maximum(
        norm * gamma[None, :, None, None] + beta[None, :, None, None], 0.0
    )


if __name__ == "__main__":
    key = jax.random.PRNGKey(0)
    ks = jax.random.split(key, 8)

    # Decoder(in_channels=8, middle_channels=16, out_channels=8)
    N, Cin, Cout, H, W = 2, 8, 8, 8, 8
    Cskip = 8
    Cm = Cout + Cskip  # middle_channels

    x1 = jax.random.normal(ks[0], (N, Cin, H, W), jnp.float32)
    x2 = jax.random.normal(ks[1], (N, Cskip, 2 * H, 2 * W), jnp.float32)

    w_up = jax.random.normal(ks[2], (Cin, Cout, 2, 2), jnp.float32) * 0.1
    b_up = jax.random.normal(ks[3], (Cout,), jnp.float32) * 0.1
    w_conv = jax.random.normal(ks[4], (Cout, Cm, 3, 3), jnp.float32) * 0.1
    b_conv = jax.random.normal(ks[5], (Cout,), jnp.float32) * 0.1
    gamma = 1.0 + 0.5 * jax.random.normal(ks[6], (Cout,), jnp.float32)
    beta = 0.1 * jax.random.normal(ks[7], (Cout,), jnp.float32)

    out = decoder_forward(x1, x2, w_up, b_up, w_conv, b_conv, gamma, beta)
    out = jax.block_until_ready(out)

    ref = decoder_reference(x1, x2, w_up, b_up, w_conv, b_conv, gamma, beta)
    assert out.shape == (N, Cout, 2 * H, 2 * W), out.shape
    max_err = float(jnp.max(jnp.abs(out - ref)))
    # bf16 MXU operands (f32 accumulation / BN math) -> loosened tolerance.
    assert jnp.allclose(out, ref, atol=5e-2, rtol=5e-2), max_err
    print("KERNEL_OK")
</pallas_src>

<mosaic_0001>
module attributes {stable_mosaic.version = 11 : i64} {
  func.func @_fused_up_conv_kernel(%arg0: i32, %arg1: memref<1x64x8xbf16, #tpu.memory_space<vmem>>, %arg2: memref<1x4x8x8x8xf32, #tpu.memory_space<vmem>>, %arg3: memref<8x32xbf16, #tpu.memory_space<vmem>>, %arg4: memref<1x32xf32, #tpu.memory_space<vmem>>, %arg5: memref<144x8xbf16, #tpu.memory_space<vmem>>, %arg6: memref<1x8xf32, #tpu.memory_space<vmem>>, %arg7: memref<1x64x32xf32, #tpu.memory_space<vmem>>, %arg8: memref<1x2x8xf32, #tpu.memory_space<vmem>>, %arg9: memref<4x10x10x16xf32, #tpu.memory_space<vmem>>) attributes {dimension_semantics = [#tpu.dimension_semantics<parallel>], iteration_bounds = array<i64: 2>, scalar_prefetch = 0 : i64, scratch_operands = 1 : i64, tpu.core_type = #tpu.core_type<tc>, window_params = [{transform_indices = @transform_0, window_bounds = array<i64: 1, 64, 8>}, {transform_indices = @transform_1, window_bounds = array<i64: 1, 4, 8, 8, 8>}, {pipeline_mode = #tpu.pipeline_mode<synchronous>, transform_indices = @transform_2, window_bounds = array<i64: 8, 32>}, {pipeline_mode = #tpu.pipeline_mode<synchronous>, transform_indices = @transform_3, window_bounds = array<i64: 1, 32>}, {pipeline_mode = #tpu.pipeline_mode<synchronous>, transform_indices = @transform_4, window_bounds = array<i64: 144, 8>}, {pipeline_mode = #tpu.pipeline_mode<synchronous>, transform_indices = @transform_5, window_bounds = array<i64: 1, 8>}, {transform_indices = @transform_6, window_bounds = array<i64: 1, 64, 32>}, {transform_indices = @transform_7, window_bounds = array<i64: 1, 2, 8>}]} {
    %c0 = arith.constant 0 : index
    %c0_0 = arith.constant 0 : index
    %c0_1 = arith.constant 0 : index
    %0 = vector.load %arg1[%c0, %c0_0, %c0_1] : memref<1x64x8xbf16, #tpu.memory_space<vmem>>, vector<1x64x8xbf16>
    %1 = vector.shape_cast %0 : vector<1x64x8xbf16> to vector<64x8xbf16>
    %c0_2 = arith.constant 0 : index
    %c0_3 = arith.constant 0 : index
    %2 = vector.load %arg3[%c0_2, %c0_3] : memref<8x32xbf16, #tpu.memory_space<vmem>>, vector<8x32xbf16>
    %cst = arith.constant dense<0.000000e+00> : vector<64x32xf32>
    %3 = tpu.matmul %1, %2, %cst {dimension_numbers = #tpu.dot_dimension_numbers<[1], [0], [0], [1], [0, 0, 1, 1], [], []>} : vector<64x8xbf16>, vector<8x32xbf16>, vector<64x32xf32> -> vector<64x32xf32>
    %c0_4 = arith.constant 0 : index
    %c0_5 = arith.constant 0 : index
    %4 = vector.load %arg4[%c0_4, %c0_5] : memref<1x32xf32, #tpu.memory_space<vmem>>, vector<1x32xf32>
    %5 = vector.broadcast %4 : vector<1x32xf32> to vector<64x32xf32>
    %6 = arith.addf %3, %5 : vector<64x32xf32>
    %cst_6 = arith.constant 0.000000e+00 : f32
    %7 = vector.broadcast %cst_6 : f32 to vector<4x1x10x16xf32>
    %c0_7 = arith.constant 0 : index
    %c0_8 = arith.constant 0 : index
    %c0_9 = arith.constant 0 : index
    %c0_10 = arith.constant 0 : index
    %8 = vector.load %arg9[%c0_7, %c0_8, %c0_9, %c0_10] : memref<4x10x10x16xf32, #tpu.memory_space<vmem>>, vector<4x1x10x16xf32>
    tpu.vector_store %arg9[%c0_7, %c0_8, %c0_9, %c0_10], %7 {strides = array<i32>} : memref<4x10x10x16xf32, #tpu.memory_space<vmem>>, vector<4x1x10x16xf32>,
    %c0_11 = arith.constant 0 : index
    %c9 = arith.constant 9 : index
    %c0_12 = arith.constant 0 : index
    %c0_13 = arith.constant 0 : index
    %9 = vector.load %arg9[%c0_11, %c9, %c0_12, %c0_13] : memref<4x10x10x16xf32, #tpu.memory_space<vmem>>, vector<4x1x10x16xf32>
    tpu.vector_store %arg9[%c0_11, %c9, %c0_12, %c0_13], %7 {strides = array<i32>} : memref<4x10x10x16xf32, #tpu.memory_space<vmem>>, vector<4x1x10x16xf32>,
    %cst_14 = arith.constant 0.000000e+00 : f32
    %10 = vector.broadcast %cst_14 : f32 to vector<8x1x16xf32>
    %11 = vector.extract_strided_slice %6 {offsets = [0, 0], sizes = [64, 8], strides = [1, 1]} : vector<64x32xf32> to vector<64x8xf32>
    %12 = vector.shape_cast %11 : vector<64x8xf32> to vector<8x8x8xf32>
    %c0_15 = arith.constant 0 : index
    %c0_16 = arith.constant 0 : index
    %c0_17 = arith.constant 0 : index
    %c0_18 = arith.constant 0 : index
    %c0_19 = arith.constant 0 : index
    %13 = vector.load %arg2[%c0_15, %c0_16, %c0_17, %c0_18, %c0_19] : memref<1x4x8x8x8xf32, #tpu.memory_space<vmem>>, vector<1x1x8x8x8xf32>
    %14 = vector.shape_cast %13 : vector<1x1x8x8x8xf32> to vector<8x8x8xf32>
    %15 = tpu.concatenate %12, %14 in 2 : vector<8x8x8xf32>, vector<8x8x8xf32> -> vector<8x8x16xf32>
    %16 = tpu.concatenate %10, %15, %10 in 1 : vector<8x1x16xf32>, vector<8x8x16xf32>, vector<8x1x16xf32> -> vector<8x10x16xf32>
    %c0_20 = arith.constant 0 : index
    %c1 = arith.constant 1 : index
    %c0_21 = arith.constant 0 : index
    %c0_22 = arith.constant 0 : index
    %17 = vector.load %arg9[%c0_20, %c1, %c0_21, %c0_22] : memref<4x10x10x16xf32, #tpu.memory_space<vmem>>, vector<1x8x10x16xf32>
    %18 = vector.shape_cast %17 : vector<1x8x10x16xf32> to vector<8x10x16xf32>
    %19 = vector.shape_cast %16 : vector<8x10x16xf32> to vector<1x8x10x16xf32>
    tpu.vector_store %arg9[%c0_20, %c1, %c0_21, %c0_22], %19 {strides = array<i32>} : memref<4x10x10x16xf32, #tpu.memory_space<vmem>>, vector<1x8x10x16xf32>,
    %20 = vector.extract_strided_slice %6 {offsets = [0, 8], sizes = [64, 8], strides = [1, 1]} : vector<64x32xf32> to vector<64x8xf32>
    %21 = vector.shape_cast %20 : vector<64x8xf32> to vector<8x8x8xf32>
    %c0_23 = arith.constant 0 : index
    %c1_24 = arith.constant 1 : index
    %c0_25 = arith.constant 0 : index
    %c0_26 = arith.constant 0 : index
    %c0_27 = arith.constant 0 : index
    %22 = vector.load %arg2[%c0_23, %c1_24, %c0_25, %c0_26, %c0_27] : memref<1x4x8x8x8xf32, #tpu.memory_space<vmem>>, vector<1x1x8x8x8xf32>
    %23 = vector.shape_cast %22 : vector<1x1x8x8x8xf32> to vector<8x8x8xf32>
    %24 = tpu.concatenate %21, %23 in 2 : vector<8x8x8xf32>, vector<8x8x8xf32> -> vector<8x8x16xf32>
    %25 = tpu.concatenate %10, %24, %10 in 1 : vector<8x1x16xf32>, vector<8x8x16xf32>, vector<8x1x16xf32> -> vector<8x10x16xf32>
    %c1_28 = arith.constant 1 : index
    %c1_29 = arith.constant 1 : index
    %c0_30 = arith.constant 0 : index
    %c0_31 = arith.constant 0 : index
    %26 = vector.load %arg9[%c1_28, %c1_29, %c0_30, %c0_31] : memref<4x10x10x16xf32, #tpu.memory_space<vmem>>, vector<1x8x10x16xf32>
    %27 = vector.shape_cast %26 : vector<1x8x10x16xf32> to vector<8x10x16xf32>
    %28 = vector.shape_cast %25 : vector<8x10x16xf32> to vector<1x8x10x16xf32>
    tpu.vector_store %arg9[%c1_28, %c1_29, %c0_30, %c0_31], %28 {strides = array<i32>} : memref<4x10x10x16xf32, #tpu.memory_space<vmem>>, vector<1x8x10x16xf32>,
    %29 = vector.extract_strided_slice %6 {offsets = [0, 16], sizes = [64, 8], strides = [1, 1]} : vector<64x32xf32> to vector<64x8xf32>
    %30 = vector.shape_cast %29 : vector<64x8xf32> to vector<8x8x8xf32>
    %c0_32 = arith.constant 0 : index
    %c2 = arith.constant 2 : index
    %c0_33 = arith.constant 0 : index
    %c0_34 = arith.constant 0 : index
    %c0_35 = arith.constant 0 : index
    %31 = vector.load %arg2[%c0_32, %c2, %c0_33, %c0_34, %c0_35] : memref<1x4x8x8x8xf32, #tpu.memory_space<vmem>>, vector<1x1x8x8x8xf32>
    %32 = vector.shape_cast %31 : vector<1x1x8x8x8xf32> to vector<8x8x8xf32>
    %33 = tpu.concatenate %30, %32 in 2 : vector<8x8x8xf32>, vector<8x8x8xf32> -> vector<8x8x16xf32>
    %34 = tpu.concatenate %10, %33, %10 in 1 : vector<8x1x16xf32>, vector<8x8x16xf32>, vector<8x1x16xf32> -> vector<8x10x16xf32>
    %c2_36 = arith.constant 2 : index
    %c1_37 = arith.constant 1 : index
    %c0_38 = arith.constant 0 : index
    %c0_39 = arith.constant 0 : index
    %35 = vector.load %arg9[%c2_36, %c1_37, %c0_38, %c0_39] : memref<4x10x10x16xf32, #tpu.memory_space<vmem>>, vector<1x8x10x16xf32>
    %36 = vector.shape_cast %35 : vector<1x8x10x16xf32> to vector<8x10x16xf32>
    %37 = vector.shape_cast %34 : vector<8x10x16xf32> to vector<1x8x10x16xf32>
    tpu.vector_store %arg9[%c2_36, %c1_37, %c0_38, %c0_39], %37 {strides = array<i32>} : memref<4x10x10x16xf32, #tpu.memory_space<vmem>>, vector<1x8x10x16xf32>,
    %38 = vector.extract_strided_slice %6 {offsets = [0, 24], sizes = [64, 8], strides = [1, 1]} : vector<64x32xf32> to vector<64x8xf32>
    %39 = vector.shape_cast %38 : vector<64x8xf32> to vector<8x8x8xf32>
    %c0_40 = arith.constant 0 : index
    %c3 = arith.constant 3 : index
    %c0_41 = arith.constant 0 : index
    %c0_42 = arith.constant 0 : index
    %c0_43 = arith.constant 0 : index
    %40 = vector.load %arg2[%c0_40, %c3, %c0_41, %c0_42, %c0_43] : memref<1x4x8x8x8xf32, #tpu.memory_space<vmem>>, vector<1x1x8x8x8xf32>
    %41 = vector.shape_cast %40 : vector<1x1x8x8x8xf32> to vector<8x8x8xf32>
    %42 = tpu.concatenate %39, %41 in 2 : vector<8x8x8xf32>, vector<8x8x8xf32> -> vector<8x8x16xf32>
    %43 = tpu.concatenate %10, %42, %10 in 1 : vector<8x1x16xf32>, vector<8x8x16xf32>, vector<8x1x16xf32> -> vector<8x10x16xf32>
    %c3_44 = arith.constant 3 : index
    %c1_45 = arith.constant 1 : index
    %c0_46 = arith.constant 0 : index
    %c0_47 = arith.constant 0 : index
    %44 = vector.load %arg9[%c3_44, %c1_45, %c0_46, %c0_47] : memref<4x10x10x16xf32, #tpu.memory_space<vmem>>, vector<1x8x10x16xf32>
    %45 = vector.shape_cast %44 : vector<1x8x10x16xf32> to vector<8x10x16xf32>
    %46 = vector.shape_cast %43 : vector<8x10x16xf32> to vector<1x8x10x16xf32>
    tpu.vector_store %arg9[%c3_44, %c1_45, %c0_46, %c0_47], %46 {strides = array<i32>} : memref<4x10x10x16xf32, #tpu.memory_space<vmem>>, vector<1x8x10x16xf32>,
    %c3_48 = arith.constant 3 : index
    %c0_49 = arith.constant 0 : index
    %c0_50 = arith.constant 0 : index
    %c0_51 = arith.constant 0 : index
    %47 = vector.load %arg9[%c3_48, %c0_49, %c0_50, %c0_51] : memref<4x10x10x16xf32, #tpu.memory_space<vmem>>, vector<1x8x8x16xf32>
    %48 = vector.shape_cast %47 : vector<1x8x8x16xf32> to vector<8x8x16xf32>
    %49 = vector.shape_cast %48 : vector<8x8x16xf32> to vector<64x16xf32>
    %c2_52 = arith.constant 2 : index
    %c0_53 = arith.constant 0 : index
    %c1_54 = arith.constant 1 : index
    %c0_55 = arith.constant 0 : index
    %50 = vector.load %arg9[%c2_52, %c0_53, %c1_54, %c0_55] : memref<4x10x10x16xf32, #tpu.memory_space<vmem>>, vector<1x8x8x16xf32>
    %51 = vector.shape_cast %50 : vector<1x8x8x16xf32> to vector<8x8x16xf32>
    %52 = vector.shape_cast %51 : vector<8x8x16xf32> to vector<64x16xf32>
    %c3_56 = arith.constant 3 : index
    %c0_57 = arith.constant 0 : index
    %c1_58 = arith.constant 1 : index
    %c0_59 = arith.constant 0 : index
    %53 = vector.load %arg9[%c3_56, %c0_57, %c1_58, %c0_59] : memref<4x10x10x16xf32, #tpu.memory_space<vmem>>, vector<1x8x8x16xf32>
    %54 = vector.shape_cast %53 : vector<1x8x8x16xf32> to vector<8x8x16xf32>
    %55 = vector.shape_cast %54 : vector<8x8x16xf32> to vector<64x16xf32>
    %c1_60 = arith.constant 1 : index
    %c1_61 = arith.constant 1 : index
    %c0_62 = arith.constant 0 : index
    %c0_63 = arith.constant 0 : index
    %56 = vector.load %arg9[%c1_60, %c1_61, %c0_62, %c0_63] : memref<4x10x10x16xf32, #tpu.memory_space<vmem>>, vector<1x8x8x16xf32>
    %57 = vector.shape_cast %56 : vector<1x8x8x16xf32> to vector<8x8x16xf32>
    %58 = vector.shape_cast %57 : vector<8x8x16xf32> to vector<64x16xf32>
    %c0_64 = arith.constant 0 : index
    %c1_65 = arith.constant 1 : index
    %c1_66 = arith.constant 1 : index
    %c0_67 = arith.constant 0 : index
    %59 = vector.load %arg9[%c0_64, %c1_65, %c1_66, %c0_67] : memref<4x10x10x16xf32, #tpu.memory_space<vmem>>, vector<1x8x8x16xf32>
    %60 = vector.shape_cast %59 : vector<1x8x8x16xf32> to vector<8x8x16xf32>
    %61 = vector.shape_cast %60 : vector<8x8x16xf32> to vector<64x16xf32>
    %c1_68 = arith.constant 1 : index
    %c1_69 = arith.constant 1 : index
    %c1_70 = arith.constant 1 : index
    %c0_71 = arith.constant 0 : index
    %62 = vector.load %arg9[%c1_68, %c1_69, %c1_70, %c0_71] : memref<4x10x10x16xf32, #tpu.memory_space<vmem>>, vector<1x8x8x16xf32>
    %63 = vector.shape_cast %62 : vector<1x8x8x16xf32> to vector<8x8x16xf32>
    %64 = vector.shape_cast %63 : vector<8x8x16xf32> to vector<64x16xf32>
    %c3_72 = arith.constant 3 : index
    %c1_73 = arith.constant 1 : index
    %c0_74 = arith.constant 0 : index
    %c0_75 = arith.constant 0 : index
    %65 = vector.load %arg9[%c3_72, %c1_73, %c0_74, %c0_75] : memref<4x10x10x16xf32, #tpu.memory_space<vmem>>, vector<1x8x8x16xf32>
    %66 = vector.shape_cast %65 : vector<1x8x8x16xf32> to vector<8x8x16xf32>
    %67 = vector.shape_cast %66 : vector<8x8x16xf32> to vector<64x16xf32>
    %c2_76 = arith.constant 2 : index
    %c1_77 = arith.constant 1 : index
    %c1_78 = arith.constant 1 : index
    %c0_79 = arith.constant 0 : index
    %68 = vector.load %arg9[%c2_76, %c1_77, %c1_78, %c0_79] : memref<4x10x10x16xf32, #tpu.memory_space<vmem>>, vector<1x8x8x16xf32>
    %69 = vector.shape_cast %68 : vector<1x8x8x16xf32> to vector<8x8x16xf32>
    %70 = vector.shape_cast %69 : vector<8x8x16xf32> to vector<64x16xf32>
    %c3_80 = arith.constant 3 : index
    %c1_81 = arith.constant 1 : index
    %c1_82 = arith.constant 1 : index
    %c0_83 = arith.constant 0 : index
    %71 = vector.load %arg9[%c3_80, %c1_81, %c1_82, %c0_83] : memref<4x10x10x16xf32, #tpu.memory_space<vmem>>, vector<1x8x8x16xf32>
    %72 = vector.shape_cast %71 : vector<1x8x8x16xf32> to vector<8x8x16xf32>
    %73 = vector.shape_cast %72 : vector<8x8x16xf32> to vector<64x16xf32>
    %74 = tpu.concatenate %49, %52, %55, %58, %61, %64, %67, %70, %73 in 1 : vector<64x16xf32>, vector<64x16xf32>, vector<64x16xf32>, vector<64x16xf32>, vector<64x16xf32>, vector<64x16xf32>, vector<64x16xf32>, vector<64x16xf32>, vector<64x16xf32> -> vector<64x144xf32>
    %c2_84 = arith.constant 2 : index
    %c0_85 = arith.constant 0 : index
    %c1_86 = arith.constant 1 : index
    %c0_87 = arith.constant 0 : index
    %75 = vector.load %arg9[%c2_84, %c0_85, %c1_86, %c0_87] : memref<4x10x10x16xf32, #tpu.memory_space<vmem>>, vector<1x8x8x16xf32>
    %76 = vector.shape_cast %75 : vector<1x8x8x16xf32> to vector<8x8x16xf32>
    %77 = vector.shape_cast %76 : vector<8x8x16xf32> to vector<64x16xf32>
    %c3_88 = arith.constant 3 : index
    %c0_89 = arith.constant 0 : index
    %c1_90 = arith.constant 1 : index
    %c0_91 = arith.constant 0 : index
    %78 = vector.load %arg9[%c3_88, %c0_89, %c1_90, %c0_91] : memref<4x10x10x16xf32, #tpu.memory_space<vmem>>, vector<1x8x8x16xf32>
    %79 = vector.shape_cast %78 : vector<1x8x8x16xf32> to vector<8x8x16xf32>
    %80 = vector.shape_cast %79 : vector<8x8x16xf32> to vector<64x16xf32>
    %c2_92 = arith.constant 2 : index
    %c0_93 = arith.constant 0 : index
    %c2_94 = arith.constant 2 : index
    %c0_95 = arith.constant 0 : index
    %81 = vector.load %arg9[%c2_92, %c0_93, %c2_94, %c0_95] : memref<4x10x10x16xf32, #tpu.memory_space<vmem>>, vector<1x8x8x16xf32>
    %82 = vector.shape_cast %81 : vector<1x8x8x16xf32> to vector<8x8x16xf32>
    %83 = vector.shape_cast %82 : vector<8x8x16xf32> to vector<64x16xf32>
    %c0_96 = arith.constant 0 : index
    %c1_97 = arith.constant 1 : index
    %c1_98 = arith.constant 1 : index
    %c0_99 = arith.constant 0 : index
    %84 = vector.load %arg9[%c0_96, %c1_97, %c1_98, %c0_99] : memref<4x10x10x16xf32, #tpu.memory_space<vmem>>, vector<1x8x8x16xf32>
    %85 = vector.shape_cast %84 : vector<1x8x8x16xf32> to vector<8x8x16xf32>
    %86 = vector.shape_cast %85 : vector<8x8x16xf32> to vector<64x16xf32>
    %c1_100 = arith.constant 1 : index
    %c1_101 = arith.constant 1 : index
    %c1_102 = arith.constant 1 : index
    %c0_103 = arith.constant 0 : index
    %87 = vector.load %arg9[%c1_100, %c1_101, %c1_102, %c0_103] : memref<4x10x10x16xf32, #tpu.memory_space<vmem>>, vector<1x8x8x16xf32>
    %88 = vector.shape_cast %87 : vector<1x8x8x16xf32> to vector<8x8x16xf32>
    %89 = vector.shape_cast %88 : vector<8x8x16xf32> to vector<64x16xf32>
    %c0_104 = arith.constant 0 : index
    %c1_105 = arith.constant 1 : index
    %c2_106 = arith.constant 2 : index
    %c0_107 = arith.constant 0 : index
    %90 = vector.load %arg9[%c0_104, %c1_105, %c2_106, %c0_107] : memref<4x10x10x16xf32, #tpu.memory_space<vmem>>, vector<1x8x8x16xf32>
    %91 = vector.shape_cast %90 : vector<1x8x8x16xf32> to vector<8x8x16xf32>
    %92 = vector.shape_cast %91 : vector<8x8x16xf32> to vector<64x16xf32>
    %c2_108 = arith.constant 2 : index
    %c1_109 = arith.constant 1 : index
    %c1_110 = arith.constant 1 : index
    %c0_111 = arith.constant 0 : index
    %93 = vector.load %arg9[%c2_108, %c1_109, %c1_110, %c0_111] : memref<4x10x10x16xf32, #tpu.memory_space<vmem>>, vector<1x8x8x16xf32>
    %94 = vector.shape_cast %93 : vector<1x8x8x16xf32> to vector<8x8x16xf32>
    %95 = vector.shape_cast %94 : vector<8x8x16xf32> to vector<64x16xf32>
    %c3_112 = arith.constant 3 : index
    %c1_113 = arith.constant 1 : index
    %c1_114 = arith.constant 1 : index
    %c0_115 = arith.constant 0 : index
    %96 = vector.load %arg9[%c3_112, %c1_113, %c1_114, %c0_115] : memref<4x10x10x16xf32, #tpu.memory_space<vmem>>, vector<1x8x8x16xf32>
    %97 = vector.shape_cast %96 : vector<1x8x8x16xf32> to vector<8x8x16xf32>
    %98 = vector.shape_cast %97 : vector<8x8x16xf32> to vector<64x16xf32>
    %c2_116 = arith.constant 2 : index
    %c1_117 = arith.constant 1 : index
    %c2_118 = arith.constant 2 : index
    %c0_119 = arith.constant 0 : index
    %99 = vector.load %arg9[%c2_116, %c1_117, %c2_118, %c0_119] : memref<4x10x10x16xf32, #tpu.memory_space<vmem>>, vector<1x8x8x16xf32>
    %100 = vector.shape_cast %99 : vector<1x8x8x16xf32> to vector<8x8x16xf32>
    %101 = vector.shape_cast %100 : vector<8x8x16xf32> to vector<64x16xf32>
    %102 = tpu.concatenate %77, %80, %83, %86, %89, %92, %95, %98, %101 in 1 : vector<64x16xf32>, vector<64x16xf32>, vector<64x16xf32>, vector<64x16xf32>, vector<64x16xf32>, vector<64x16xf32>, vector<64x16xf32>, vector<64x16xf32>, vector<64x16xf32> -> vector<64x144xf32>
    %c1_120 = arith.constant 1 : index
    %c1_121 = arith.constant 1 : index
    %c0_122 = arith.constant 0 : index
    %c0_123 = arith.constant 0 : index
    %103 = vector.load %arg9[%c1_120, %c1_121, %c0_122, %c0_123] : memref<4x10x10x16xf32, #tpu.memory_space<vmem>>, vector<1x8x8x16xf32>
    %104 = vector.shape_cast %103 : vector<1x8x8x16xf32> to vector<8x8x16xf32>
    %105 = vector.shape_cast %104 : vector<8x8x16xf32> to vector<64x16xf32>
    %c0_124 = arith.constant 0 : index
    %c1_125 = arith.constant 1 : index
    %c1_126 = arith.constant 1 : index
    %c0_127 = arith.constant 0 : index
    %106 = vector.load %arg9[%c0_124, %c1_125, %c1_126, %c0_127] : memref<4x10x10x16xf32, #tpu.memory_space<vmem>>, vector<1x8x8x16xf32>
    %107 = vector.shape_cast %106 : vector<1x8x8x16xf32> to vector<8x8x16xf32>
    %108 = vector.shape_cast %107 : vector<8x8x16xf32> to vector<64x16xf32>
    %c1_128 = arith.constant 1 : index
    %c1_129 = arith.constant 1 : index
    %c1_130 = arith.constant 1 : index
    %c0_131 = arith.constant 0 : index
    %109 = vector.load %arg9[%c1_128, %c1_129, %c1_130, %c0_131] : memref<4x10x10x16xf32, #tpu.memory_space<vmem>>, vector<1x8x8x16xf32>
    %110 = vector.shape_cast %109 : vector<1x8x8x16xf32> to vector<8x8x16xf32>
    %111 = vector.shape_cast %110 : vector<8x8x16xf32> to vector<64x16xf32>
    %c3_132 = arith.constant 3 : index
    %c1_133 = arith.constant 1 : index
    %c0_134 = arith.constant 0 : index
    %c0_135 = arith.constant 0 : index
    %112 = vector.load %arg9[%c3_132, %c1_133, %c0_134, %c0_135] : memref<4x10x10x16xf32, #tpu.memory_space<vmem>>, vector<1x8x8x16xf32>
    %113 = vector.shape_cast %112 : vector<1x8x8x16xf32> to vector<8x8x16xf32>
    %114 = vector.shape_cast %113 : vector<8x8x16xf32> to vector<64x16xf32>
    %c2_136 = arith.constant 2 : index
    %c1_137 = arith.constant 1 : index
    %c1_138 = arith.constant 1 : index
    %c0_139 = arith.constant 0 : index
    %115 = vector.load %arg9[%c2_136, %c1_137, %c1_138, %c0_139] : memref<4x10x10x16xf32, #tpu.memory_space<vmem>>, vector<1x8x8x16xf32>
    %116 = vector.shape_cast %115 : vector<1x8x8x16xf32> to vector<8x8x16xf32>
    %117 = vector.shape_cast %116 : vector<8x8x16xf32> to vector<64x16xf32>
    %c3_140 = arith.constant 3 : index
    %c1_141 = arith.constant 1 : index
    %c1_142 = arith.constant 1 : index
    %c0_143 = arith.constant 0 : index
    %118 = vector.load %arg9[%c3_140, %c1_141, %c1_142, %c0_143] : memref<4x10x10x16xf32, #tpu.memory_space<vmem>>, vector<1x8x8x16xf32>
    %119 = vector.shape_cast %118 : vector<1x8x8x16xf32> to vector<8x8x16xf32>
    %120 = vector.shape_cast %119 : vector<8x8x16xf32> to vector<64x16xf32>
    %c1_144 = arith.constant 1 : index
    %c2_145 = arith.constant 2 : index
    %c0_146 = arith.constant 0 : index
    %c0_147 = arith.constant 0 : index
    %121 = vector.load %arg9[%c1_144, %c2_145, %c0_146, %c0_147] : memref<4x10x10x16xf32, #tpu.memory_space<vmem>>, vector<1x8x8x16xf32>
    %122 = vector.shape_cast %121 : vector<1x8x8x16xf32> to vector<8x8x16xf32>
    %123 = vector.shape_cast %122 : vector<8x8x16xf32> to vector<64x16xf32>
    %c0_148 = arith.constant 0 : index
    %c2_149 = arith.constant 2 : index
    %c1_150 = arith.constant 1 : index
    %c0_151 = arith.constant 0 : index
    %124 = vector.load %arg9[%c0_148, %c2_149, %c1_150, %c0_151] : memref<4x10x10x16xf32, #tpu.memory_space<vmem>>, vector<1x8x8x16xf32>
    %125 = vector.shape_cast %124 : vector<1x8x8x16xf32> to vector<8x8x16xf32>
    %126 = vector.shape_cast %125 : vector<8x8x16xf32> to vector<64x16xf32>
    %c1_152 = arith.constant 1 : index
    %c2_153 = arith.constant 2 : index
    %c1_154 = arith.constant 1 : index
    %c0_155 = arith.constant 0 : index
    %127 = vector.load %arg9[%c1_152, %c2_153, %c1_154, %c0_155] : memref<4x10x10x16xf32, #tpu.memory_space<vmem>>, vector<1x8x8x16xf32>
    %128 = vector.shape_cast %127 : vector<1x8x8x16xf32> to vector<8x8x16xf32>
    %129 = vector.shape_cast %128 : vector<8x8x16xf32> to vector<64x16xf32>
    %130 = tpu.concatenate %105, %108, %111, %114, %117, %120, %123, %126, %129 in 1 : vector<64x16xf32>, vector<64x16xf32>, vector<64x16xf32>, vector<64x16xf32>, vector<64x16xf32>, vector<64x16xf32>, vector<64x16xf32>, vector<64x16xf32>, vector<64x16xf32> -> vector<64x144xf32>
    %c0_156 = arith.constant 0 : index
    %c1_157 = arith.constant 1 : index
    %c1_158 = arith.constant 1 : index
    %c0_159 = arith.constant 0 : index
    %131 = vector.load %arg9[%c0_156, %c1_157, %c1_158, %c0_159] : memref<4x10x10x16xf32, #tpu.memory_space<vmem>>, vector<1x8x8x16xf32>
    %132 = vector.shape_cast %131 : vector<1x8x8x16xf32> to vector<8x8x16xf32>
    %133 = vector.shape_cast %132 : vector<8x8x16xf32> to vector<64x16xf32>
    %c1_160 = arith.constant 1 : index
    %c1_161 = arith.constant 1 : index
    %c1_162 = arith.constant 1 : index
    %c0_163 = arith.constant 0 : index
    %134 = vector.load %arg9[%c1_160, %c1_161, %c1_162, %c0_163] : memref<4x10x10x16xf32, #tpu.memory_space<vmem>>, vector<1x8x8x16xf32>
    %135 = vector.shape_cast %134 : vector<1x8x8x16xf32> to vector<8x8x16xf32>
    %136 = vector.shape_cast %135 : vector<8x8x16xf32> to vector<64x16xf32>
    %c0_164 = arith.constant 0 : index
    %c1_165 = arith.constant 1 : index
    %c2_166 = arith.constant 2 : index
    %c0_167 = arith.constant 0 : index
    %137 = vector.load %arg9[%c0_164, %c1_165, %c2_166, %c0_167] : memref<4x10x10x16xf32, #tpu.memory_space<vmem>>, vector<1x8x8x16xf32>
    %138 = vector.shape_cast %137 : vector<1x8x8x16xf32> to vector<8x8x16xf32>
    %139 = vector.shape_cast %138 : vector<8x8x16xf32> to vector<64x16xf32>
    %c2_168 = arith.constant 2 : index
    %c1_169 = arith.constant 1 : index
    %c1_170 = arith.constant 1 : index
    %c0_171 = arith.constant 0 : index
    %140 = vector.load %arg9[%c2_168, %c1_169, %c1_170, %c0_171] : memref<4x10x10x16xf32, #tpu.memory_space<vmem>>, vector<1x8x8x16xf32>
    %141 = vector.shape_cast %140 : vector<1x8x8x16xf32> to vector<8x8x16xf32>
    %142 = vector.shape_cast %141 : vector<8x8x16xf32> to vector<64x16xf32>
    %c3_172 = arith.constant 3 : index
    %c1_173 = arith.constant 1 : index
    %c1_174 = arith.constant 1 : index
    %c0_175 = arith.constant 0 : index
    %143 = vector.load %arg9[%c3_172, %c1_173, %c1_174, %c0_175] : memref<4x10x10x16xf32, #tpu.memory_space<vmem>>, vector<1x8x8x16xf32>
    %144 = vector.shape_cast %143 : vector<1x8x8x16xf32> to vector<8x8x16xf32>
    %145 = vector.shape_cast %144 : vector<8x8x16xf32> to vector<64x16xf32>
    %c2_176 = arith.constant 2 : index
    %c1_177 = arith.constant 1 : index
    %c2_178 = arith.constant 2 : index
    %c0_179 = arith.constant 0 : index
    %146 = vector.load %arg9[%c2_176, %c1_177, %c2_178, %c0_179] : memref<4x10x10x16xf32, #tpu.memory_space<vmem>>, vector<1x8x8x16xf32>
    %147 = vector.shape_cast %146 : vector<1x8x8x16xf32> to vector<8x8x16xf32>
    %148 = vector.shape_cast %147 : vector<8x8x16xf32> to vector<64x16xf32>
    %c0_180 = arith.constant 0 : index
    %c2_181 = arith.constant 2 : index
    %c1_182 = arith.constant 1 : index
    %c0_183 = arith.constant 0 : index
    %149 = vector.load %arg9[%c0_180, %c2_181, %c1_182, %c0_183] : memref<4x10x10x16xf32, #tpu.memory_space<vmem>>, vector<1x8x8x16xf32>
    %150 = vector.shape_cast %149 : vector<1x8x8x16xf32> to vector<8x8x16xf32>
    %151 = vector.shape_cast %150 : vector<8x8x16xf32> to vector<64x16xf32>
    %c1_184 = arith.constant 1 : index
    %c2_185 = arith.constant 2 : index
    %c1_186 = arith.constant 1 : index
    %c0_187 = arith.constant 0 : index
    %152 = vector.load %arg9[%c1_184, %c2_185, %c1_186, %c0_187] : memref<4x10x10x16xf32, #tpu.memory_space<vmem>>, vector<1x8x8x16xf32>
    %153 = vector.shape_cast %152 : vector<1x8x8x16xf32> to vector<8x8x16xf32>
    %154 = vector.shape_cast %153 : vector<8x8x16xf32> to vector<64x16xf32>
    %c0_188 = arith.constant 0 : index
    %c2_189 = arith.constant 2 : index
    %c2_190 = arith.constant 2 : index
    %c0_191 = arith.constant 0 : index
    %155 = vector.load %arg9[%c0_188, %c2_189, %c2_190, %c0_191] : memref<4x10x10x16xf32, #tpu.memory_space<vmem>>, vector<1x8x8x16xf32>
    %156 = vector.shape_cast %155 : vector<1x8x8x16xf32> to vector<8x8x16xf32>
    %157 = vector.shape_cast %156 : vector<8x8x16xf32> to vector<64x16xf32>
    %158 = tpu.concatenate %133, %136, %139, %142, %145, %148, %151, %154, %157 in 1 : vector<64x16xf32>, vector<64x16xf32>, vector<64x16xf32>, vector<64x16xf32>, vector<64x16xf32>, vector<64x16xf32>, vector<64x16xf32>, vector<64x16xf32>, vector<64x16xf32> -> vector<64x144xf32>
    %159 = tpu.concatenate %74, %102, %130, %158 in 0 : vector<64x144xf32>, vector<64x144xf32>, vector<64x144xf32>, vector<64x144xf32> -> vector<256x144xf32>
    %160 = arith.truncf %159 : vector<256x144xf32> to vector<256x144xbf16>
    %c0_192 = arith.constant 0 : index
    %c0_193 = arith.constant 0 : index
    %161 = vector.load %arg5[%c0_192, %c0_193] : memref<144x8xbf16, #tpu.memory_space<vmem>>, vector<144x8xbf16>
    %cst_194 = arith.constant dense<0.000000e+00> : vector<256x8xf32>
    %162 = tpu.matmul %160, %161, %cst_194 {dimension_numbers = #tpu.dot_dimension_numbers<[1], [0], [0], [1], [0, 0, 1, 1], [], []>} : vector<256x144xbf16>, vector<144x8xbf16>, vector<256x8xf32> -> vector<256x8xf32>
    %c0_195 = arith.constant 0 : index
    %c0_196 = arith.constant 0 : index
    %163 = vector.load %arg6[%c0_195, %c0_196] : memref<1x8xf32, #tpu.memory_space<vmem>>, vector<1x8xf32>
    %164 = vector.broadcast %163 : vector<1x8xf32> to vector<256x8xf32>
    %165 = arith.addf %162, %164 : vector<256x8xf32>
    %166 = vector.extract_strided_slice %165 {offsets = [0, 0], sizes = [64, 8], strides = [1, 1]} : vector<256x8xf32> to vector<64x8xf32>
    %167 = vector.extract_strided_slice %165 {offsets = [64, 0], sizes = [64, 8], strides = [1, 1]} : vector<256x8xf32> to vector<64x8xf32>
    %168 = vector.extract_strided_slice %165 {offsets = [128, 0], sizes = [64, 8], strides = [1, 1]} : vector<256x8xf32> to vector<64x8xf32>
    %169 = vector.extract_strided_slice %165 {offsets = [192, 0], sizes = [64, 8], strides = [1, 1]} : vector<256x8xf32> to vector<64x8xf32>
    %170 = tpu.concatenate %166, %167, %168, %169 in 1 : vector<64x8xf32>, vector<64x8xf32>, vector<64x8xf32>, vector<64x8xf32> -> vector<64x32xf32>
    %c0_197 = arith.constant 0 : index
    %c0_198 = arith.constant 0 : index
    %c0_199 = arith.constant 0 : index
    %171 = vector.load %arg7[%c0_197, %c0_198, %c0_199] : memref<1x64x32xf32, #tpu.memory_space<vmem>>, vector<1x64x32xf32>
    %172 = vector.shape_cast %171 : vector<1x64x32xf32> to vector<64x32xf32>
    %173 = vector.shape_cast %170 : vector<64x32xf32> to vector<1x64x32xf32>
    tpu.vector_store %arg7[%c0_197, %c0_198, %c0_199], %173 {strides = array<i32>} : memref<1x64x32xf32, #tpu.memory_space<vmem>>, vector<1x64x32xf32>,
    %cst_200 = arith.constant dense<0.000000e+00> : vector<8xf32>
    %174 = vector.multi_reduction <add>, %165, %cst_200 [0] : vector<256x8xf32> to vector<8xf32>
    %175 = vector.shape_cast %174 : vector<8xf32> to vector<1x8xf32>
    %cst_201 = arith.constant 3.906250e-03 : f32
    %176 = vector.broadcast %cst_201 : f32 to vector<1x8xf32>
    %177 = arith.mulf %175, %176 : vector<1x8xf32>
    %178 = vector.broadcast %177 : vector<1x8xf32> to vector<256x8xf32>
    %179 = arith.subf %165, %178 : vector<256x8xf32>
    %180 = arith.mulf %179, %179 : vector<256x8xf32>
    %cst_202 = arith.constant dense<0.000000e+00> : vector<8xf32>
    %181 = vector.multi_reduction <add>, %180, %cst_202 [0] : vector<256x8xf32> to vector<8xf32>
    %182 = vector.shape_cast %181 : vector<8xf32> to vector<1x8xf32>
    %183 = tpu.concatenate %177, %182 in 0 : vector<1x8xf32>, vector<1x8xf32> -> vector<2x8xf32>
    %c0_203 = arith.constant 0 : index
    %c0_204 = arith.constant 0 : index
    %c0_205 = arith.constant 0 : index
    %184 = vector.load %arg8[%c0_203, %c0_204, %c0_205] : memref<1x2x8xf32, #tpu.memory_space<vmem>>, vector<1x2x8xf32>
    %185 = vector.shape_cast %184 : vector<1x2x8xf32> to vector<2x8xf32>
    %186 = vector.shape_cast %183 : vector<2x8xf32> to vector<1x2x8xf32>
    tpu.vector_store %arg8[%c0_203, %c0_204, %c0_205], %186 {strides = array<i32>} : memref<1x2x8xf32, #tpu.memory_space<vmem>>, vector<1x2x8xf32>,
    return
  }
  func.func @transform_0(%arg0: i32) -> (i32, i32, i32) {
    %c0_i32 = arith.constant 0 : i32
    %c0_i32_0 = arith.constant 0 : i32
    %c0_i32_1 = arith.constant 0 : i32
    return %arg0, %c0_i32, %c0_i32_0 : i32, i32, i32
  }
  func.func @transform_1(%arg0: i32) -> (i32, i32, i32, i32, i32) {
    %c0_i32 = arith.constant 0 : i32
    %c0_i32_0 = arith.constant 0 : i32
    %c0_i32_1 = arith.constant 0 : i32
    %c0_i32_2 = arith.constant 0 : i32
    %c0_i32_3 = arith.constant 0 : i32
    return %arg0, %c0_i32, %c0_i32_0, %c0_i32_1, %c0_i32_2 : i32, i32, i32, i32, i32
  }
  func.func @transform_2(%arg0: i32) -> (i32, i32) {
    %c0_i32 = arith.constant 0 : i32
    %c0_i32_0 = arith.constant 0 : i32
    %c0_i32_1 = arith.constant 0 : i32
    return %c0_i32, %c0_i32_0 : i32, i32
  }
  func.func @transform_3(%arg0: i32) -> (i32, i32) {
    %c0_i32 = arith.constant 0 : i32
    %c0_i32_0 = arith.constant 0 : i32
    %c0_i32_1 = arith.constant 0 : i32
    return %c0_i32, %c0_i32_0 : i32, i32
  }
  func.func @transform_4(%arg0: i32) -> (i32, i32) {
    %c0_i32 = arith.constant 0 : i32
    %c0_i32_0 = arith.constant 0 : i32
    %c0_i32_1 = arith.constant 0 : i32
    return %c0_i32, %c0_i32_0 : i32, i32
  }
  func.func @transform_5(%arg0: i32) -> (i32, i32) {
    %c0_i32 = arith.constant 0 : i32
    %c0_i32_0 = arith.constant 0 : i32
    %c0_i32_1 = arith.constant 0 : i32
    return %c0_i32, %c0_i32_0 : i32, i32
  }
  func.func @transform_6(%arg0: i32) -> (i32, i32, i32) {
    %c0_i32 = arith.constant 0 : i32
    %c0_i32_0 = arith.constant 0 : i32
    %c0_i32_1 = arith.constant 0 : i32
    return %arg0, %c0_i32, %c0_i32_0 : i32, i32, i32
  }
  func.func @transform_7(%arg0: i32) -> (i32, i32, i32) {
    %c0_i32 = arith.constant 0 : i32
    %c0_i32_0 = arith.constant 0 : i32
    %c0_i32_1 = arith.constant 0 : i32
    return %arg0, %c0_i32, %c0_i32_0 : i32, i32, i32
  }
}

</mosaic_0001>

<bundles_post_ra>
// kernel: tile.9
= control target key start
LH: loop header
LB: loop body
LE: loop exit
PB: predicated region body
PF: predicated region fallthrough
CT: control target
= control target key end

     0   :  { %vm7_vm0 = vcmask 64512   ;;  %s37_s8 = smov 8   ;;  %s38_s9 = smov 16   ;;  %vm13_vm1 = vcmask 261312   ;;  %vm19_vm2 = vcmask 195712   ;;  %vm25_vm3 = vcmask 130112   ;;  %s55_s0 = inlined_call_operand.vmem [shape: f32[4,8], index: 0, kind: input, shape index: {}]   ;;  %s56_s1 = inlined_call_operand.vmem [shape: f32[1,32], index: 1, kind: output, shape index: {}]  }
   0x1   :  { %v4_v0 = vld [vmem:[%s55_s0] sm:$0xf]  ;;  %s36_s0 = smov 24  }
   0x2   :  { %5 = vst [vmem:[#allocation1] sm:$0xf] %v4_v0 }
   0x9   :  { %v10_v1 = vld [vmem:[#allocation1 + $0x3] sm:$0x1]   ;;  %v22_v2 = vld [vmem:[#allocation1 + $0x1] sm:$0x1]   ;;  %v6_v3 = vld [vmem:[#allocation1] sm:$0x1]  }
   0xa   :  { %11 = vrot.lane.b32.xlu0 %v10_v1, %s36_s0  ;;  %23 = vrot.lane.b32.xlu1 %v22_v2, %s37_s8  ;;  %v16_v4 = vld [vmem:[#allocation1 + $0x2] sm:$0x1]   ;;  %8 = vst.msk [vmem:[#allocation0] sm:$0x1] %vm7_vm0, %v6_v3  }
   0xe   :  { %17 = vrot.lane.b32.xlu0 %v16_v4, %s38_s9 }
  0x7c   :  { %v12_v5 = vpop.permute.xlu0 %11   ;;  %v24_v6 = vpop.permute.xlu1 %23  }
  0x7d   :  { %14 = vst.msk [vmem:[#allocation0] sm:$0x1] %vm13_vm1, %v12_v5  }
  0x80   :  { %v18_v7 = vpop.permute.xlu0 %17  }
  0x81   :  { %20 = vst.msk [vmem:[#allocation0] sm:$0x1] %vm19_vm2, %v18_v7  }
  0x82   :  { %26 = vst.msk [vmem:[#allocation0] sm:$0x1] %vm25_vm3, %v24_v6  }
  0x89   :  { %v30_v8 = vld [vmem:[#allocation0] sm:$0x1] }
  0x8a   :  { %32 = vst [vmem:[%s56_s1] sm:$0x1] %v30_v8 }

// kernel: tile.8
= control target key start
LH: loop header
LB: loop body
LE: loop exit
PB: predicated region body
PF: predicated region fallthrough
CT: control target
= control target key end

     0   :  { %s22_s0 = inlined_call_operand.vmem [shape: f32[8], index: 0, kind: input, shape index: {}]   ;;  %s23_s1 = inlined_call_operand.vmem [shape: f32[4,8], index: 1, kind: output, shape index: {}]  }
   0x1   :  { %v4_v0 = vld [vmem:[%s22_s0] ss:$0 sm:$0xff] }
   0x2   :  { %5 = vst [vmem:[%s23_s1] sm:$0xf] %v4_v0 }

// kernel: decoder_forward.1
= control target key start
LH: loop header
LB: loop body
LE: loop exit
PB: predicated region body
PF: predicated region fallthrough
CT: control target
= control target key end

     0   :  { %s3624_s24 = smov 0   ;;  %s5555_s0 = inlined_call_operand.vmem [shape: bf16[2,64,8], index: 0, kind: input, shape index: {}]   ;;  %s5556_s1 = inlined_call_operand.vmem [shape: f32[2,4,8,8,8], index: 1, kind: input, shape index: {}]   ;;  %s5557_s2 = inlined_call_operand.vmem [shape: bf16[8,32], index: 2, kind: input, shape index: {}]   ;;  %s5558_s3 = inlined_call_operand.vmem [shape: f32[1,32], index: 3, kind: input, shape index: {}]   ;;  %s5559_s4 = inlined_call_operand.vmem [shape: bf16[144,8], index: 4, kind: input, shape index: {}]   ;;  %s5560_s5 = inlined_call_operand.vmem [shape: f32[1,8], index: 5, kind: input, shape index: {}]   ;;  %s5561_s6 = inlined_call_operand.vmem [shape: f32[2,64,32], index: 6, kind: output, shape index: {0}]   ;;  %s5562_s7 = inlined_call_operand.vmem [shape: f32[2,2,8], index: 7, kind: output, shape index: {1}]  }
   0x1 LB: > { %s2851_s25 = sadd.s32 4294967295, %s3569_s24   ;;  %p2855_p0 = scmp.ge.s32.totalorder %s3569_s24, 1  ;;  %s3569_s24 = sphi %s3624_s24, %s18_s24  }
   0x2   : > { %p250_p1 = scmp.lt.s32.totalorder %s3569_s24, 3 }
   0x4   : > { %p251_p2 = pnand %p2855_p0, %p250_p1 }
   0x6   : > { %254 = sbr.rel (%p251_p2) target bundleno = 1029 (0x405), region = 44 }
   0xd   : > { %v319_v0 = vld [vmem:[%s5557_s2] sm:$0xf]  ;;  %vm360_vm0 = vcmask 1043456   ;;  %p291_p3 = scmp.lt.s32.totalorder %s2851_s25, 1  ;;  %vm347_vm1 = vcmask 64512   ;;  %s3571_s13 = smov 8  }
   0xe   : > { %2960 = vmatprep.subr.msk.bf16.mxu0 %vm360_vm0, %v319_v0  ;;  %v362_v1 = vsel %vm360_vm0, %v319_v0, 0  ;;  %vm429_vm2 = vcmask 130048   ;;  %vm431_vm3 = vcmask 123904   ;;  %v3572_v38 = vmov 0.0   ;;  %v2863_v41 = vld [vmem:[%s5558_s3] ss:$0 sm:$0xff] }
   0xf   : > { %2933 = vmatpush3.bf16.msra.mxu0 %v362_v1  ;;  %s5722_s25 = smov (!%p291_p3, %s2851_s25), 1  ;;  %435 = vst.msk [vmem:[#allocation2 + $0x140] sm:$0xff] %vm429_vm2, %v3572_v38  ;;  %437 = vst.msk [vmem:[#allocation2 + $0x1e0] sm:$0xff] %vm429_vm2, %v3572_v38  ;;  %vm520_vm4 = vcmask 1040384   ;;  %s3573_s16 = smov 120   ;;  %vm1258_vm5 = vcmask 261120  }
  0x10   : > { %s2924_s28 = sshll.u32 %s5722_s25, 5  ;;  %s2925_s29 = sshll.u32 %s5722_s25, 8  ;;  %436 = vst.msk [vmem:[#allocation2 + $0x148] sm:$0x3] %vm431_vm3, %v3572_v38  ;;  %438 = vst.msk [vmem:[#allocation2 + $0x1e8] sm:$0x3] %vm431_vm3, %v3572_v38 }
  0x11   : > { %s295_s9 = scalar_lea.vmem %s5555_s0, %s2924_s28  ;;  %s3645_s12 = scalar_lea.vmem %s5556_s1, %s2925_s29  ;;  %440 = vst.msk [vmem:[#allocation2 + $0x90] sm:$0xff] %vm429_vm2, %v3572_v38  ;;  %442 = vst.msk [vmem:[#allocation2 + $0x130] sm:$0xff] %vm429_vm2, %v3572_v38  ;;  %vm1267_vm6 = vcmask 392192   ;;  %vm1276_vm7 = vcmask 523264   ;;  %vm1294_vm8 = vcmask 785408   ;;  %vm1285_vm9 = vcmask 654336  }
  0x12   : > { %v3542_v2 = vld [vmem:[%s295_s9] sm:$0xff]   ;;  %v3543_v3 = vld [vmem:[%s295_s9 + $0x8] sm:$0xff]   ;;  %v3544_v4 = vld [vmem:[%s295_s9 + $0x10] sm:$0xff]   ;;  %441 = vst.msk [vmem:[#allocation2 + $0x98] sm:$0x3] %vm431_vm3, %v3572_v38  ;;  %s3574_s17 = smov 112  }
  0x13   : > { %2934 = vmatprep.mubr.msk.bf16.mxu0 %vm347_vm1, %v3542_v2  ;;  %v450_v5 = vld [vmem:[%s3645_s12 + $0x10] sm:$0xff]  ;;  %v448_v6 = vld [vmem:[%s3645_s12] sm:$0xff]  ;;  %v451_v7 = vld [vmem:[%s3645_s12 + $0x18] sm:$0xff]  ;;  %443 = vst.msk [vmem:[#allocation2 + $0x138] sm:$0x3] %vm431_vm3, %v3572_v38  ;;  %s3575_s18 = smov 104  }
  0x14   : > { %2935 = vmatmul.mubr.msk.bf16.vlgmr.msra.gmra.mrb[0].mxu0 %vm347_vm1, %v3543_v3  ;;  %468 = vrot.lane.b32.xlu1 %v450_v5, %s3571_s13  ;;  %v449_v8 = vld [vmem:[%s3645_s12 + $0x8] sm:$0xff]  ;;  %v3545_v9 = vld [vmem:[%s295_s9 + $0x18] sm:$0xff]   ;;  %v452_v10 = vld [vmem:[%s3645_s12 + $0x20] sm:$0xff]  ;;  %s3576_s19 = smov 16   ;;  %s3577_s20 = smov 48   ;;  %vm1303_vm10 = vcmask 916480  }
  0x15   : > { %2938 = vmatprep.mubr.msk.bf16.mxu0 %vm347_vm1, %v3544_v4  ;;  %464 = vrot.lane.b32.xlu0 %v448_v6, %s3571_s13  ;;  %v453_v11 = vld [vmem:[%s3645_s12 + $0x28] sm:$0xff]  ;;  %v455_v12 = vld [vmem:[%s3645_s12 + $0x38] sm:$0xff]  ;;  %v454_v13 = vld [vmem:[%s3645_s12 + $0x30] sm:$0xff]  ;;  %s3578_s21 = smov 64   ;;  %s3579_s22 = smov 80   ;;  %vm2530_vm11 = vcmask 195584  }
  0x16   : > { %v2873_v14 = vld [vmem:[%s3645_s12 + $0x48] sm:$0xff]  ;;  %v2872_v15 = vld [vmem:[%s3645_s12 + $0x40] sm:$0xff]  ;;  %v2875_v16 = vld [vmem:[%s3645_s12 + $0x58] sm:$0xff]  ;;  %s3581_s27 = smov 32   ;;  %s3582_s30 = smov 96   ;;  %vm2751_vm12 = vcmask 58368  }
  0x17   : > { %v2874_v17 = vld [vmem:[%s3645_s12 + $0x50] sm:$0xff]  ;;  %v2877_v18 = vld [vmem:[%s3645_s12 + $0x68] sm:$0xff]  ;;  %v2876_v19 = vld [vmem:[%s3645_s12 + $0x60] sm:$0xff] }
  0x18   : > { %470 = vrot.lane.b32.xlu1 %v451_v7, %s3571_s13  ;;  %v2879_v20 = vld [vmem:[%s3645_s12 + $0x78] sm:$0xff]  ;;  %v2878_v21 = vld [vmem:[%s3645_s12 + $0x70] sm:$0xff]  ;;  %v2881_v22 = vld [vmem:[%s3645_s12 + $0x88] sm:$0xff] }
  0x19   : > { %466 = vrot.lane.b32.xlu0 %v449_v8, %s3571_s13  ;;  %v2880_v23 = vld [vmem:[%s3645_s12 + $0x80] sm:$0xff]  ;;  %v2883_v24 = vld [vmem:[%s3645_s12 + $0x98] sm:$0xff]  ;;  %v2882_v25 = vld [vmem:[%s3645_s12 + $0x90] sm:$0xff] }
  0x1a   : > { %v2885_v26 = vld [vmem:[%s3645_s12 + $0xa8] sm:$0xff]  ;;  %v2884_v27 = vld [vmem:[%s3645_s12 + $0xa0] sm:$0xff]  ;;  %v2886_v31 = vld [vmem:[%s3645_s12 + $0xb0] sm:$0xff] }
  0x1b   : > { %v2888_v28 = vld [vmem:[%s3645_s12 + $0xc0] sm:$0xff]  ;;  %v2893_v29 = vld [vmem:[%s3645_s12 + $0xe8] sm:$0xff]  ;;  %v2890_v32 = vld [vmem:[%s3645_s12 + $0xd0] sm:$0xff] }
  0x1c   : > { %2939 = vmatmul.mubr.msk.bf16.gmra.mrb[4].mxu0 %vm347_vm1, %v3545_v9  ;;  %474 = vrot.lane.b32.xlu1 %v453_v11, %s3571_s13  ;;  %v2889_v30 = vld [vmem:[%s3645_s12 + $0xc8] sm:$0xff]  ;;  %v2891_v33 = vld [vmem:[%s3645_s12 + $0xd8] sm:$0xff]  ;;  %v2892_v34 = vld [vmem:[%s3645_s12 + $0xe0] sm:$0xff] }
  0x1d   : > { %472 = vrot.lane.b32.xlu0 %v452_v10, %s3571_s13  ;;  %v2894_v35 = vld [vmem:[%s3645_s12 + $0xf0] sm:$0xff]  ;;  %v2887_v36 = vld [vmem:[%s3645_s12 + $0xb8] sm:$0xff] }
  0x1e   : > { %v2895_v37 = vld [vmem:[%s3645_s12 + $0xf8] sm:$0xff] }
  0x20   : > { %478 = vrot.lane.b32.xlu1 %v455_v12, %s3571_s13 }
  0x21   : > { %476 = vrot.lane.b32.xlu0 %v454_v13, %s3571_s13 }
  0x24   : > { %605 = vrot.lane.b32.xlu1 %v2873_v14, %s3571_s13 }
  0x25   : > { %603 = vrot.lane.b32.xlu0 %v2872_v15, %s3571_s13 }
  0x28   : > { %609 = vrot.lane.b32.xlu1 %v2875_v16, %s3571_s13 }
  0x29   : > { %607 = vrot.lane.b32.xlu0 %v2874_v17, %s3571_s13 }
  0x2c   : > { %613 = vrot.lane.b32.xlu1 %v2877_v18, %s3571_s13 }
  0x2d   : > { %611 = vrot.lane.b32.xlu0 %v2876_v19, %s3571_s13 }
  0x30   : > { %617 = vrot.lane.b32.xlu1 %v2879_v20, %s3571_s13 }
  0x31   : > { %615 = vrot.lane.b32.xlu0 %v2878_v21, %s3571_s13 }
  0x34   : > { %735 = vrot.lane.b32.xlu1 %v2881_v22, %s3571_s13 }
  0x35   : > { %733 = vrot.lane.b32.xlu0 %v2880_v23, %s3571_s13 }
  0x38   : > { %739 = vrot.lane.b32.xlu1 %v2883_v24, %s3571_s13 }
  0x39   : > { %737 = vrot.lane.b32.xlu0 %v2882_v25, %s3571_s13 }
  0x3c   : > { %743 = vrot.lane.b32.xlu1 %v2885_v26, %s3571_s13 }
  0x3d   : > { %741 = vrot.lane.b32.xlu0 %v2884_v27, %s3571_s13 }
  0x40   : > { %863 = vrot.lane.b32.xlu1 %v2888_v28, %s3571_s13 }
  0x41   : > { %873 = vrot.lane.b32.xlu0 %v2893_v29, %s3571_s13 }
  0x44   : > { %865 = vrot.lane.b32.xlu1 %v2889_v30, %s3571_s13 }
  0x45   : > { %745 = vrot.lane.b32.xlu0 %v2886_v31, %s3571_s13 }
  0x48   : > { %867 = vrot.lane.b32.xlu1 %v2890_v32, %s3571_s13 }
  0x4c   : > { %869 = vrot.lane.b32.xlu1 %v2891_v33, %s3571_s13 }
  0x50   : > { %871 = vrot.lane.b32.xlu1 %v2892_v34, %s3571_s13 }
  0x54   : > { %875 = vrot.lane.b32.xlu1 %v2894_v35, %s3571_s13 }
  0x58   : > { %747 = vrot.lane.b32.xlu1 %v2887_v36, %s3571_s13 }
  0x5c   : > { %877 = vrot.lane.b32.xlu1 %v2895_v37, %s3571_s13 }
  0x86   : > { %v469_v39 = vpop.permute.xlu1 %468 }
  0x87   : > { %v465_v40 = vpop.permute.xlu0 %464 }
  0x8a   : > { %v471_v42 = vpop.permute.xlu1 %470 }
  0x8b   : > { %v467_v44 = vpop.permute.xlu0 %466 }
  0x8e   : > { %v475_v56 = vpop.permute.xlu1 %474 }
  0x8f   : > { %v473_v55 = vpop.permute.xlu0 %472 }
  0x92   : > { %v479_v12 = vpop.permute.xlu1 %478 }
  0x93   : > { %v477_v5 = vpop.permute.xlu0 %476 }
  0xe7   : > { %v2936_v43 = vpop.f32.mrb[0].mxu0 }
  0xe8   : > { %v407_v45 = vadd.f32 %v2936_v43, %v2863_v41  ;;  %v398_v46 = vpop.f32.mrb[1].mxu0 }
  0xe9   : > { %v3726_v47 = vadd.f32 %v2863_v41, %v398_v46  ;;  %v2937_v48 = vpop.f32.mrb[2].mxu0 }
  0xea   : > { %v490_v49 = vsel %vm347_vm1, %v407_v45, %v469_v39  ;;  %v3729_v50 = vadd.f32 %v2937_v48, %v2863_v41  ;;  %575 = vrot.lane.b32.xlu0 %v407_v45, %s3573_s16  ;;  %v401_v51 = vpop.f32.mrb[3].mxu0 }
  0xeb   : > { %v506_v52 = vrot.slane %v490_v49, 7  ;;  %v488_v53 = vsel %vm347_vm1, %v3726_v47, %v465_v40  ;;  %v3734_v54 = vadd.f32 %v2863_v41, %v401_v51 }
  0xec   : > { %v504_v57 = vrot.slane %v488_v53, 7  ;;  %v491_v58 = vsel %vm347_vm1, %v3729_v50, %v471_v42  ;;  %577 = vrot.lane.b32.xlu1 %v3729_v50, %s3573_s16 }
  0xed   : > { %v523_v59 = vsel %vm520_vm4, 0.0, %v506_v52  ;;  %v531_v60 = vsel %vm520_vm4, %v506_v52, 0.0  ;;  %v507_v61 = vrot.slane %v491_v58, 7  ;;  %v489_v62 = vsel %vm347_vm1, %v3734_v54, %v467_v44  ;;  %v3820_v44 = vpop.permute.xlu1 %605 }
  0xee   : > { %542 = vst.msk [vmem:[#allocation2 + $0x30] sm:$0xff] %vm429_vm2, %v523_v59  ;;  %v521_v63 = vsel %vm520_vm4, 0.0, %v504_v57  ;;  %v529_v0 = vsel %vm520_vm4, %v504_v57, 0.0  ;;  %v505_v1 = vrot.slane %v489_v62, 7  ;;  %705 = vrot.lane.b32.xlu0 %v407_v45, %s3574_s17  ;;  %v3860_v59 = vpop.permute.xlu0 %603 }
  0xef   : > { %543 = vst.msk [vmem:[#allocation2 + $0x38] sm:$0x3] %vm431_vm3, %v531_v60  ;;  %539 = vst.msk [vmem:[#allocation2 + $0x18] sm:$0x3] %vm431_vm3, %v529_v0  ;;  %v524_v2 = vsel %vm520_vm4, 0.0, %v507_v61  ;;  %v532_v3 = vsel %vm520_vm4, %v507_v61, 0.0 }
  0xf0   : > { %538 = vst.msk [vmem:[#allocation2 + $0x10] sm:$0xff] %vm429_vm2, %v521_v63  ;;  %v2940_v4 = vpop.f32.mrb[4].mxu0  ;;  %544 = vst.msk [vmem:[#allocation2 + $0x40] sm:$0xff] %vm429_vm2, %v524_v2  ;;  %v522_v6 = vsel %vm520_vm4, 0.0, %v505_v1  ;;  %v530_v7 = vsel %vm520_vm4, %v505_v1, 0.0  ;;  %707 = vrot.lane.b32.xlu1 %v3729_v50, %s3574_s17 }
  0xf1   : > { %545 = vst.msk [vmem:[#allocation2 + $0x48] sm:$0x3] %vm431_vm3, %v532_v3  ;;  %v3757_v8 = vadd.f32 %v2940_v4, %v2863_v41  ;;  %v414_v9 = vpop.f32.mrb[5].mxu0  ;;  %541 = vst.msk [vmem:[#allocation2 + $0x28] sm:$0x3] %vm431_vm3, %v530_v7 }
  0xf2   : > { %540 = vst.msk [vmem:[#allocation2 + $0x20] sm:$0xff] %vm429_vm2, %v522_v6  ;;  %v3763_v10 = vadd.f32 %v2863_v41, %v414_v9  ;;  %v2941_v11 = vpop.f32.mrb[6].mxu0  ;;  %835 = vrot.lane.b32.xlu0 %v407_v45, %s3575_s18  ;;  %v3828_v45 = vpop.permute.xlu1 %609 }
  0xf3   : > { %v3766_v13 = vadd.f32 %v2941_v11, %v2863_v41  ;;  %v417_v14 = vpop.f32.mrb[7].mxu0  ;;  %v494_v15 = vsel %vm347_vm1, %v3757_v8, %v477_v5  ;;  %v608_v62 = vpop.permute.xlu0 %607 }
  0xf4   : > { %v492_v16 = vsel %vm347_vm1, %v3763_v10, %v473_v55  ;;  %v3772_v17 = vadd.f32 %v2863_v41, %v417_v14  ;;  %v510_v18 = vrot.slane %v494_v15, 7  ;;  %573 = vrot.lane.b32.xlu1 %v3734_v54, %s3573_s16 }
  0xf5   : > { %v508_v19 = vrot.slane %v492_v16, 7  ;;  %v495_v20 = vsel %vm347_vm1, %v3766_v13, %v479_v12 }
  0xf6   : > { %v493_v21 = vsel %vm347_vm1, %v3772_v17, %v475_v56  ;;  %v511_v22 = vrot.slane %v495_v20, 7  ;;  %v527_v23 = vsel %vm520_vm4, 0.0, %v510_v18  ;;  %v535_v24 = vsel %vm520_vm4, %v510_v18, 0.0  ;;  %571 = vrot.lane.b32.xlu0 %v3726_v47, %s3573_s16  ;;  %v1322_v30 = vld [vmem:[#allocation2 + $0x32] sm:$0xff]  ;;  %v3835_v49 = vpop.permute.xlu1 %613 }
  0xf7   : > { %v525_v25 = vsel %vm520_vm4, 0.0, %v508_v19  ;;  %v533_v26 = vsel %vm520_vm4, %v508_v19, 0.0  ;;  %v509_v27 = vrot.slane %v493_v21, 7  ;;  %550 = vst.msk [vmem:[#allocation2 + $0x70] sm:$0xff] %vm429_vm2, %v527_v23  ;;  %v1320_v35 = vld [vmem:[#allocation2 + $0x12] sm:$0xff]  ;;  %v3878_v3 = vpop.permute.xlu0 %611 }
  0xf8   : > { %551 = vst.msk [vmem:[#allocation2 + $0x78] sm:$0x3] %vm431_vm3, %v535_v24  ;;  %547 = vst.msk [vmem:[#allocation2 + $0x58] sm:$0x3] %vm431_vm3, %v533_v26  ;;  %v528_v28 = vsel %vm520_vm4, 0.0, %v511_v22  ;;  %v536_v29 = vsel %vm520_vm4, %v511_v22, 0.0  ;;  %703 = vrot.lane.b32.xlu1 %v3734_v54, %s3574_s17 }
  0xf9   : > { %546 = vst.msk [vmem:[#allocation2 + $0x50] sm:$0xff] %vm429_vm2, %v525_v25  ;;  %v1323_v31 = vld [vmem:[#allocation2 + $0x42] sm:$0xff]  ;;  %v526_v32 = vsel %vm520_vm4, 0.0, %v509_v27  ;;  %v534_v33 = vsel %vm520_vm4, %v509_v27, 0.0  ;;  %552 = vst.msk [vmem:[#allocation2 + $0x80] sm:$0xff] %vm429_vm2, %v528_v28  ;;  %v986_v51 = vld [vmem:[#allocation2 + $0x11] sm:$0xff] }
  0xfa   : > { %553 = vst.msk [vmem:[#allocation2 + $0x88] sm:$0x3] %vm431_vm3, %v536_v29  ;;  %v3798_v34 = vpack.i.bf16 %v1323_v31, %v1322_v30  ;;  %v1321_v36 = vld [vmem:[#allocation2 + $0x22] sm:$0xff]  ;;  %549 = vst.msk [vmem:[#allocation2 + $0x68] sm:$0x3] %vm431_vm3, %v534_v33  ;;  %701 = vrot.lane.b32.xlu0 %v3726_v47, %s3574_s17  ;;  %v3842_v53 = vpop.permute.xlu1 %617 }
  0xfb   : > { %548 = vst.msk [vmem:[#allocation2 + $0x60] sm:$0xff] %vm429_vm2, %v526_v32  ;;  %v3802_v37 = vpack.i.bf16 %v1321_v36, %v1320_v35  ;;  %v989_v46 = vld [vmem:[#allocation2 + $0x41] sm:$0xff]  ;;  %v3890_v7 = vpop.permute.xlu0 %615 }
  0xfc   : > { %843 = vrot.lane.b32.xlu1 %v3757_v8, %s3575_s18 }
  0xfe   : > { %831 = vrot.lane.b32.xlu0 %v3726_v47, %s3575_s18  ;;  %v988_v47 = vld [vmem:[#allocation2 + $0x31] sm:$0xff] }
  0xff   : > { %v1326_v39 = vld [vmem:[#allocation2 + $0x72] sm:$0xff]  ;;  %v2987_v48 = vpack.i.bf16 %v989_v46, %v988_v47  ;;  %v3897_v9 = vpop.permute.xlu0 %733 }
 0x100   : > { %v1324_v38 = vld [vmem:[#allocation2 + $0x52] sm:$0xff]  ;;  %585 = vrot.lane.b32.xlu1 %v3766_v13, %s3573_s16 }
 0x101   : > { %v1327_v40 = vld [vmem:[#allocation2 + $0x82] sm:$0xff]  ;;  %v992_v55 = vld [vmem:[#allocation2 + $0x71] sm:$0xff] }
 0x102   : > { %v3812_v41 = vpack.i.bf16 %v1327_v40, %v1326_v39  ;;  %v1325_v42 = vld [vmem:[#allocation2 + $0x62] sm:$0xff]  ;;  %837 = vrot.lane.b32.xlu0 %v3729_v50, %s3575_s18  ;;  %v990_v1 = vld [vmem:[#allocation2 + $0x51] sm:$0xff] }
 0x103   : > { %v3814_v43 = vpack.i.bf16 %v1325_v42, %v1324_v38  ;;  %v987_v50 = vld [vmem:[#allocation2 + $0x21] sm:$0xff]  ;;  %v3881_v4 = vpack.i.bf16 %v990_v1, %v989_v46  ;;  %v738_v11 = vpop.permute.xlu0 %737 }
 0x104   : > { %715 = vrot.lane.b32.xlu1 %v3766_v13, %s3574_s17  ;;  %v3002_v52 = vpack.i.bf16 %v987_v50, %v986_v51  ;;  %v3850_v56 = vld [vmem:[#allocation2 + $0x81] sm:$0xff]  ;;  %v3869_v61 = vpack.i.bf16 %v988_v47, %v987_v50 }
 0x105   : > { %v3032_v57 = vpack.i.bf16 %v3850_v56, %v992_v55  ;;  %v991_v63 = vld [vmem:[#allocation2 + $0x61] sm:$0xff] }
 0x106   : > { %833 = vrot.lane.b32.xlu0 %v3734_v54, %s3575_s18  ;;  %v3848_v54 = vpop.permute.xlu1 %735  ;;  %v3052_v2 = vpack.i.bf16 %v991_v63, %v990_v1  ;;  %v3888_v6 = vpack.i.bf16 %v992_v55, %v991_v63 }
 0x108   : > { %581 = vrot.lane.b32.xlu1 %v3772_v17, %s3573_s16 }
 0x10a   : > { %583 = vrot.lane.b32.xlu0 %v3757_v8, %s3573_s16  ;;  %v740_v58 = vpop.permute.xlu1 %739 }
 0x10c   : > { %711 = vrot.lane.b32.xlu1 %v3772_v17, %s3574_s17 }
 0x10e   : > { %713 = vrot.lane.b32.xlu0 %v3757_v8, %s3574_s17  ;;  %v3864_v60 = vpop.permute.xlu1 %743 }
 0x110   : > { %2988 = vrot.lane.b32.xlu1 %v2987_v48, %s3576_s19 }
 0x112   : > { %579 = vrot.lane.b32.xlu0 %v3763_v10, %s3573_s16  ;;  %v3873_v0 = vpop.permute.xlu1 %863 }
 0x114   : > { %2993 = vrot.lane.b32.xlu1 %v2987_v48, %s3577_s20 }
 0x116   : > { %709 = vrot.lane.b32.xlu0 %v3763_v10, %s3574_s17  ;;  %v3883_v5 = vpop.permute.xlu1 %865 }
 0x118   : > { %3003 = vrot.lane.b32.xlu1 %v3002_v52, %s3578_s21 }
 0x11a   : > { %839 = vrot.lane.b32.xlu0 %v3763_v10, %s3575_s18  ;;  %v868_v8 = vpop.permute.xlu1 %867 }
 0x11c   : > { %3008 = vrot.lane.b32.xlu1 %v3002_v52, %s3576_s19 }
 0x11e   : > { %845 = vrot.lane.b32.xlu0 %v3766_v13, %s3575_s18  ;;  %v3899_v10 = vpop.permute.xlu1 %869  ;;  %v3903_v13 = vpop.permute.xlu0 %741 }
 0x120   : > { %3013 = vrot.lane.b32.xlu1 %v3002_v52, %s3577_s20 }
 0x122   : > { %841 = vrot.lane.b32.xlu0 %v3772_v17, %s3575_s18  ;;  %v3901_v12 = vpop.permute.xlu1 %871  ;;  %v3907_v15 = vpop.permute.xlu0 %873 }
 0x124   : > { %3033 = vrot.lane.b32.xlu1 %v3032_v57, %s3577_s20 }
 0x126   : > { %2983 = vrot.lane.b32.xlu0 %v2987_v48, %s3578_s21  ;;  %v3905_v14 = vpop.permute.xlu1 %875  ;;  %v3911_v17 = vpop.permute.xlu0 %745 }
 0x128   : > { %3038 = vrot.lane.b32.xlu1 %v3812_v41, %s3579_s22 }
 0x12a   : > { %2998 = vrot.lane.b32.xlu0 %v3798_v34, %s3579_s22  ;;  %v3909_v16 = vpop.permute.xlu1 %747 }
 0x12c   : > { %3043 = vrot.lane.b32.xlu1 %v3032_v57, %s3578_s21 }
 0x12e   : > { %3018 = vrot.lane.b32.xlu0 %v3869_v61, %s3574_s17  ;;  %v3913_v18 = vpop.permute.xlu1 %877 }
 0x130   : > { %3048 = vrot.lane.b32.xlu1 %v3032_v57, %s3576_s19 }
 0x132   : > { %3023 = vrot.lane.b32.xlu0 %v3802_v37, %s3579_s22 }
 0x134   : > { %3053 = vrot.lane.b32.xlu1 %v3052_v2, %s3578_s21 }
 0x136   : > { %3028 = vrot.lane.b32.xlu0 %v3881_v4, %s3574_s17 }
 0x138   : > { %3058 = vrot.lane.b32.xlu1 %v3052_v2, %s3576_s19 }
 0x13a   : > { %3068 = vrot.lane.b32.xlu0 %v3888_v6, %s3574_s17 }
 0x13c   : > { %3063 = vrot.lane.b32.xlu1 %v3052_v2, %s3577_s20 }
 0x13e   : > { %3073 = vrot.lane.b32.xlu0 %v3814_v43, %s3579_s22 }
 0x15c   : > { %v576_v19 = vpop.permute.xlu0 %575 }
 0x15d   : > { %v629_v20 = vsel %vm347_vm1, %v576_v19, %v608_v62 }
 0x15e   : > { %v645_v21 = vrot.slane %v629_v20, 7  ;;  %v578_v22 = vpop.permute.xlu1 %577 }
 0x15f   : > { %v630_v23 = vsel %vm347_vm1, %v578_v22, %v3828_v45 }
 0x160   : > { %v661_v24 = vsel %vm520_vm4, 0.0, %v645_v21  ;;  %v669_v25 = vsel %vm520_vm4, %v645_v21, 0.0  ;;  %v646_v26 = vrot.slane %v630_v23, 7  ;;  %v706_v27 = vpop.permute.xlu0 %705 }
 0x161   : > { %680 = vst.msk [vmem:[#allocation2 + $0xd0] sm:$0xff] %vm429_vm2, %v661_v24  ;;  %v759_v28 = vsel %vm347_vm1, %v706_v27, %v738_v11 }
 0x162   : > { %681 = vst.msk [vmem:[#allocation2 + $0xd8] sm:$0x3] %vm431_vm3, %v669_v25  ;;  %v662_v29 = vsel %vm520_vm4, 0.0, %v646_v26  ;;  %v670_v30 = vsel %vm520_vm4, %v646_v26, 0.0  ;;  %v775_v31 = vrot.slane %v759_v28, 7  ;;  %v708_v32 = vpop.permute.xlu1 %707 }
 0x163   : > { %682 = vst.msk [vmem:[#allocation2 + $0xe0] sm:$0xff] %vm429_vm2, %v662_v29  ;;  %v760_v33 = vsel %vm347_vm1, %v708_v32, %v740_v58 }
 0x164   : > { %683 = vst.msk [vmem:[#allocation2 + $0xe8] sm:$0x3] %vm431_vm3, %v670_v30  ;;  %v791_v35 = vsel %vm520_vm4, 0.0, %v775_v31  ;;  %v799_v36 = vsel %vm520_vm4, %v775_v31, 0.0  ;;  %v776_v38 = vrot.slane %v760_v33, 7  ;;  %v836_v39 = vpop.permute.xlu0 %835 }
 0x165   : > { %810 = vst.msk [vmem:[#allocation2 + $0x170] sm:$0xff] %vm429_vm2, %v791_v35  ;;  %v889_v40 = vsel %vm347_vm1, %v836_v39, %v868_v8 }
 0x166   : > { %811 = vst.msk [vmem:[#allocation2 + $0x178] sm:$0x3] %vm431_vm3, %v799_v36  ;;  %v792_v42 = vsel %vm520_vm4, 0.0, %v776_v38  ;;  %v800_v45 = vsel %vm520_vm4, %v776_v38, 0.0  ;;  %v905_v46 = vrot.slane %v889_v40, 7  ;;  %v574_v47 = vpop.permute.xlu1 %573 }
 0x167   : > { %812 = vst.msk [vmem:[#allocation2 + $0x180] sm:$0xff] %vm429_vm2, %v792_v42  ;;  %v628_v48 = vsel %vm347_vm1, %v574_v47, %v3820_v44 }
 0x168   : > { %813 = vst.msk [vmem:[#allocation2 + $0x188] sm:$0x3] %vm431_vm3, %v800_v45  ;;  %v921_v50 = vsel %vm520_vm4, 0.0, %v905_v46  ;;  %v929_v51 = vsel %vm520_vm4, %v905_v46, 0.0  ;;  %v644_v52 = vrot.slane %v628_v48, 7  ;;  %v572_v55 = vpop.permute.xlu0 %571 }
 0x169   : > { %940 = vst.msk [vmem:[#allocation2 + $0x210] sm:$0xff] %vm429_vm2, %v921_v50  ;;  %v627_v57 = vsel %vm347_vm1, %v572_v55, %v3860_v59  ;;  %v3979_v36 = vld [vmem:[#allocation2 + $0xd1] sm:$0xff]  ;;  %v3999_v55 = vld [vmem:[#allocation2 + $0x141] sm:$0xff] }
 0x16a   : > { %941 = vst.msk [vmem:[#allocation2 + $0x218] sm:$0x3] %vm431_vm3, %v929_v51  ;;  %v660_v58 = vsel %vm520_vm4, 0.0, %v644_v52  ;;  %v668_v62 = vsel %vm520_vm4, %v644_v52, 0.0  ;;  %v643_v63 = vrot.slane %v627_v57, 7  ;;  %v704_v1 = vpop.permute.xlu1 %703  ;;  %5611 = vst [vmem:[#allocation5_spill] sm:$0xff] %v3979_v36 }
 0x16b   : > { %678 = vst.msk [vmem:[#allocation2 + $0xc0] sm:$0xff] %vm429_vm2, %v660_v58  ;;  %v758_v44 = vsel %vm347_vm1, %v704_v1, %v3848_v54 }
 0x16c   : > { %679 = vst.msk [vmem:[#allocation2 + $0xc8] sm:$0x3] %vm431_vm3, %v668_v62  ;;  %v659_v2 = vsel %vm520_vm4, 0.0, %v643_v63  ;;  %v667_v8 = vsel %vm520_vm4, %v643_v63, 0.0  ;;  %v774_v11 = vrot.slane %v758_v44, 7  ;;  %v702_v19 = vpop.permute.xlu0 %701 }
 0x16d   : > { %676 = vst.msk [vmem:[#allocation2 + $0xb0] sm:$0xff] %vm429_vm2, %v659_v2  ;;  %v757_v59 = vsel %vm347_vm1, %v702_v19, %v3897_v9  ;;  %v3959_v54 = vld [vmem:[#allocation2 + $0x172] sm:$0xff] }
 0x16e   : > { %677 = vst.msk [vmem:[#allocation2 + $0xb8] sm:$0x3] %vm431_vm3, %v667_v8  ;;  %v790_v20 = vsel %vm520_vm4, 0.0, %v774_v11  ;;  %v798_v21 = vsel %vm520_vm4, %v774_v11, 0.0  ;;  %v773_v22 = vrot.slane %v757_v59, 7  ;;  %v844_v23 = vpop.permute.xlu1 %843  ;;  %5609 = vst [vmem:[#allocation3_spill] sm:$0xff] %v3959_v54 }
 0x16f   : > { %v3961_v24 = vld [vmem:[#allocation2 + $0x182] sm:$0xff]  ;;  %808 = vst.msk [vmem:[#allocation2 + $0x160] sm:$0xff] %vm429_vm2, %v790_v20  ;;  %v893_v25 = vsel %vm347_vm1, %v844_v23, %v3905_v14 }
 0x170   : > { %5610 = vst [vmem:[#allocation4_spill] sm:$0xff] %v3961_v24  ;;  %809 = vst.msk [vmem:[#allocation2 + $0x168] sm:$0x3] %vm431_vm3, %v798_v21  ;;  %v789_v27 = vsel %vm520_vm4, 0.0, %v773_v22  ;;  %v797_v28 = vsel %vm520_vm4, %v773_v22, 0.0  ;;  %v909_v29 = vrot.slane %v893_v25, 7  ;;  %v832_v30 = vpop.permute.xlu0 %831 }
 0x171   : > { %806 = vst.msk [vmem:[#allocation2 + $0x150] sm:$0xff] %vm429_vm2, %v789_v27  ;;  %v887_v31 = vsel %vm347_vm1, %v832_v30, %v3873_v0  ;;  %v970_v20 = vld [vmem:[#allocation2 + $0x1e1] sm:$0xff] }
 0x172   : > { %807 = vst.msk [vmem:[#allocation2 + $0x158] sm:$0x3] %vm431_vm3, %v797_v28  ;;  %v925_v14 = vsel %vm520_vm4, 0.0, %v909_v29  ;;  %v933_v32 = vsel %vm520_vm4, %v909_v29, 0.0  ;;  %v903_v33 = vrot.slane %v887_v31, 7  ;;  %v586_v35 = vpop.permute.xlu1 %585  ;;  %v3580_v31 = vmov 0  }
 0x173   : > { %v3981_v38 = vld [vmem:[#allocation2 + $0xc1] sm:$0xff]  ;;  %948 = vst.msk [vmem:[#allocation2 + $0x250] sm:$0xff] %vm429_vm2, %v925_v14  ;;  %v634_v39 = vsel %vm347_vm1, %v586_v35, %v3842_v53  ;;  %2257 = vmatprep.subr.bf16.mxu0 %v3580_v31  ;;  %2942 = vmatprep.subr.bf16.mxu1 %v3580_v31 }
 0x174   : > { %5612 = vst [vmem:[#allocation6_spill] sm:$0xff] %v3981_v38  ;;  %949 = vst.msk [vmem:[#allocation2 + $0x258] sm:$0x3] %vm431_vm3, %v933_v32  ;;  %v919_v42 = vsel %vm520_vm4, 0.0, %v903_v33  ;;  %v927_v45 = vsel %vm520_vm4, %v903_v33, 0.0  ;;  %v650_v46 = vrot.slane %v634_v39, 7  ;;  %v838_v47 = vpop.permute.xlu0 %837 }
 0x175   : > { %936 = vst.msk [vmem:[#allocation2 + $0x1f0] sm:$0xff] %vm429_vm2, %v919_v42  ;;  %v890_v48 = vsel %vm347_vm1, %v838_v47, %v3899_v10  ;;  %v3546_v14 = vld [vmem:[%s5559_s4] sm:$0xff]   ;;  %v4041_v32 = vld [vmem:[#allocation2 + $0x131] sm:$0xff] }
 0x176   : > { %937 = vst.msk [vmem:[#allocation2 + $0x1f8] sm:$0x3] %vm431_vm3, %v927_v45  ;;  %v666_v53 = vsel %vm520_vm4, 0.0, %v650_v46  ;;  %v674_v50 = vsel %vm520_vm4, %v650_v46, 0.0  ;;  %v906_v51 = vrot.slane %v890_v48, 7  ;;  %v716_v52 = vpop.permute.xlu1 %715  ;;  %v4054_v47 = vld [vmem:[#allocation2 + $0x210] sm:$0xff]  ;;  %2258 = vmatpush1.bf16.msra.mxu0 %v3546_v14  ;;  %2951 = vmatpush1.bf16.msra.mxu1 %v3546_v14 }
 0x177   : > { %690 = vst.msk [vmem:[#allocation2 + $0x120] sm:$0xff] %vm429_vm2, %v666_v53  ;;  %v764_v57 = vsel %vm347_vm1, %v716_v52, %v3909_v16  ;;  %v4019_v21 = vld [vmem:[#allocation2 + $0x162] sm:$0xff]  ;;  %v4056_v48 = vld [vmem:[#allocation2 + $0x211] sm:$0xff]  ;;  %2259 = vmatprep.subr.bf16.mxu0 %v3580_v31  ;;  %2943 = vmatprep.subr.bf16.mxu1 %v3580_v31 }
 0x178   : > { %691 = vst.msk [vmem:[#allocation2 + $0x128] sm:$0x3] %vm431_vm3, %v674_v50  ;;  %v922_v58 = vsel %vm520_vm4, 0.0, %v906_v51  ;;  %v930_v62 = vsel %vm520_vm4, %v906_v51, 0.0  ;;  %v780_v10 = vrot.slane %v764_v57, 7  ;;  %v834_v63 = vpop.permute.xlu0 %833  ;;  %5614 = vst [vmem:[#allocation8_spill] sm:$0xff] %v4019_v21  ;;  %v3227_v40 = vpack.i.bf16 %v3959_v54, %v4019_v21 }
 0x179   : > { %v4007_v1 = vld [vmem:[#allocation2 + $0x151] sm:$0xff]  ;;  %942 = vst.msk [vmem:[#allocation2 + $0x220] sm:$0xff] %vm429_vm2, %v922_v58  ;;  %v888_v2 = vsel %vm347_vm1, %v834_v63, %v3883_v5 }
 0x17a   : > { %v4009_v44 = vld [vmem:[#allocation2 + $0x152] sm:$0xff]  ;;  %943 = vst.msk [vmem:[#allocation2 + $0x228] sm:$0x3] %vm431_vm3, %v930_v62  ;;  %v3077_v16 = vpack.i.bf16 %v4007_v1, %v3999_v55  ;;  %v796_v8 = vsel %vm520_vm4, 0.0, %v780_v10  ;;  %v804_v11 = vsel %vm520_vm4, %v780_v10, 0.0  ;;  %v904_v19 = vrot.slane %v888_v2, 7  ;;  %v582_v59 = vpop.permute.xlu1 %581 }
 0x17b   : > { %5613 = vst [vmem:[#allocation7_spill] sm:$0xff] %v4009_v44  ;;  %820 = vst.msk [vmem:[#allocation2 + $0x1c0] sm:$0xff] %vm429_vm2, %v796_v8  ;;  %v632_v22 = vsel %vm347_vm1, %v582_v59, %v3835_v49  ;;  %v4080_v59 = vld [vmem:[#allocation2 + $0x181] sm:$0xff] }
 0x17c   : > { %821 = vst.msk [vmem:[#allocation2 + $0x1c8] sm:$0x3] %vm431_vm3, %v804_v11  ;;  %3078 = vrot.lane.b32.xlu0 %v3077_v16, %s3576_s19  ;;  %v920_v23 = vsel %vm520_vm4, 0.0, %v904_v19  ;;  %v928_v25 = vsel %vm520_vm4, %v904_v19, 0.0  ;;  %v648_v27 = vrot.slane %v632_v22, 7  ;;  %v584_v28 = vpop.permute.xlu0 %583  ;;  %5615 = vst [vmem:[#allocation9_spill] sm:$0xff] %v4080_v59 }
 0x17d   : > { %v4030_v29 = vld [vmem:[#allocation2 + $0x1f1] sm:$0xff]  ;;  %938 = vst.msk [vmem:[#allocation2 + $0x200] sm:$0xff] %vm429_vm2, %v920_v23  ;;  %v633_v49 = vsel %vm347_vm1, %v584_v28, %v3890_v7  ;;  %v1312_v7 = vld [vmem:[#allocation2 + $0x142] sm:$0xff] }
 0x17e   : > { %939 = vst.msk [vmem:[#allocation2 + $0x208] sm:$0x3] %vm431_vm3, %v928_v25  ;;  %v3082_v30 = vpack.i.bf16 %v4030_v29, %v970_v20  ;;  %v664_v33 = vsel %vm520_vm4, 0.0, %v648_v27  ;;  %v672_v35 = vsel %vm520_vm4, %v648_v27, 0.0  ;;  %v649_v39 = vrot.slane %v633_v49, 7  ;;  %v712_v42 = vpop.permute.xlu1 %711  ;;  %v4094_v27 = vld [vmem:[#allocation2 + $0x171] sm:$0xff] }
 0x17f   : > { %v4046_v45 = vld [vmem:[#allocation2 + $0x121] sm:$0xff]  ;;  %686 = vst.msk [vmem:[#allocation2 + $0x100] sm:$0xff] %vm429_vm2, %v664_v33  ;;  %v762_v46 = vsel %vm347_vm1, %v712_v42, %v3864_v60  ;;  %v3092_v2 = vpack.i.bf16 %v4009_v44, %v1312_v7  ;;  %5616 = vst [vmem:[#allocation10_spill] sm:$0xff] %v4094_v27  ;;  %v3548_v28 = vld [vmem:[%s5559_s4 + $0x10] sm:$0xff]   ;;  %v4107_v14 = vpack.i.bf16 %v4080_v59, %v4094_v27 }
 0x180   : > { %687 = vst.msk [vmem:[#allocation2 + $0x108] sm:$0x3] %vm431_vm3, %v672_v35  ;;  %3083 = vrot.lane.b32.xlu0 %v3082_v30, %s3581_s27  ;;  %3088 = vrot.lane.b32.xlu1 %v3082_v30, %s3576_s19  ;;  %v665_v53 = vsel %vm520_vm4, 0.0, %v649_v39  ;;  %v673_v50 = vsel %vm520_vm4, %v649_v39, 0.0  ;;  %v778_v51 = vrot.slane %v762_v46, 7  ;;  %v714_v52 = vpop.permute.xlu0 %713  ;;  %v1005_v57 = vld [vmem:[#allocation2 + $0x220] sm:$0xff] }
 0x181   : > { %v4060_v58 = vld [vmem:[#allocation2 + $0x221] sm:$0xff]  ;;  %688 = vst.msk [vmem:[#allocation2 + $0x110] sm:$0xff] %vm429_vm2, %v665_v53  ;;  %v763_v10 = vsel %vm347_vm1, %v714_v52, %v3911_v17  ;;  %v4072_v63 = vpack.i.bf16 %v1005_v57, %v4054_v47  ;;  %v4109_v33 = vld [vmem:[#allocation2 + $0xd0] sm:$0xff] }
 0x182   : > { %v3547_v60 = vld [vmem:[%s5559_s4 + $0x8] sm:$0xff]   ;;  %689 = vst.msk [vmem:[#allocation2 + $0x118] sm:$0x3] %vm431_vm3, %v673_v50  ;;  %v794_v8 = vsel %vm520_vm4, 0.0, %v778_v51  ;;  %v802_v11 = vsel %vm520_vm4, %v778_v51, 0.0  ;;  %v779_v19 = vrot.slane %v763_v10, 7  ;;  %v4134_v52 = vpack.i.bf16 %v4060_v58, %v4056_v48 }
 0x183   : > { %816 = vst.msk [vmem:[#allocation2 + $0x1a0] sm:$0xff] %vm429_vm2, %v794_v8  ;;  %v4088_v17 = vld [vmem:[#allocation2 + $0xe0] sm:$0xff]  ;;  %2260 = vmatpush1.bf16.msra.mxu0 %v3547_v60  ;;  %2952 = vmatpush1.bf16.msra.mxu1 %v3547_v60  ;;  %v3549_v50 = vld [vmem:[%s5559_s4 + $0x18] sm:$0xff]  }
 0x184   : > { %817 = vst.msk [vmem:[#allocation2 + $0x1a8] sm:$0x3] %vm431_vm3, %v802_v11  ;;  %3108 = vrot.lane.b32.xlu0 %v4072_v63, %s3582_s30  ;;  %3093 = vrot.lane.b32.xlu1 %v3092_v2, %s3581_s27  ;;  %v795_v20 = vsel %vm520_vm4, 0.0, %v779_v19  ;;  %v803_v22 = vsel %vm520_vm4, %v779_v19, 0.0  ;;  %v580_v23 = vpop.permute.xlu0 %579  ;;  %v3097_v39 = vpack.i.bf16 %v4088_v17, %v4109_v33  ;;  %v4271_v5 = vld [vmem:[#allocation2 + $0x200] sm:$0xff] }
 0x185   : > { %v4092_v25 = vld [vmem:[#allocation2 + $0x201] sm:$0xff]  ;;  %818 = vst.msk [vmem:[#allocation2 + $0x1b0] sm:$0xff] %vm429_vm2, %v795_v20  ;;  %v631_v49 = vsel %vm347_vm1, %v580_v23, %v3878_v3  ;;  %2261 = vmatprep.subr.bf16.mxu0 %v3580_v31  ;;  %2944 = vmatprep.subr.bf16.mxu1 %v3580_v31 }
 0x186   : > { %819 = vst.msk [vmem:[#allocation2 + $0x1b8] sm:$0x3] %vm431_vm3, %v803_v22  ;;  %v2099_v30 = vpack.c.bf16 %v4092_v25, %v4030_v29  ;;  %v647_v35 = vrot.slane %v631_v49, 7  ;;  %v4118_v3 = vld [vmem:[#allocation2 + $0xe1] sm:$0xff] }
 0x187   : > { %5617 = vst [vmem:[#allocation11_spill] sm:$0xff] %v4118_v3  ;;  %2262 = vmatpush1.bf16.msra.mxu0 %v3548_v28  ;;  %v4136_v57 = vld [vmem:[#allocation2 + $0x101] sm:$0xff]  ;;  %v4141_v10 = vpack.i.bf16 %v4118_v3, %v3979_v36  ;;  %2953 = vmatpush1.bf16.msra.mxu1 %v3548_v28 }
 0x188   : > { %2906 = vmatprep.mubr.msk.bf16.mxu0 %vm429_vm2, %v2099_v30  ;;  %3128 = vrot.lane.b32.xlu0 %v4107_v14, %s3578_s21  ;;  %v663_v42 = vsel %vm520_vm4, 0.0, %v647_v35  ;;  %v671_v7 = vsel %vm520_vm4, %v647_v35, 0.0  ;;  %v710_v46 = vpop.permute.xlu0 %709  ;;  %5619 = vst [vmem:[#allocation13_spill] sm:$0xff] %v4136_v57  ;;  %v4156_v22 = vld [vmem:[#allocation2 + $0x1c2] sm:$0xff] }
 0x189   : > { %3098 = vrot.lane.b32.xlu1 %v3097_v39, %s3577_s20  ;;  %v4123_v53 = vld [vmem:[#allocation2 + $0x111] sm:$0xff]  ;;  %684 = vst.msk [vmem:[#allocation2 + $0xf0] sm:$0xff] %vm429_vm2, %v663_v42  ;;  %v761_v51 = vsel %vm347_vm1, %v710_v46, %v3903_v13  ;;  %2263 = vmatprep.subr.bf16.mxu0 %v3580_v31  ;;  %5620 = vst [vmem:[#allocation14_spill] sm:$0xff] %v4156_v22  ;;  %v3550_v23 = vld [vmem:[%s5559_s4 + $0x20] sm:$0xff]  }
 0x18a   : > { %5618 = vst [vmem:[#allocation12_spill] sm:$0xff] %v4123_v53  ;;  %685 = vst.msk [vmem:[#allocation2 + $0xf8] sm:$0x3] %vm431_vm3, %v671_v7  ;;  %v777_v60 = vrot.slane %v761_v51, 7  ;;  %2945 = vmatprep.subr.bf16.mxu1 %v3580_v31  ;;  %v3551_v46 = vld [vmem:[%s5559_s4 + $0x28] sm:$0xff]   ;;  %v4340_v16 = vld [vmem:[#allocation2 + $0x120] sm:$0xff] }
 0x18b   : > { %2264 = vmatpush1.bf16.msra.mxu0 %v3549_v50  ;;  %2954 = vmatpush1.bf16.msra.mxu1 %v3549_v50  ;;  %5631 = vst [vmem:[#allocation25_spill] sm:$0xff] %v4340_v16 }
 0x18c   : > { %3133 = vrot.lane.b32.xlu0 %v4134_v52, %s3579_s22  ;;  %v793_v8 = vsel %vm520_vm4, 0.0, %v777_v60  ;;  %v801_v11 = vsel %vm520_vm4, %v777_v60, 0.0  ;;  %v840_v19 = vpop.permute.xlu0 %839  ;;  %2265 = vmatprep.subr.bf16.mxu0 %v3580_v31  ;;  %v4187_v60 = vld [vmem:[#allocation2 + $0xb0] sm:$0xff] }
 0x18d   : > { %3103 = vrot.lane.b32.xlu1 %v4141_v10, %s3579_s22  ;;  %v4154_v20 = vld [vmem:[#allocation2 + $0x1b2] sm:$0xff]  ;;  %814 = vst.msk [vmem:[#allocation2 + $0x190] sm:$0xff] %vm429_vm2, %v793_v8  ;;  %v891_v28 = vsel %vm347_vm1, %v840_v19, %v3901_v12  ;;  %2946 = vmatprep.subr.bf16.mxu1 %v3580_v31 }
 0x18e   : > { %815 = vst.msk [vmem:[#allocation2 + $0x198] sm:$0x3] %vm431_vm3, %v801_v11  ;;  %v2113_v30 = vpack.c.bf16 %v4156_v22, %v4154_v20  ;;  %v907_v35 = vrot.slane %v891_v28, 7  ;;  %v4198_v28 = vld [vmem:[#allocation2 + $0xc0] sm:$0xff]  ;;  %v4329_v26 = vld [vmem:[#allocation2 + $0x1b1] sm:$0xff] }
 0x18f   : > { %2266 = vmatpush1.bf16.msra.mxu0 %v3550_v23  ;;  %2955 = vmatpush1.bf16.msra.mxu1 %v3550_v23  ;;  %v3552_v23 = vld [vmem:[%s5559_s4 + $0x30] sm:$0xff]   ;;  %v3202_v13 = vpack.i.bf16 %v4109_v33, %v4198_v28  ;;  %5629 = vst [vmem:[#allocation23_spill] sm:$0xff] %v4329_v26 }
 0x190   : > { %2913 = vmatprep.mubr.msk.bf16.mxu1 %vm429_vm2, %v2113_v30  ;;  %3143 = vrot.lane.b32.xlu0 %v4107_v14, %s3582_s30  ;;  %v923_v39 = vsel %vm520_vm4, 0.0, %v907_v35  ;;  %v931_v42 = vsel %vm520_vm4, %v907_v35, 0.0  ;;  %v846_v12 = vpop.permute.xlu0 %845  ;;  %v4311_v8 = vld [vmem:[#allocation2 + $0xf0] sm:$0xff] }
 0x191   : > { %3113 = vrot.lane.b32.xlu1 %v4107_v14, %s3574_s17  ;;  %v4177_v7 = vld [vmem:[#allocation2 + $0xf1] sm:$0xff]  ;;  %944 = vst.msk [vmem:[#allocation2 + $0x230] sm:$0xff] %vm429_vm2, %v923_v39  ;;  %v894_v50 = vsel %vm347_vm1, %v846_v12, %v3913_v18  ;;  %2267 = vmatprep.subr.bf16.mxu0 %v3580_v31  ;;  %v3162_v39 = vpack.i.bf16 %v4198_v28, %v4187_v60  ;;  %5628 = vst [vmem:[#allocation22_spill] sm:$0xff] %v4311_v8 }
 0x192   : > { %5621 = vst [vmem:[#allocation15_spill] sm:$0xff] %v4177_v7  ;;  %945 = vst.msk [vmem:[#allocation2 + $0x238] sm:$0x3] %vm431_vm3, %v931_v42  ;;  %v910_v51 = vrot.slane %v894_v50, 7  ;;  %v4211_v42 = vld [vmem:[#allocation2 + $0x1a2] sm:$0xff]  ;;  %v994_v50 = vld [vmem:[#allocation2 + $0xb1] sm:$0xff]  ;;  %2947 = vmatprep.subr.bf16.mxu1 %v3580_v31 }
 0x193   : > { %2268 = vmatpush1.bf16.msra.mxu0 %v3551_v46  ;;  %2956 = vmatpush1.bf16.msra.mxu1 %v3551_v46 }
 0x194   : > { %3148 = vrot.lane.b32.xlu0 %v4134_v52, %s3574_s17  ;;  %v926_v11 = vsel %vm520_vm4, 0.0, %v910_v51  ;;  %v934_v19 = vsel %vm520_vm4, %v910_v51, 0.0  ;;  %v842_v18 = vpop.permute.xlu0 %841  ;;  %2269 = vmatprep.subr.bf16.mxu0 %v3580_v31  ;;  %v3242_v51 = vpack.i.bf16 %v4311_v8, %v4088_v17 }
 0x195   : > { %3118 = vrot.lane.b32.xlu1 %v4141_v10, %s3581_s27  ;;  %v4200_v30 = vld [vmem:[#allocation2 + $0x192] sm:$0xff]  ;;  %950 = vst.msk [vmem:[#allocation2 + $0x260] sm:$0xff] %vm429_vm2, %v926_v11  ;;  %v892_v35 = vsel %vm347_vm1, %v842_v18, %v3907_v15  ;;  %2948 = vmatprep.subr.bf16.mxu1 %v3580_v31  ;;  %v3157_v11 = vpack.i.bf16 %v4056_v48, %v4092_v25 }
 0x196   : > { %5622 = vst [vmem:[#allocation16_spill] sm:$0xff] %v4200_v30  ;;  %951 = vst.msk [vmem:[#allocation2 + $0x268] sm:$0x3] %vm431_vm3, %v934_v19  ;;  %v908_v12 = vrot.slane %v892_v35, 7  ;;  %v3553_v18 = vld [vmem:[%s5559_s4 + $0x38] sm:$0xff]   ;;  %v4230_v35 = vpack.i.bf16 %v3981_v38, %v994_v50 }
 0x197   : > { %2270 = vmatpush1.bf16.msra.mxu0 %v3552_v23  ;;  %2957 = vmatpush1.bf16.msra.mxu1 %v3552_v23  ;;  %v4249_v50 = vld [vmem:[#allocation2 + $0x251] sm:$0xff] }
 0x198   : > { %3163 = vrot.lane.b32.xlu0 %v3162_v39, %s3577_s20  ;;  %v924_v15 = vsel %vm520_vm4, 0.0, %v908_v12  ;;  %v932_v19 = vsel %vm520_vm4, %v908_v12, 0.0  ;;  %2271 = vmatprep.subr.bf16.mxu0 %v3580_v31  ;;  %v3554_v39 = vld [vmem:[%s5559_s4 + $0x40] sm:$0xff]   ;;  %5625 = vst [vmem:[#allocation19_spill] sm:$0xff] %v4249_v50 }
 0x199   : > { %3123 = vrot.lane.b32.xlu1 %v4072_v63, %s3577_s20  ;;  %946 = vst.msk [vmem:[#allocation2 + $0x240] sm:$0xff] %vm429_vm2, %v924_v15  ;;  %v4236_v63 = vld [vmem:[#allocation2 + $0x161] sm:$0xff]  ;;  %2949 = vmatprep.subr.bf16.mxu1 %v3580_v31  ;;  %v4262_v62 = vld [vmem:[#allocation2 + $0x231] sm:$0xff] }
 0x19a   : > { %947 = vst.msk [vmem:[#allocation2 + $0x248] sm:$0x3] %vm431_vm3, %v932_v19  ;;  %5623 = vst [vmem:[#allocation17_spill] sm:$0xff] %v4236_v63  ;;  %v4247_v12 = vpack.i.bf16 %v4236_v63, %v4007_v1  ;;  %v3152_v23 = vpack.i.bf16 %v4094_v27, %v4236_v63  ;;  %v4362_v63 = vld [vmem:[#allocation2 + $0x250] sm:$0xff] }
 0x19b   : > { %2272 = vmatpush1.bf16.msra.mxu0 %v3553_v18  ;;  %2958 = vmatpush1.bf16.msra.mxu1 %v3553_v18  ;;  %v4276_v18 = vpack.i.bf16 %v4092_v25, %v4030_v29  ;;  %v4297_v25 = vld [vmem:[#allocation2 + $0x191] sm:$0xff]  ;;  %5635 = vst [vmem:[#allocation29_spill] sm:$0xff] %v4362_v63 }
 0x19c   : > { %3168 = vrot.lane.b32.xlu0 %v4230_v35, %s3579_s22  ;;  %2273 = vmatprep.subr.bf16.mxu0 %v3580_v31  ;;  %5627 = vst [vmem:[#allocation21_spill] sm:$0xff] %v4297_v25 }
 0x19d   : > { %3138 = vrot.lane.b32.xlu1 %v4141_v10, %s3578_s21  ;;  %v4240_v46 = vld [vmem:[#allocation2 + $0x261] sm:$0xff]  ;;  %2950 = vmatprep.subr.bf16.mxu1 %v3580_v31 }
 0x19e   : > { %5624 = vst [vmem:[#allocation18_spill] sm:$0xff] %v4240_v46 }
 0x19f   : > { %2274 = vmatpush1.bf16.msra.mxu0 %v3554_v39  ;;  %2959 = vmatpush1.bf16.msra.mxu1 %v3554_v39  ;;  %v4287_v39 = vpop.permute.xlu1 %2988 }
 0x1a0   : > { %3178 = vrot.lane.b32.xlu0 %v4247_v12, %s3574_s17 }
 0x1a1   : > { %3153 = vrot.lane.b32.xlu1 %v3152_v23, %s3576_s19  ;;  %v4260_v19 = vld [vmem:[#allocation2 + $0x241] sm:$0xff]  ;;  %v4278_v23 = vld [vmem:[#allocation2 + $0x1f0] sm:$0xff] }
 0x1a2   : > { %v3172_v31 = vpack.i.bf16 %v4271_v5, %v4278_v23 }
 0x1a3   : > { %v4295_v29 = vpop.permute.xlu1 %2993 }
 0x1a4   : > { %3193 = vrot.lane.b32.xlu0 %v4247_v12, %s3578_s21  ;;  %5626 = vst [vmem:[#allocation20_spill] sm:$0xff] %v4295_v29 }
 0x1a5   : > { %3158 = vrot.lane.b32.xlu1 %v3157_v11, %s3581_s27 }
 0x1a7   : > { %v4305_v15 = vpop.permute.xlu1 %3003 }
 0x1a8   : > { %3198 = vrot.lane.b32.xlu0 %v4276_v18, %s3579_s22 }
 0x1a9   : > { %3173 = vrot.lane.b32.xlu1 %v3172_v31, %s3582_s30 }
 0x1ab   : > { %v4317_v2 = vpop.permute.xlu1 %3008 }
 0x1ac   : > { %3203 = vrot.lane.b32.xlu0 %v3202_v13, %s3582_s30  ;;  %v3232_v13 = vpack.i.bf16 %v4297_v25, %v4080_v59 }
 0x1ad   : > { %3183 = vrot.lane.b32.xlu1 %v4230_v35, %s3581_s27 }
 0x1af   : > { %v4331_v49 = vpop.permute.xlu1 %3013 }
 0x1b0   : > { %3213 = vrot.lane.b32.xlu0 %v4247_v12, %s3582_s30 }
 0x1b1   : > { %3188 = vrot.lane.b32.xlu1 %v3172_v31, %s3577_s20  ;;  %v3237_v31 = vpack.i.bf16 %v4262_v62, %v4060_v58 }
 0x1b3   : > { %v4350_v59 = vpop.permute.xlu1 %3033 }
 0x1b4   : > { %3218 = vrot.lane.b32.xlu0 %v4276_v18, %s3574_s17  ;;  %5633 = vst [vmem:[#allocation27_spill] sm:$0xff] %v4350_v59 }
 0x1b5   : > { %3208 = vrot.lane.b32.xlu1 %v4230_v35, %s3578_s21 }
 0x1b8   : > { %3233 = vrot.lane.b32.xlu0 %v3232_v13, %s3576_s19  ;;  %v3252_v13 = vpack.i.bf16 %v4200_v30, %v3961_v24  ;;  %v4377_v30 = vld [vmem:[#allocation2 + $0x1a1] sm:$0xff] }
 0x1b9   : > { %3223 = vrot.lane.b32.xlu1 %v3157_v11, %s3576_s19  ;;  %v4325_v11 = vpack.i.bf16 %v4046_v45, %v4123_v53  ;;  %5638 = vst [vmem:[#allocation32_spill] sm:$0xff] %v4377_v30 }
 0x1bc   : > { %3238 = vrot.lane.b32.xlu0 %v3237_v31, %s3581_s27 }
 0x1bd   : > { %3228 = vrot.lane.b32.xlu1 %v3227_v40, %s3581_s27  ;;  %v4333_v40 = vld [vmem:[#allocation2 + $0x110] sm:$0xff] }
 0x1be   : > { %5630 = vst [vmem:[#allocation24_spill] sm:$0xff] %v4333_v40  ;;  %v3267_v0 = vpack.i.bf16 %v4340_v16, %v4333_v40 }
 0x1c0   : > { %3243 = vrot.lane.b32.xlu0 %v3242_v51, %s3582_s30  ;;  %v1017_v51 = vld [vmem:[#allocation2 + $0x1c1] sm:$0xff] }
 0x1c1   : > { %3248 = vrot.lane.b32.xlu1 %v3237_v31, %s3576_s19  ;;  %v4338_v31 = vpop.permute.xlu0 %2983  ;;  %v4343_v9 = vpack.i.bf16 %v1017_v51, %v4329_v26  ;;  %v1009_v51 = vld [vmem:[#allocation2 + $0x260] sm:$0xff] }
 0x1c2   : > { %v3297_v27 = vpack.i.bf16 %v1009_v51, %v4362_v63  ;;  %v3317_v51 = vpack.i.bf16 %v4329_v26, %v4377_v30 }
 0x1c3   : > { %5632 = vst [vmem:[#allocation26_spill] sm:$0xff] %v4343_v9 }
 0x1c4   : > { %3258 = vrot.lane.b32.xlu0 %v4325_v11, %s3578_s21 }
 0x1c5   : > { %3253 = vrot.lane.b32.xlu1 %v3252_v13, %s3581_s27  ;;  %v4354_v13 = vpack.i.bf16 %v4240_v46, %v4249_v50  ;;  %v4356_v53 = vpop.permute.xlu0 %2998 }
 0x1c7   : > { %5634 = vst [vmem:[#allocation28_spill] sm:$0xff] %v4354_v13 }
 0x1c8   : > { %3263 = vrot.lane.b32.xlu0 %v4343_v9, %s3582_s30 }
 0x1c9   : > { %3268 = vrot.lane.b32.xlu1 %v3267_v0, %s3577_s20  ;;  %v4365_v0 = vpop.permute.xlu1 %3038  ;;  %v4370_v46 = vpop.permute.xlu0 %3018 }
 0x1ca   : > { %5636 = vst [vmem:[#allocation30_spill] sm:$0xff] %v4365_v0  ;;  %v1592_v0 = vld [vmem:[#allocation2 + $0x130] sm:$0xff] }
 0x1cb   : > { %v3312_v26 = vpack.i.bf16 %v1592_v0, %v4340_v16 }
 0x1cc   : > { %3273 = vrot.lane.b32.xlu0 %v4354_v13, %s3574_s17 }
 0x1cd   : > { %3293 = vrot.lane.b32.xlu1 %v4325_v11, %s3581_s27  ;;  %v4375_v59 = vpop.permute.xlu1 %3043  ;;  %v4381_v63 = vpop.permute.xlu0 %3023 }
 0x1ce   : > { %5637 = vst [vmem:[#allocation31_spill] sm:$0xff] %v4375_v59 }
 0x1d0   : > { %3278 = vrot.lane.b32.xlu0 %v4325_v11, %s3579_s22 }
 0x1d1   : > { %3298 = vrot.lane.b32.xlu1 %v3297_v27, %s3577_s20  ;;  %v4388_v22 = vpop.permute.xlu1 %3048  ;;  %v4393_v59 = vpop.permute.xlu0 %3028 }
 0x1d2   : > { %5639 = vst [vmem:[#allocation33_spill] sm:$0xff] %v4388_v22  ;;  %5640 = vst [vmem:[#allocation34_spill] sm:$0xff] %v4393_v59  ;;  %v3347_v22 = vpack.i.bf16 %v4154_v20, %v4211_v42  ;;  %v1601_v59 = vld [vmem:[#allocation2 + $0x91] sm:$0xff] }
 0x1d3   : > { %v4415_v0 = vpack.i.bf16 %v1601_v59, %v3850_v56 }
 0x1d4   : > { %3283 = vrot.lane.b32.xlu0 %v3297_v27, %s3582_s30  ;;  %v3322_v27 = vpack.i.bf16 %v4249_v50, %v4260_v19 }
 0x1d5   : > { %3308 = vrot.lane.b32.xlu1 %v4354_v13, %s3579_s22  ;;  %v4397_v13 = vld [vmem:[#allocation2 + $0x100] sm:$0xff]  ;;  %5644 = vst [vmem:[#allocation38_spill] sm:$0xff] %v4415_v0 }
 0x1d6   : > { %5641 = vst [vmem:[#allocation35_spill] sm:$0xff] %v4397_v13  ;;  %v3327_v50 = vpack.i.bf16 %v4397_v13, %v4311_v8 }
 0x1d8   : > { %3288 = vrot.lane.b32.xlu0 %v4343_v9, %s3574_s17 }
 0x1d9   : > { %3318 = vrot.lane.b32.xlu1 %v3317_v51, %s3576_s19  ;;  %v4400_v51 = vpop.permute.xlu1 %3053 }
 0x1da   : > { %5642 = vst [vmem:[#allocation36_spill] sm:$0xff] %v4400_v51 }
 0x1dc   : > { %3303 = vrot.lane.b32.xlu0 %v4343_v9, %s3578_s21  ;;  %v4406_v9 = vpop.permute.xlu0 %3068 }
 0x1dd   : > { %3323 = vrot.lane.b32.xlu1 %v3322_v27, %s3581_s27  ;;  %5643 = vst [vmem:[#allocation37_spill] sm:$0xff] %v4406_v9  ;;  %v4419_v8 = vpop.permute.xlu1 %3058 }
 0x1de   : > { %5646 = vst [vmem:[#allocation40_spill] sm:$0xff] %v4419_v8 }
 0x1e0   : > { %3313 = vrot.lane.b32.xlu0 %v3312_v26, %s3582_s30  ;;  %v4412_v26 = vpack.i.bf16 %v4136_v57, %v4177_v7 }
 0x1e1   : > { %3338 = vrot.lane.b32.xlu1 %v3322_v27, %s3576_s19  ;;  %v4417_v27 = vld [vmem:[#allocation2 + $0x240] sm:$0xff]  ;;  %v4434_v56 = vpop.permute.xlu1 %3063 }
 0x1e2   : > { %5645 = vst [vmem:[#allocation39_spill] sm:$0xff] %v4417_v27  ;;  %5649 = vst [vmem:[#allocation43_spill] sm:$0xff] %v4434_v56 }
 0x1e4   : > { %3328 = vrot.lane.b32.xlu0 %v3327_v50, %s3577_s20  ;;  %v4425_v50 = vld [vmem:[#allocation2 + $0x230] sm:$0xff] }
 0x1e5   : > { %3348 = vrot.lane.b32.xlu1 %v3347_v22, %s3581_s27  ;;  %5647 = vst [vmem:[#allocation41_spill] sm:$0xff] %v4425_v50  ;;  %v4427_v22 = vpop.permute.xlu0 %3073  ;;  %v3342_v9 = vpack.i.bf16 %v4417_v27, %v4425_v50 }
 0x1e6   : > { %5648 = vst [vmem:[#allocation42_spill] sm:$0xff] %v4427_v22 }
 0x1e8   : > { %3333 = vrot.lane.b32.xlu0 %v4412_v26, %s3579_s22 }
 0x1e9   : > { %3353 = vrot.lane.b32.xlu1 %v4415_v0, %s3574_s17 }
 0x1ec   : > { %3343 = vrot.lane.b32.xlu0 %v3342_v9, %s3582_s30 }
 0x1ed   : > { %3363 = vrot.lane.b32.xlu1 %v3802_v37, %s3581_s27 }
 0x1ee   : > { %v4436_v59 = vpop.permute.xlu0 %3078 }
 0x1f0   : > { %3358 = vrot.lane.b32.xlu0 %v4230_v35, %s3576_s19  ;;  %v4456_v35 = vpack.i.bf16 %v4377_v30, %v4297_v25  ;;  %v3010_v30 = vunpack.i.l.bf16 %v4317_v2  ;;  %v3467_v25 = vpack.i.bf16 %v4177_v7, %v4118_v3 }
 0x1f1   : > { %3373 = vrot.lane.b32.xlu1 %v4276_v18, %s3578_s21 }
 0x1f2   : > { %v4442_v8 = vpop.permute.xlu0 %3083  ;;  %v4444_v22 = vpop.permute.xlu1 %3088 }
 0x1f4   : > { %3368 = vrot.lane.b32.xlu0 %v4247_v12, %s3577_s20  ;;  %v3382_v12 = vpack.i.bf16 %v4019_v21, %v4009_v44 }
 0x1f5   : > { %3388 = vrot.lane.b32.xlu1 %v3869_v61, %s3582_s30 }
 0x1f6   : > { %v4450_v37 = vpop.permute.xlu0 %3108  ;;  %v4452_v56 = vpop.permute.xlu1 %3093 }
 0x1f7   : > { %v3096_v7 = vunpack.i.h.bf16 %v4452_v56 }
 0x1f8   : > { %3378 = vrot.lane.b32.xlu0 %v4456_v35, %s3574_s17 }
 0x1f9   : > { %3398 = vrot.lane.b32.xlu1 %v4141_v10, %s3576_s19  ;;  %v5650_v10 = vpack.i.bf16 %v3979_v36, %v3981_v38  ;;  %v3011_v36 = vunpack.i.h.bf16 %v4317_v2  ;;  %v5652_v2 = vpack.i.bf16 %v3961_v24, %v3959_v54  ;;  %v3080_v54 = vunpack.i.l.bf16 %v4436_v59 }
 0x1fa   : > { %v4462_v18 = vpop.permute.xlu0 %3128  ;;  %v3085_v24 = vunpack.i.l.bf16 %v4442_v8 }
 0x1fb   : > { %v4466_v61 = vpop.permute.xlu1 %3098 }
 0x1fc   : > { %3383 = vrot.lane.b32.xlu0 %v3382_v12, %s3579_s22 }
 0x1fd   : > { %3408 = vrot.lane.b32.xlu1 %v4412_v26, %s3581_s27 }
 0x1fe   : > { %v4471_v51 = vpop.permute.xlu0 %3133 }
 0x1ff   : > { %v4473_v50 = vpop.permute.xlu1 %3103 }
 0x200   : > { %3393 = vrot.lane.b32.xlu0 %v5650_v10, %s3574_s17  ;;  %v2991_v10 = vunpack.i.h.bf16 %v4287_v39 }
 0x201   : > { %3413 = vrot.lane.b32.xlu1 %v3342_v9, %s3577_s20  ;;  %v2990_v9 = vunpack.i.l.bf16 %v4287_v39 }
 0x202   : > { %v4480_v27 = vpop.permute.xlu0 %3143  ;;  %v4517_v0 = vsel %vm429_vm2, %v4088_v17, %v2991_v10  ;;  %v3427_v17 = vpack.i.bf16 %v4333_v40, %v4397_v13  ;;  %v3081_v10 = vunpack.i.h.bf16 %v4436_v59  ;;  %v3091_v59 = vunpack.i.h.bf16 %v4444_v22 }
 0x203   : > { %v4482_v44 = vpop.permute.xlu1 %3113  ;;  %v3090_v13 = vunpack.i.l.bf16 %v4444_v22 }
 0x204   : > { %3403 = vrot.lane.b32.xlu0 %v3798_v34, %s3581_s27  ;;  %v4502_v34 = vpack.i.bf16 %v4260_v19, %v4262_v62 }
 0x205   : > { %3433 = vrot.lane.b32.xlu1 %v4412_v26, %s3578_s21 }
 0x206   : > { %v4488_v12 = vpop.permute.xlu0 %3148 }
 0x207   : > { %5651 = vst [vmem:[#allocation44_spill] sm:$0xff] %v4488_v12  ;;  %v4490_v21 = vpop.permute.xlu1 %3118 }
 0x208   : > { %3418 = vrot.lane.b32.xlu0 %v4456_v35, %s3578_s21 }
 0x209   : > { %3438 = vrot.lane.b32.xlu1 %v4107_v14, %s3577_s20  ;;  %v4513_v14 = vsel %vm429_vm2, %v4109_v33, %v2990_v9  ;;  %v4535_v9 = vsel %vm429_vm2, %v4187_v60, %v3010_v30  ;;  %v3086_v30 = vunpack.i.h.bf16 %v4442_v8  ;;  %v3095_v8 = vunpack.i.l.bf16 %v4452_v56 }
 0x20a   : > { %v4498_v38 = vpop.permute.xlu0 %3163 }
 0x20b   : > { %v4506_v16 = vpop.permute.xlu1 %3123  ;;  %v3166_v57 = vunpack.i.h.bf16 %v4498_v38  ;;  %v3165_v22 = vunpack.i.l.bf16 %v4498_v38  ;;  %v1528_v38 = vsel %vm429_vm2, %v3999_v55, %v3090_v13 }
 0x20c   : > { %3423 = vrot.lane.b32.xlu0 %v4502_v34, %s3579_s22 }
 0x20d   : > { %3458 = vrot.lane.b32.xlu1 %v5652_v2, %s3579_s22  ;;  %v4539_v2 = vsel %vm429_vm2, %v4198_v28, %v3011_v36  ;;  %v2985_v36 = vunpack.i.l.bf16 %v4338_v31  ;;  %v953_v28 = vld [vmem:[#allocation2 + $0x1e0] sm:$0xff] }
 0x20e   : > { %v4528_v33 = vpop.permute.xlu0 %3168  ;;  %v1250_v39 = vsel %vm429_vm2, %v953_v28, %v3080_v54  ;;  %v1529_v54 = vsel %vm429_vm2, %v4007_v1, %v3091_v59 }
 0x20f   : > { %v4541_v12 = vpop.permute.xlu1 %3138  ;;  %v1259_v3 = vsel %vm1258_vm5, %v1250_v39, %v3085_v24  ;;  %v1536_v24 = vsel %vm1258_vm5, %v1528_v38, %v3095_v8  ;;  %v1537_v39 = vsel %vm1258_vm5, %v1529_v54, %v3096_v7  ;;  %v3170_v8 = vunpack.i.l.bf16 %v4528_v33 }
 0x210   : > { %3428 = vrot.lane.b32.xlu0 %v3427_v17, %s3582_s30  ;;  %v1268_v1 = vsel %vm1267_vm6, %v1259_v3, %v3165_v22  ;;  %v3106_v3 = vunpack.i.h.bf16 %v4473_v50  ;;  %v5655_v38 = vunpack.i.h.bf16 %v4338_v31 }
 0x211   : > { %3468 = vrot.lane.b32.xlu1 %v3467_v25, %s3574_s17  ;;  %v1251_v25 = vsel %vm429_vm2, %v4278_v23, %v3081_v10  ;;  %v3111_v23 = vunpack.i.h.bf16 %v4450_v37  ;;  %v3110_v10 = vunpack.i.l.bf16 %v4450_v37  ;;  %v3171_v37 = vunpack.i.h.bf16 %v4528_v33 }
 0x212   : > { %v4559_v17 = vpop.permute.xlu0 %3178  ;;  %v1260_v56 = vsel %vm1258_vm5, %v1251_v25, %v3086_v30  ;;  %v5653_v33 = vunpack.i.l.bf16 %v4305_v15 }
 0x213   : > { %v3154_v40 = vpop.permute.xlu1 %3153  ;;  %v1269_v59 = vsel %vm1267_vm6, %v1260_v56, %v3166_v57  ;;  %v3105_v57 = vunpack.i.l.bf16 %v4473_v50 }
 0x214   : > { %3443 = vrot.lane.b32.xlu0 %v4456_v35, %s3582_s30  ;;  %v3156_v60 = vunpack.i.h.bf16 %v3154_v40  ;;  %v3155_v29 = vunpack.i.l.bf16 %v3154_v40  ;;  %v3101_v40 = vunpack.i.h.bf16 %v4466_v61 }
 0x215   : > { %3473 = vrot.lane.b32.xlu1 %v3814_v43, %s3581_s27  ;;  %v3100_v43 = vunpack.i.l.bf16 %v4466_v61 }
 0x216   : > { %v4582_v28 = vpop.permute.xlu0 %3193  ;;  %v1253_v7 = vsel %vm429_vm2, %v4054_v47, %v3156_v60  ;;  %v1252_v61 = vsel %vm429_vm2, %v4271_v5, %v3155_v29  ;;  %v1277_v47 = vsel %vm1276_vm7, %v1268_v1, %v5653_v33  ;;  %v5654_v60 = vunpack.i.h.bf16 %v4305_v15 }
 0x217   : > { %v3159_v30 = vpop.permute.xlu1 %3158  ;;  %v1286_v15 = vsel %vm1285_vm9, %v1277_v47, %v3170_v8  ;;  %v3121_v8 = vunpack.i.h.bf16 %v4490_v21  ;;  %v5656_v47 = vunpack.i.l.bf16 %v4331_v49 }
 0x218   : > { %v3161_v55 = vunpack.i.h.bf16 %v3159_v30  ;;  %v3160_v13 = vunpack.i.l.bf16 %v3159_v30  ;;  %3448 = vrot.lane.b32.xlu0 %v4502_v34, %s3574_s17  ;;  %v1278_v5 = vsel %vm1276_vm7, %v1269_v59, %v5654_v60 }
 0x219   : > { %3478 = vrot.lane.b32.xlu1 %v3888_v6, %s3582_s30  ;;  %v1287_v1 = vsel %vm1285_vm9, %v1278_v5, %v3171_v37  ;;  %v3120_v37 = vunpack.i.l.bf16 %v4490_v21  ;;  %v5657_v21 = vunpack.i.h.bf16 %v4331_v49  ;;  %v3130_v49 = vunpack.i.l.bf16 %v4462_v18 }
 0x21a   : > { %v1261_v25 = vsel %vm1258_vm5, %v1252_v61, %v3160_v13  ;;  %v1262_v22 = vsel %vm1258_vm5, %v1253_v7, %v3161_v55  ;;  %v4604_v56 = vpop.permute.xlu0 %3198 }
 0x21b   : > { %v1270_v6 = vsel %vm1267_vm6, %v1261_v25, %v3100_v43  ;;  %v1271_v29 = vsel %vm1267_vm6, %v1262_v22, %v3101_v40  ;;  %v3174_v54 = vpop.permute.xlu1 %3173  ;;  %v3181_v43 = vunpack.i.h.bf16 %v4559_v17  ;;  %v3180_v40 = vunpack.i.l.bf16 %v4559_v17 }
 0x21c   : > { %v1279_v50 = vsel %vm1276_vm7, %v1270_v6, %v2985_v36  ;;  %v1280_v30 = vsel %vm1276_vm7, %v1271_v29, %v5655_v38  ;;  %v3176_v55 = vunpack.i.h.bf16 %v3174_v54  ;;  %v3175_v13 = vunpack.i.l.bf16 %v3174_v54  ;;  %3453 = vrot.lane.b32.xlu0 %v4134_v52, %s3578_s21 }
 0x21d   : > { %3483 = vrot.lane.b32.xlu1 %v4325_v11, %s3576_s19  ;;  %v1288_v7 = vsel %vm1285_vm9, %v1279_v50, %v3105_v57  ;;  %v1289_v52 = vsel %vm1285_vm9, %v1280_v30, %v3106_v3  ;;  %v1544_v57 = vsel %vm1267_vm6, %v1536_v24, %v5656_v47  ;;  %v3131_v3 = vunpack.i.h.bf16 %v4462_v18 }
 0x21e   : > { %v1295_v31 = vsel %vm1294_vm8, %v1286_v15, %v3175_v13  ;;  %v1296_v36 = vsel %vm1294_vm8, %v1287_v1, %v3176_v55  ;;  %v3204_v59 = vpop.permute.xlu0 %3203  ;;  %v1545_v60 = vsel %vm1267_vm6, %v1537_v39, %v5657_v21  ;;  %v1297_v5 = vsel %vm1294_vm8, %v1288_v7, %v3110_v10 }
 0x21f   : > { %v1304_v61 = vsel %vm1303_vm10, %v1295_v31, %v3180_v40  ;;  %v1305_v17 = vsel %vm1303_vm10, %v1296_v36, %v3181_v43  ;;  %v3184_v25 = vpop.permute.xlu1 %3183  ;;  %v1298_v6 = vsel %vm1294_vm8, %v1289_v52, %v3111_v23  ;;  %v3116_v29 = vunpack.i.h.bf16 %v4482_v44 }
 0x220   : > { %v2098_v22 = vpack.c.bf16 %v1305_v17, %v1304_v61  ;;  %v3186_v11 = vunpack.i.h.bf16 %v3184_v25  ;;  %v3185_v33 = vunpack.i.l.bf16 %v3184_v25  ;;  %3463 = vrot.lane.b32.xlu0 %v3881_v4, %s3582_s30  ;;  %v3115_v4 = vunpack.i.l.bf16 %v4482_v44 }
 0x221   : > { %3503 = vrot.lane.b32.xlu1 %v4502_v34, %s3578_s21  ;;  %v1805_v39 = vsel %vm1258_vm5, %v4517_v0, %v3121_v8  ;;  %v1804_v23 = vsel %vm1258_vm5, %v4513_v14, %v3120_v37  ;;  %v3126_v10 = vunpack.i.h.bf16 %v4506_v16  ;;  %v5658_v44 = vpack.c.bf16 %v4060_v58, %v4056_v48  ;;  %v5659_v48 = vld [vmem:[#allocation26_spill] sm:$0xff] }
 0x222   : > { %v1802_v24 = vsel %vm1258_vm5, %v4535_v9, %v3185_v33  ;;  %v1803_v54 = vsel %vm1258_vm5, %v4539_v2, %v3186_v11  ;;  %2290 = vmatmul.mubr.bf16.vlgmr.msra.gmra.mrb[8].mxu0 %v2098_v22  ;;  %v3214_v34 = vpop.permute.xlu0 %3213  ;;  %v1306_v38 = vsel %vm1303_vm10, %v1297_v5, %v3115_v4  ;;  %v1307_v0 = vsel %vm1303_vm10, %v1298_v6, %v3116_v29 }
 0x223   : > { %v3189_v50 = vpop.permute.xlu1 %3188  ;;  %2907 = vmatprep.mubr.msk.bf16.mxu0 %vm429_vm2, %v5658_v44  ;;  %v3125_v30 = vunpack.i.l.bf16 %v4506_v16  ;;  %v3196_v14 = vunpack.i.h.bf16 %v4582_v28  ;;  %v3195_v55 = vunpack.i.l.bf16 %v4582_v28  ;;  %v3201_v13 = vunpack.i.h.bf16 %v4604_v56 }
 0x224   : > { %v3191_v9 = vunpack.i.h.bf16 %v3189_v50  ;;  %v3190_v2 = vunpack.i.l.bf16 %v3189_v50  ;;  %3488 = vrot.lane.b32.xlu0 %v3812_v41, %s3581_s27  ;;  %v3200_v58 = vunpack.i.l.bf16 %v4604_v56  ;;  %v3206_v15 = vunpack.i.h.bf16 %v3204_v59 }
 0x225   : > { %3508 = vrot.lane.b32.xlu1 %v5659_v48, %s3577_s20  ;;  %v3205_v40 = vunpack.i.l.bf16 %v3204_v59  ;;  %v2100_v28 = vpack.c.bf16 %v1307_v0, %v1306_v38  ;;  %v1812_v37 = vsel %vm1267_vm6, %v1804_v23, %v3125_v30  ;;  %v3215_v61 = vunpack.i.l.bf16 %v3214_v34  ;;  %v5660_v59 = vld [vmem:[#allocation14_spill] sm:$0xff] }
 0x226   : > { %v1810_v41 = vsel %vm1267_vm6, %v1802_v24, %v3190_v2  ;;  %v1811_v1 = vsel %vm1267_vm6, %v1803_v54, %v3191_v9  ;;  %v3219_v43 = vpop.permute.xlu0 %3218  ;;  %v5661_v17 = vpack.i.bf16 %v5660_v59, %v4154_v20  ;;  %v5662_v47 = vunpack.i.l.bf16 %v4370_v46 }
 0x227   : > { %v1818_v16 = vsel %vm1276_vm7, %v1810_v41, %v3195_v55  ;;  %v1819_v31 = vsel %vm1276_vm7, %v1811_v1, %v3196_v14  ;;  %v3209_v36 = vpop.permute.xlu1 %3208  ;;  %v5663_v5 = vunpack.i.h.bf16 %v4370_v46  ;;  %v3216_v6 = vunpack.i.h.bf16 %v3214_v34 }
 0x228   : > { %v3211_v7 = vunpack.i.h.bf16 %v3209_v36  ;;  %v3210_v52 = vunpack.i.l.bf16 %v3209_v36  ;;  %3493 = vrot.lane.b32.xlu0 %v4412_v26, %s3576_s19  ;;  %v1826_v56 = vsel %vm1285_vm9, %v1818_v16, %v3200_v58  ;;  %v1827_v8 = vsel %vm1285_vm9, %v1819_v31, %v3201_v13  ;;  %v5672_v36 = vld [vmem:[#allocation17_spill] sm:$0xff] }
 0x229   : > { %3528 = vrot.lane.b32.xlu1 %v5661_v17, %s3579_s22  ;;  %v1834_v25 = vsel %vm1294_vm8, %v1826_v56, %v3205_v40  ;;  %v1835_v22 = vsel %vm1294_vm8, %v1827_v8, %v3206_v15  ;;  %v3220_v29 = vunpack.i.l.bf16 %v3219_v43  ;;  %v5664_v4 = vunpack.i.l.bf16 %v4381_v63  ;;  %v5669_v40 = vld [vmem:[#allocation16_spill] sm:$0xff] }
 0x22a   : > { %v1552_v11 = vsel %vm1276_vm7, %v1544_v57, %v3210_v52  ;;  %v1553_v26 = vsel %vm1276_vm7, %v1545_v60, %v3211_v7  ;;  %2298 = vmatmul.mubr.bf16.gmra.mrb[12].mxu0 %v2100_v28  ;;  %v4691_v33 = vpop.permute.xlu0 %3233  ;;  %v4696_v21 = vsel %vm1303_vm10, %v1834_v25, %v5662_v47  ;;  %v4701_v20 = vsel %vm1303_vm10, %v1835_v22, %v5663_v5 }
 0x22b   : > { %v1560_v57 = vsel %vm1285_vm9, %v1552_v11, %v5664_v4  ;;  %v5665_v60 = vunpack.i.h.bf16 %v4381_v63  ;;  %v3224_v54 = vpop.permute.xlu1 %3223  ;;  %v5666_v23 = vpack.c.bf16 %v4260_v19, %v4262_v62  ;;  %v1813_v46 = vsel %vm1267_vm6, %v1805_v39, %v3126_v10  ;;  %v5677_v4 = vld [vmem:[#allocation13_spill] sm:$0xff] }
 0x22c   : > { %v3221_v50 = vunpack.i.h.bf16 %v3219_v43  ;;  %3498 = vrot.lane.b32.xlu0 %v4456_v35, %s3577_s20  ;;  %v2114_v34 = vpack.c.bf16 %v4701_v20, %v4696_v21  ;;  %v1568_v44 = vsel %vm1294_vm8, %v1560_v57, %v3215_v61  ;;  %v3226_v63 = vunpack.i.h.bf16 %v3224_v54  ;;  %v5668_v35 = vld [vmem:[#allocation34_spill] sm:$0xff] }
 0x22d   : > { %v1561_v24 = vsel %vm1285_vm9, %v1553_v26, %v5665_v60  ;;  %2908 = vmatprep.mubr.msk.bf16.mxu0 %vm429_vm2, %v5666_v23  ;;  %v3225_v9 = vunpack.i.l.bf16 %v3224_v54  ;;  %v5667_v2 = vpack.i.bf16 %v4041_v32, %v4046_v45  ;;  %v4725_v19 = vsel %vm1303_vm10, %v1568_v44, %v3220_v29  ;;  %v5676_v29 = vld [vmem:[#allocation12_spill] sm:$0xff] }
 0x22e   : > { %v1569_v62 = vsel %vm1294_vm8, %v1561_v24, %v3216_v6  ;;  %v3000_v39 = vunpack.i.l.bf16 %v4356_v53  ;;  %v3031_v10 = vunpack.i.h.bf16 %v5668_v35  ;;  %v3030_v38 = vunpack.i.l.bf16 %v5668_v35  ;;  %v4730_v0 = vpop.permute.xlu0 %3238  ;;  %v5680_v44 = vld [vmem:[#allocation44_spill] sm:$0xff] }
 0x22f   : > { %3538 = vrot.lane.b32.xlu1 %v5667_v2, %s3574_s17  ;;  %v4733_v30 = vsel %vm1303_vm10, %v1569_v62, %v3221_v50  ;;  %v3136_v14 = vunpack.i.h.bf16 %v4471_v51  ;;  %v1820_v55 = vsel %vm1276_vm7, %v1812_v37, %v3130_v49  ;;  %v1821_v13 = vsel %vm1276_vm7, %v1813_v46, %v3131_v3  ;;  %v3229_v48 = vpop.permute.xlu1 %3228  ;;  %v5671_v3 = vld [vmem:[#allocation10_spill] sm:$0xff]  ;;  %v5673_v37 = vld [vmem:[#allocation20_spill] sm:$0xff] }
 0x230   : > { %v2106_v58 = vpack.c.bf16 %v4733_v30, %v4725_v19  ;;  %v3135_v15 = vunpack.i.l.bf16 %v4471_v51  ;;  %v3145_v41 = vunpack.i.l.bf16 %v4480_v27  ;;  %v3231_v1 = vunpack.i.h.bf16 %v3229_v48 }
 0x231   : > { %v3230_v43 = vunpack.i.l.bf16 %v3229_v48  ;;  %v5670_v16 = vpack.i.bf16 %v4211_v42, %v5669_v40  ;;  %v3141_v49 = vunpack.i.h.bf16 %v4541_v12  ;;  %v3140_v18 = vunpack.i.l.bf16 %v4541_v12 }
 0x232   : > { %v1531_v31 = vsel %vm429_vm2, %v5671_v3, %v3226_v63  ;;  %v1530_v28 = vsel %vm429_vm2, %v5672_v36, %v3225_v9  ;;  %v3244_v52 = vpop.permute.xlu0 %3243  ;;  %v1828_v56 = vsel %vm1285_vm9, %v1820_v55, %v3135_v15  ;;  %v1829_v8 = vsel %vm1285_vm9, %v1821_v13, %v3136_v14  ;;  %v5681_v13 = vld [vmem:[#allocation28_spill] sm:$0xff]  ;;  %v5684_v36 = vld [vmem:[#allocation38_spill] sm:$0xff] }
 0x233   : > { %3513 = vrot.lane.b32.xlu0 %v5670_v16, %s3579_s22  ;;  %v1538_v51 = vsel %vm1258_vm5, %v1530_v28, %v3230_v43  ;;  %v1539_v7 = vsel %vm1258_vm5, %v1531_v31, %v3231_v1  ;;  %v5674_v61 = vunpack.i.l.bf16 %v5673_v37  ;;  %v5675_v12 = vunpack.i.h.bf16 %v5673_v37  ;;  %v3249_v11 = vpop.permute.xlu1 %3248  ;;  %v5683_v1 = vld [vmem:[#allocation9_spill] sm:$0xff] }
 0x234   : > { %v3246_v25 = vunpack.i.h.bf16 %v3244_v52  ;;  %v3245_v22 = vunpack.i.l.bf16 %v3244_v52  ;;  %v3251_v5 = vunpack.i.h.bf16 %v3249_v11  ;;  %v3250_v6 = vunpack.i.l.bf16 %v3249_v11  ;;  %v5685_v28 = vld [vmem:[#allocation33_spill] sm:$0xff] }
 0x235   : > { %v1546_v59 = vsel %vm1267_vm6, %v1538_v51, %v5674_v61  ;;  %v1547_v17 = vsel %vm1267_vm6, %v1539_v7, %v5675_v12  ;;  %v5678_v57 = vpack.i.bf16 %v5676_v29, %v5677_v4  ;;  %v5679_v23 = vunpack.i.h.bf16 %v4356_v53  ;;  %v5686_v61 = vld [vmem:[#allocation25_spill] sm:$0xff]  ;;  %v5687_v12 = vld [vmem:[#allocation24_spill] sm:$0xff] }
 0x236   : > { %v1554_v26 = vsel %vm1276_vm7, %v1546_v59, %v3140_v18  ;;  %v1555_v47 = vsel %vm1276_vm7, %v1547_v17, %v3141_v49  ;;  %v1836_v60 = vsel %vm1294_vm8, %v1828_v56, %v3245_v22  ;;  %v1837_v24 = vsel %vm1294_vm8, %v1829_v8, %v3246_v25  ;;  %v4780_v9 = vpop.permute.xlu0 %3258 }
 0x237   : > { %3518 = vrot.lane.b32.xlu0 %v5678_v57, %s3574_s17  ;;  %v1562_v54 = vsel %vm1285_vm9, %v1554_v26, %v3000_v39  ;;  %v1563_v46 = vsel %vm1285_vm9, %v1555_v47, %v5679_v23  ;;  %v3146_v50 = vunpack.i.h.bf16 %v4480_v27  ;;  %v3150_v63 = vunpack.i.l.bf16 %v5680_v44  ;;  %v3254_v14 = vpop.permute.xlu1 %3253 }
 0x238   : > { %v4783_v2 = vsel %vm1303_vm10, %v1836_v60, %v3030_v38  ;;  %v4786_v62 = vsel %vm1303_vm10, %v1837_v24, %v3031_v10  ;;  %v3151_v35 = vunpack.i.h.bf16 %v5680_v44  ;;  %v1570_v39 = vsel %vm1294_vm8, %v1562_v54, %v3145_v41  ;;  %v5682_v10 = vld [vmem:[#allocation21_spill] sm:$0xff] }
 0x239   : > { %v2116_v53 = vpack.c.bf16 %v4786_v62, %v4783_v2  ;;  %v3256_v55 = vunpack.i.h.bf16 %v3254_v14  ;;  %v3255_v27 = vunpack.i.l.bf16 %v3254_v14  ;;  %v1571_v48 = vsel %vm1294_vm8, %v1563_v46, %v3146_v50  ;;  %v5708_v2 = vld [vmem:[#allocation7_spill] sm:$0xff] }
 0x23a   : > { %v4796_v38 = vsel %vm1303_vm10, %v1570_v39, %v3150_v63  ;;  %v1533_v15 = vsel %vm429_vm2, %v5682_v10, %v3251_v5  ;;  %v1532_v43 = vsel %vm429_vm2, %v5683_v1, %v3250_v6  ;;  %v4803_v16 = vsel %vm1303_vm10, %v1571_v48, %v3151_v35  ;;  %v4811_v18 = vpop.permute.xlu0 %3263 }
 0x23b   : > { %3523 = vrot.lane.b32.xlu0 %v5681_v13, %s3578_s21  ;;  %v4806_v41 = vsel %vm1258_vm5, %v1532_v43, %v3255_v27  ;;  %v4809_v49 = vsel %vm1258_vm5, %v1533_v15, %v3256_v55  ;;  %v2108_v3 = vpack.c.bf16 %v4803_v16, %v4796_v38  ;;  %v4815_v31 = vpop.permute.xlu1 %3268  ;;  %v3051_v51 = vunpack.i.h.bf16 %v5685_v28  ;;  %v5688_v43 = vld [vmem:[#allocation27_spill] sm:$0xff] }
 0x23c   : > { %v3050_v7 = vunpack.i.l.bf16 %v5685_v28  ;;  %v3035_v28 = vunpack.i.l.bf16 %v5688_v43 }
 0x23d   : > { %v1801_v59 = vsel %vm429_vm2, %v5686_v61, %v3051_v51  ;;  %v3260_v61 = vunpack.i.l.bf16 %v4780_v9 }
 0x23e   : > { %v4821_v52 = vpop.permute.xlu0 %3273  ;;  %v1800_v17 = vsel %vm429_vm2, %v5687_v12, %v3050_v7  ;;  %v5689_v7 = vld [vmem:[#allocation30_spill] sm:$0xff]  ;;  %v3266_v12 = vunpack.i.h.bf16 %v4811_v18 }
 0x23f   : > { %3533 = vrot.lane.b32.xlu0 %v5684_v36, %s3582_s30  ;;  %v3294_v56 = vpop.permute.xlu1 %3293  ;;  %v3036_v36 = vunpack.i.h.bf16 %v5688_v43  ;;  %s2862_s30 = sshll.u32 %s5722_s25, 1 }
 0x240   : > { %v3296_v8 = vunpack.i.h.bf16 %v3294_v56  ;;  %v3295_v37 = vunpack.i.l.bf16 %v3294_v56  ;;  %v3041_v56 = vunpack.i.h.bf16 %v5689_v7  ;;  %s309_s11 = scalar_lea.vmem %s5562_s7, %s2862_s30 }
 0x242   : > { %v1808_v25 = vsel %vm1258_vm5, %v1800_v17, %v3295_v37  ;;  %v1809_v22 = vsel %vm1258_vm5, %v1801_v59, %v3296_v8  ;;  %v4829_v11 = vpop.permute.xlu0 %3278  ;;  %v3040_v8 = vunpack.i.l.bf16 %v5689_v7  ;;  %v3261_v37 = vunpack.i.h.bf16 %v4780_v9 }
 0x243   : > { %v3299_v26 = vpop.permute.xlu1 %3298  ;;  %v3265_v17 = vunpack.i.l.bf16 %v4811_v18 }
 0x244   : > { %v3301_v47 = vunpack.i.h.bf16 %v3299_v26  ;;  %v3300_v5 = vunpack.i.l.bf16 %v3299_v26 }
 0x246   : > { %v1816_v6 = vsel %vm1267_vm6, %v1808_v25, %v3300_v5  ;;  %v1817_v57 = vsel %vm1267_vm6, %v1809_v22, %v3301_v47  ;;  %v4833_v60 = vpop.permute.xlu0 %3283  ;;  %v5690_v5 = vld [vmem:[#allocation23_spill] sm:$0xff] }
 0x247   : > { %v3309_v24 = vpop.permute.xlu1 %3308 }
 0x248   : > { %v3311_v35 = vunpack.i.h.bf16 %v3309_v24  ;;  %v3310_v14 = vunpack.i.l.bf16 %v3309_v24 }
 0x24a   : > { %v4835_v54 = vpop.permute.xlu0 %3288 }
 0x24b   : > { %v4837_v23 = vpop.permute.xlu1 %3318 }
 0x24c   : > { %v3321_v18 = vunpack.i.h.bf16 %v4837_v23 }
 0x24e   : > { %v3304_v46 = vpop.permute.xlu0 %3303 }
 0x24f   : > { %v3306_v50 = vunpack.i.h.bf16 %v3304_v46  ;;  %v3305_v44 = vunpack.i.l.bf16 %v3304_v46  ;;  %v4839_v63 = vpop.permute.xlu1 %3323  ;;  %v3276_v46 = vunpack.i.h.bf16 %v4821_v52 }
 0x251   : > { %v1824_v39 = vsel %vm1276_vm7, %v1816_v6, %v3305_v44  ;;  %v1825_v55 = vsel %vm1276_vm7, %v1817_v57, %v3306_v50  ;;  %v5691_v57 = vld [vmem:[#allocation32_spill] sm:$0xff]  ;;  %v3275_v50 = vunpack.i.l.bf16 %v4821_v52 }
 0x252   : > { %v3314_v27 = vpop.permute.xlu0 %3313  ;;  %v1832_v13 = vsel %vm1285_vm9, %v1824_v39, %v3310_v14  ;;  %v1833_v48 = vsel %vm1285_vm9, %v1825_v55, %v3311_v35  ;;  %v3320_v14 = vunpack.i.l.bf16 %v4837_v23 }
 0x253   : > { %v3339_v10 = vpop.permute.xlu1 %3338  ;;  %v3316_v26 = vunpack.i.h.bf16 %v3314_v27  ;;  %v3315_v47 = vunpack.i.l.bf16 %v3314_v27 }
 0x254   : > { %v3341_v15 = vunpack.i.h.bf16 %v3339_v10  ;;  %v3340_v1 = vunpack.i.l.bf16 %v3339_v10 }
 0x255   : > { %v1840_v43 = vsel %vm1294_vm8, %v1832_v13, %v3315_v47  ;;  %v1841_v7 = vsel %vm1294_vm8, %v1833_v48, %v3316_v26  ;;  %v3326_v13 = vunpack.i.h.bf16 %v4839_v63  ;;  %v3325_v48 = vunpack.i.l.bf16 %v4839_v63 }
 0x256   : > { %v4847_v51 = vpop.permute.xlu0 %3328  ;;  %v1535_v6 = vsel %vm429_vm2, %v5690_v5, %v3341_v15  ;;  %v1534_v24 = vsel %vm429_vm2, %v5691_v57, %v3340_v1  ;;  %v3235_v47 = vunpack.i.l.bf16 %v4691_v33  ;;  %v3241_v5 = vunpack.i.h.bf16 %v4730_v0  ;;  %v5692_v57 = vld [vmem:[#allocation29_spill] sm:$0xff] }
 0x257   : > { %v3349_v59 = vpop.permute.xlu1 %3348  ;;  %v1257_v63 = vsel %vm429_vm2, %v5692_v57, %v3321_v18  ;;  %v957_v18 = vld [vmem:[#allocation2 + $0x220] sm:$0xff] }
 0x258   : > { %v3351_v25 = vunpack.i.h.bf16 %v3349_v59  ;;  %v3350_v22 = vunpack.i.l.bf16 %v3349_v59 }
 0x25a   : > { %v1542_v9 = vsel %vm1258_vm5, %v1534_v24, %v3350_v22  ;;  %v1543_v44 = vsel %vm1258_vm5, %v1535_v6, %v3351_v25  ;;  %v4863_v35 = vpop.permute.xlu0 %3333  ;;  %v3240_v6 = vunpack.i.l.bf16 %v4730_v0  ;;  %v5693_v24 = vld [vmem:[#allocation39_spill] sm:$0xff]  ;;  %v5694_v0 = vld [vmem:[#allocation5_spill] sm:$0xff] }
 0x25b   : > { %v1550_v39 = vsel %vm1267_vm6, %v1542_v9, %v3035_v28  ;;  %v1551_v55 = vsel %vm1267_vm6, %v1543_v44, %v3036_v36  ;;  %v3354_v27 = vpop.permute.xlu1 %3353  ;;  %v1266_v44 = vsel %vm1258_vm5, %v1257_v63, %v3326_v13 }
 0x25c   : > { %v1558_v10 = vsel %vm1276_vm7, %v1550_v39, %v3260_v61  ;;  %v1559_v15 = vsel %vm1276_vm7, %v1551_v55, %v3261_v37  ;;  %v3356_v52 = vunpack.i.h.bf16 %v3354_v27  ;;  %v3355_v1 = vunpack.i.l.bf16 %v3354_v27  ;;  %v5695_v27 = vld [vmem:[#allocation6_spill] sm:$0xff] }
 0x25d   : > { %v1566_v59 = vsel %vm1285_vm9, %v1558_v10, %v3040_v8  ;;  %v1567_v25 = vsel %vm1285_vm9, %v1559_v15, %v3041_v56  ;;  %v3331_v39 = vunpack.i.h.bf16 %v4847_v51  ;;  %v5696_v10 = vpack.c.bf16 %v5694_v0, %v5695_v27 }
 0x25e   : > { %v4875_v23 = vpop.permute.xlu0 %3343  ;;  %v1574_v28 = vsel %vm1294_vm8, %v1566_v59, %v3265_v17  ;;  %v1575_v36 = vsel %vm1294_vm8, %v1567_v25, %v3266_v12  ;;  %v4880_v61 = vsel %vm1303_vm10, %v1840_v43, %v3355_v1  ;;  %v4883_v37 = vsel %vm1303_vm10, %v1841_v7, %v3356_v52  ;;  %v5697_v52 = vld [vmem:[#allocation31_spill] sm:$0xff]  ;;  %v5698_v7 = vld [vmem:[#allocation41_spill] sm:$0xff] }
 0x25f   : > { %v4887_v22 = vpop.permute.xlu1 %3363  ;;  %v1582_v56 = vsel %vm1303_vm10, %v1574_v28, %v3275_v50  ;;  %v1583_v8 = vsel %vm1303_vm10, %v1575_v36, %v3276_v46  ;;  %v2120_v12 = vpack.c.bf16 %v4883_v37, %v4880_v61  ;;  %v3236_v17 = vunpack.i.h.bf16 %v4691_v33 }
 0x260   : > { %v2112_v26 = vpack.c.bf16 %v1583_v8, %v1582_v56  ;;  %v1256_v50 = vsel %vm429_vm2, %v5693_v24, %v3320_v14  ;;  %v3330_v33 = vunpack.i.l.bf16 %v4847_v51  ;;  %v3271_v14 = vunpack.i.h.bf16 %v4815_v31 }
 0x261   : > { %v1265_v9 = vsel %vm1258_vm5, %v1256_v50, %v3325_v48  ;;  %v3270_v15 = vunpack.i.l.bf16 %v4815_v31  ;;  %v3046_v1 = vunpack.i.h.bf16 %v5697_v52  ;;  %v3045_v43 = vunpack.i.l.bf16 %v5697_v52 }
 0x262   : > { %2346 = vmatmul.mubr.bf16.vlgmr.msra.gmra.mrb[0].mxu1 %v2112_v26  ;;  %v4901_v46 = vpop.permute.xlu0 %3358  ;;  %v1255_v59 = vsel %vm429_vm2, %v5698_v7, %v3236_v17  ;;  %v1254_v51 = vsel %vm429_vm2, %v957_v18, %v3235_v47  ;;  %v1275_v13 = vsel %vm1267_vm6, %v1266_v44, %v3271_v14  ;;  %v3336_v8 = vunpack.i.h.bf16 %v4863_v35  ;;  %v5699_v47 = vld [vmem:[#allocation36_spill] sm:$0xff]  ;;  %v5700_v18 = vld [vmem:[#allocation15_spill] sm:$0xff] }
 0x263   : > { %v4907_v55 = vpop.permute.xlu1 %3373  ;;  %2914 = vmatprep.mubr.msk.bf16.mxu1 %vm429_vm2, %v5696_v10  ;;  %v1263_v25 = vsel %vm1258_vm5, %v1254_v51, %v3240_v6  ;;  %v1264_v28 = vsel %vm1258_vm5, %v1255_v59, %v3241_v5  ;;  %v1274_v36 = vsel %vm1267_vm6, %v1265_v9, %v3270_v15  ;;  %v3335_v26 = vunpack.i.l.bf16 %v4863_v35  ;;  %v5701_v14 = vld [vmem:[#allocation11_spill] sm:$0xff] }
 0x264   : > { %v1272_v31 = vsel %vm1267_vm6, %v1263_v25, %v3330_v33  ;;  %v1273_v56 = vsel %vm1267_vm6, %v1264_v28, %v3331_v39  ;;  %v3056_v6 = vunpack.i.h.bf16 %v5699_v47  ;;  %v3055_v5 = vunpack.i.l.bf16 %v5699_v47 }
 0x265   : > { %v3346_v57 = vunpack.i.h.bf16 %v4875_v23  ;;  %v3345_v63 = vunpack.i.l.bf16 %v4875_v23  ;;  %v3281_v24 = vunpack.i.h.bf16 %v4829_v11  ;;  %v3280_v50 = vunpack.i.l.bf16 %v4829_v11 }
 0x266   : > { %v4924_v48 = vpop.permute.xlu0 %3368  ;;  %v1283_v9 = vsel %vm1276_vm7, %v1274_v36, %v3045_v43  ;;  %v1284_v44 = vsel %vm1276_vm7, %v1275_v13, %v3046_v1  ;;  %v1281_v35 = vsel %vm1276_vm7, %v1272_v31, %v3055_v5  ;;  %v1282_v39 = vsel %vm1276_vm7, %v1273_v56, %v3056_v6 }
 0x267   : > { %v4930_v17 = vpop.permute.xlu1 %3388  ;;  %v1290_v0 = vsel %vm1285_vm9, %v1281_v35, %v3335_v26  ;;  %v1291_v23 = vsel %vm1285_vm9, %v1282_v39, %v3336_v8  ;;  %v5702_v15 = vpack.c.bf16 %v5700_v18, %v5701_v14  ;;  %v1293_v43 = vsel %vm1285_vm9, %v1284_v44, %v3281_v24  ;;  %v5703_v8 = vld [vmem:[#allocation18_spill] sm:$0xff]  ;;  %v5704_v26 = vld [vmem:[#allocation19_spill] sm:$0xff] }
 0x268   : > { %v1299_v52 = vsel %vm1294_vm8, %v1290_v0, %v3345_v63  ;;  %v1300_v1 = vsel %vm1294_vm8, %v1291_v23, %v3346_v57  ;;  %v3286_v7 = vunpack.i.h.bf16 %v4833_v60  ;;  %v3285_v59 = vunpack.i.l.bf16 %v4833_v60  ;;  %v5711_v0 = vld [vmem:[#allocation35_spill] sm:$0xff] }
 0x269   : > { %v3291_v31 = vunpack.i.h.bf16 %v4835_v54  ;;  %v3290_v56 = vunpack.i.l.bf16 %v4835_v54  ;;  %v5705_v47 = vpack.c.bf16 %v5703_v8, %v5704_v26  ;;  %v5706_v5 = vpack.c.bf16 %v5676_v29, %v5677_v4  ;;  %v5715_v26 = vld [vmem:[#allocation4_spill] sm:$0xff] }
 0x26a   : > { %2354 = vmatmul.mubr.bf16.gmra.mrb[4].mxu1 %v2114_v34  ;;  %v3379_v33 = vpop.permute.xlu0 %3378  ;;  %v1292_v34 = vsel %vm1285_vm9, %v1283_v9, %v3280_v50  ;;  %v1302_v13 = vsel %vm1294_vm8, %v1293_v43, %v3286_v7  ;;  %v5707_v9 = vld [vmem:[#allocation8_spill] sm:$0xff]  ;;  %v5714_v7 = vld [vmem:[#allocation43_spill] sm:$0xff] }
 0x26b   : > { %v3381_v27 = vunpack.i.h.bf16 %v3379_v33  ;;  %v3380_v10 = vunpack.i.l.bf16 %v3379_v33  ;;  %v4947_v11 = vpop.permute.xlu1 %3398  ;;  %2915 = vmatprep.mubr.msk.bf16.mxu1 %vm429_vm2, %v5702_v15  ;;  %v1301_v36 = vsel %vm1294_vm8, %v1292_v34, %v3285_v59  ;;  %v1311_v54 = vsel %vm1303_vm10, %v1302_v13, %v3291_v31 }
 0x26c   : > { %v1310_v57 = vsel %vm1303_vm10, %v1301_v36, %v3290_v56  ;;  %v5709_v62 = vpack.c.bf16 %v5707_v9, %v5708_v2  ;;  %v3066_v59 = vunpack.i.h.bf16 %v5714_v7  ;;  %v3361_v13 = vunpack.i.h.bf16 %v4901_v46 }
 0x26d   : > { %v1308_v21 = vsel %vm1303_vm10, %v1299_v52, %v3380_v10  ;;  %v1309_v20 = vsel %vm1303_vm10, %v1300_v1, %v3381_v27  ;;  %v2104_v24 = vpack.c.bf16 %v1311_v54, %v1310_v57  ;;  %v5712_v27 = vld [vmem:[#allocation22_spill] sm:$0xff]  ;;  %v5713_v52 = vld [vmem:[#allocation37_spill] sm:$0xff]  ;;  %v3360_v31 = vunpack.i.l.bf16 %v4901_v46 }
 0x26e   : > { %v4961_v51 = vpop.permute.xlu0 %3383  ;;  %v2102_v25 = vpack.c.bf16 %v1309_v20, %v1308_v21  ;;  %v3071_v1 = vunpack.i.h.bf16 %v5713_v52  ;;  %v3070_v21 = vunpack.i.l.bf16 %v5713_v52  ;;  %v3366_v52 = vunpack.i.h.bf16 %v4887_v22 }
 0x26f   : > { %v3409_v28 = vpop.permute.xlu1 %3408  ;;  %v3386_v16 = vunpack.i.h.bf16 %v4961_v51 }
 0x270   : > { %2306 = vmatmul.mubr.bf16.gmra.mrb[16].mxu0 %v2102_v25  ;;  %v3411_v39 = vunpack.i.h.bf16 %v3409_v28  ;;  %v3410_v33 = vunpack.i.l.bf16 %v3409_v28  ;;  %v3065_v25 = vunpack.i.l.bf16 %v5714_v7 }
 0x271   : > { %2909 = vmatprep.mubr.msk.bf16.mxu0 %vm429_vm2, %v5705_v47  ;;  %v5716_v47 = vld [vmem:[#allocation3_spill] sm:$0xff] }
 0x272   : > { %2362 = vmatmul.mubr.bf16.gmra.mrb[8].mxu1 %v2116_v53  ;;  %v4974_v60 = vpop.permute.xlu0 %3393  ;;  %v5710_v53 = vld [vmem:[#allocation40_spill] sm:$0xff]  ;;  %v1548_v30 = vsel %vm1267_vm6, %v4806_v41, %v3065_v25 }
 0x273   : > { %v3414_v6 = vpop.permute.xlu1 %3413  ;;  %2916 = vmatprep.mubr.msk.bf16.mxu1 %vm429_vm2, %v5706_v5  ;;  %v3061_v44 = vunpack.i.h.bf16 %v5710_v53  ;;  %v3060_v29 = vunpack.i.l.bf16 %v5710_v53  ;;  %v5718_v5 = vld [vmem:[#allocation42_spill] sm:$0xff] }
 0x274   : > { %v3416_v18 = vunpack.i.h.bf16 %v3414_v6  ;;  %v3415_v14 = vunpack.i.l.bf16 %v3414_v6  ;;  %v5717_v6 = vpack.c.bf16 %v5715_v26, %v5716_v47  ;;  %v3076_v57 = vunpack.i.h.bf16 %v5718_v5  ;;  %v1850_v26 = vld [vmem:[#allocation2 + $0x22] sm:$0xff] }
 0x275   : > { %v1799_v23 = vsel %vm429_vm2, %v5711_v0, %v3061_v44  ;;  %v1798_v10 = vsel %vm429_vm2, %v5712_v27, %v3060_v29  ;;  %v3556_v0 = vld [vmem:[#allocation2 + $0x11] sm:$0xff] }
 0x276   : > { %v4982_v63 = vpop.permute.xlu0 %3403  ;;  %v1806_v56 = vsel %vm1258_vm5, %v1798_v10, %v3410_v33  ;;  %v1807_v8 = vsel %vm1258_vm5, %v1799_v23, %v3411_v39  ;;  %v3555_v39 = vld [vmem:[#allocation2 + $0x21] sm:$0xff]  ;;  %v2042_v41 = vsel %vm429_vm2, %v3556_v0, %v3360_v31  ;;  %v3371_v10 = vunpack.i.h.bf16 %v4924_v48 }
 0x277   : > { %v3434_v50 = vpop.permute.xlu1 %3433  ;;  %v1814_v54 = vsel %vm1267_vm6, %v1806_v56, %v3415_v14  ;;  %v1815_v19 = vsel %vm1267_vm6, %v1807_v8, %v3416_v18  ;;  %v2043_v33 = vsel %vm429_vm2, %v3555_v39, %v3361_v13  ;;  %v3370_v18 = vunpack.i.l.bf16 %v4924_v48 }
 0x278   : > { %2314 = vmatmul.mubr.bf16.gmra.mrb[20].mxu0 %v2104_v24  ;;  %v3436_v53 = vunpack.i.h.bf16 %v3434_v50  ;;  %v3435_v44 = vunpack.i.l.bf16 %v3434_v50  ;;  %v3075_v48 = vunpack.i.l.bf16 %v5718_v5  ;;  %v5720_v8 = vpack.c.bf16 %v4041_v32, %v4046_v45 }
 0x279   : > { %2910 = vmatprep.mubr.msk.bf16.mxu0 %vm429_vm2, %v5709_v62  ;;  %v3376_v5 = vunpack.i.h.bf16 %v4907_v55  ;;  %v3396_v39 = vunpack.i.h.bf16 %v4974_v60 }
 0x27a   : > { %v3419_v4 = vpop.permute.xlu0 %3418  ;;  %v1556_v25 = vsel %vm1276_vm7, %v1548_v30, %v3435_v44  ;;  %v3406_v44 = vunpack.i.h.bf16 %v4982_v63 }
 0x27b   : > { %v4990_v35 = vpop.permute.xlu1 %3438  ;;  %v3421_v20 = vunpack.i.h.bf16 %v3419_v4  ;;  %v3420_v34 = vunpack.i.l.bf16 %v3419_v4 }
 0x27c   : > { %v3440_v0 = vunpack.i.l.bf16 %v4990_v35 }
 0x27d   : > { %v1822_v46 = vsel %vm1276_vm7, %v1814_v54, %v3420_v34  ;;  %v1823_v24 = vsel %vm1276_vm7, %v1815_v19, %v3421_v20  ;;  %v3365_v20 = vunpack.i.l.bf16 %v4887_v22  ;;  %v1549_v34 = vsel %vm1267_vm6, %v4809_v49, %v3066_v59 }
 0x27e   : > { %v3424_v15 = vpop.permute.xlu0 %3423  ;;  %v5719_v59 = vpack.c.bf16 %v4211_v42, %v5669_v40  ;;  %v1564_v42 = vsel %vm1285_vm9, %v1556_v25, %v3075_v48 }
 0x27f   : > { %v4998_v43 = vpop.permute.xlu1 %3458  ;;  %v3426_v28 = vunpack.i.h.bf16 %v3424_v15  ;;  %v3425_v36 = vunpack.i.l.bf16 %v3424_v15  ;;  %v2050_v22 = vsel %vm1258_vm5, %v2042_v41, %v3365_v20  ;;  %v3391_v41 = vunpack.i.h.bf16 %v4930_v17 }
 0x280   : > { %2322 = vmatmul.mubr.bf16.gmra.mrb[24].mxu0 %v2106_v58  ;;  %v2058_v31 = vsel %vm1267_vm6, %v2050_v22, %v3370_v18  ;;  %v3461_v48 = vunpack.i.h.bf16 %v4998_v43 }
 0x281   : > { %2911 = vmatprep.mubr.msk.bf16.mxu0 %vm429_vm2, %v5717_v6  ;;  %v1830_v29 = vsel %vm1285_vm9, %v1822_v46, %v3425_v36  ;;  %v1831_v4 = vsel %vm1285_vm9, %v1823_v24, %v3426_v28  ;;  %v1557_v28 = vsel %vm1276_vm7, %v1549_v34, %v3436_v53  ;;  %v3401_v46 = vunpack.i.h.bf16 %v4947_v11 }
 0x282   : > { %v3429_v58 = vpop.permute.xlu0 %3428  ;;  %v1565_v40 = vsel %vm1285_vm9, %v1557_v28, %v3076_v57  ;;  %v3400_v57 = vunpack.i.l.bf16 %v4947_v11  ;;  %v3441_v11 = vunpack.i.h.bf16 %v4990_v35 }
 0x283   : > { %v3431_v9 = vunpack.i.h.bf16 %v3429_v58  ;;  %v3430_v2 = vunpack.i.l.bf16 %v3429_v58  ;;  %v5020_v62 = vpop.permute.xlu1 %3468 }
 0x285   : > { %v1838_v23 = vsel %vm1294_vm8, %v1830_v29, %v3430_v2  ;;  %v1839_v27 = vsel %vm1294_vm8, %v1831_v4, %v3431_v9  ;;  %v3405_v29 = vunpack.i.l.bf16 %v4982_v63  ;;  %v3557_v63 = vld [vmem:[#allocation2 + $0x41] sm:$0xff] }
 0x286   : > { %v3444_v14 = vpop.permute.xlu0 %3443  ;;  %v1846_v50 = vsel %vm1303_vm10, %v1838_v23, %v3070_v21  ;;  %v1847_v15 = vsel %vm1303_vm10, %v1839_v27, %v3071_v1  ;;  %v3375_v1 = vunpack.i.l.bf16 %v4907_v55  ;;  %v2051_v21 = vsel %vm1258_vm5, %v2043_v33, %v3366_v52 }
 0x287   : > { %v2118_v7 = vpack.c.bf16 %v1847_v15, %v1846_v50  ;;  %v3446_v36 = vunpack.i.h.bf16 %v3444_v14  ;;  %v3445_v13 = vunpack.i.l.bf16 %v3444_v14  ;;  %v5045_v49 = vpop.permute.xlu1 %3473  ;;  %v2059_v38 = vsel %vm1267_vm6, %v2051_v21, %v3371_v10  ;;  %v3558_v14 = vld [vmem:[#allocation2 + $0x31] sm:$0xff] }
 0x288   : > { %2330 = vmatmul.mubr.bf16.gmra.mrb[28].mxu0 %v2108_v3  ;;  %v3385_v3 = vunpack.i.l.bf16 %v4961_v51  ;;  %v1851_v51 = vld [vmem:[#allocation2 + $0x32] sm:$0xff]  ;;  %v2066_v30 = vsel %vm1276_vm7, %v2058_v31, %v3375_v1  ;;  %v2067_v24 = vsel %vm1276_vm7, %v2059_v38, %v3376_v5  ;;  %v3395_v33 = vunpack.i.l.bf16 %v4974_v60 }
 0x289   : > { %2912 = vmatprep.mubr.msk.bf16.mxu0 %vm429_vm2, %v5719_v59  ;;  %2370 = vmatmul.mubr.bf16.gmra.mrb[12].mxu1 %v2118_v7  ;;  %v1572_v54 = vsel %vm1294_vm8, %v1564_v42, %v3445_v13  ;;  %v1573_v19 = vsel %vm1294_vm8, %v1565_v40, %v3446_v36  ;;  %v2123_v58 = vpack.c.bf16 %v1851_v51, %v1850_v26  ;;  %v3390_v23 = vunpack.i.l.bf16 %v4930_v17  ;;  %v1853_v13 = vld [vmem:[#allocation2 + $0x52] sm:$0xff]  ;;  %v1852_v59 = vld [vmem:[#allocation2 + $0x42] sm:$0xff] }
 0x28a   : > { %v3449_v56 = vpop.permute.xlu0 %3448  ;;  %2917 = vmatprep.mubr.msk.bf16.mxu1 %vm429_vm2, %v5720_v8  ;;  %v2074_v2 = vsel %vm1285_vm9, %v2066_v30, %v3385_v3  ;;  %v2075_v53 = vsel %vm1285_vm9, %v2067_v24, %v3386_v16  ;;  %v2045_v18 = vsel %vm429_vm2, %v3557_v63, %v3401_v46  ;;  %v2044_v60 = vsel %vm429_vm2, %v3558_v14, %v3400_v57  ;;  %v3560_v51 = vld [vmem:[#allocation2 + $0x51] sm:$0xff] }
 0x28b   : > { %v3451_v47 = vunpack.i.h.bf16 %v3449_v56  ;;  %v3450_v6 = vunpack.i.l.bf16 %v3449_v56  ;;  %v5074_v4 = vpop.permute.xlu1 %3478  ;;  %v2052_v35 = vsel %vm1258_vm5, %v2044_v60, %v3405_v29  ;;  %v2053_v15 = vsel %vm1258_vm5, %v2045_v18, %v3406_v44 }
 0x28c   : > { %v2082_v17 = vsel %vm1294_vm8, %v2074_v2, %v3390_v23  ;;  %v2083_v52 = vsel %vm1294_vm8, %v2075_v53, %v3391_v41  ;;  %v2060_v61 = vsel %vm1267_vm6, %v2052_v35, %v3440_v0  ;;  %v2061_v37 = vsel %vm1267_vm6, %v2053_v15, %v3441_v11 }
 0x28d   : > { %v1580_v32 = vsel %vm1303_vm10, %v1572_v54, %v3450_v6  ;;  %v1581_v45 = vsel %vm1303_vm10, %v1573_v19, %v3451_v47  ;;  %v2091_v20 = vsel %vm1303_vm10, %v2083_v52, %v3396_v39  ;;  %v3460_v1 = vunpack.i.l.bf16 %v4998_v43  ;;  %v3559_v54 = vld [vmem:[#allocation2 + $0x61] sm:$0xff] }
 0x28e   : > { %v3454_v9 = vpop.permute.xlu0 %3453  ;;  %v2110_v55 = vpack.c.bf16 %v1581_v45, %v1580_v32  ;;  %v2125_v16 = vpack.c.bf16 %v1853_v13, %v1852_v59  ;;  %v3471_v8 = vunpack.i.h.bf16 %v5020_v62  ;;  %v3470_v26 = vunpack.i.l.bf16 %v5020_v62  ;;  %v1854_v32 = vld [vmem:[#allocation2 + $0x62] sm:$0xff]  ;;  %v1855_v45 = vld [vmem:[#allocation2 + $0x72] sm:$0xff] }
 0x28f   : > { %v3456_v27 = vunpack.i.h.bf16 %v3454_v9  ;;  %v3455_v10 = vunpack.i.l.bf16 %v3454_v9  ;;  %v5098_v25 = vpop.permute.xlu1 %3483  ;;  %v3476_v62 = vunpack.i.h.bf16 %v5045_v49  ;;  %v2127_v53 = vpack.c.bf16 %v1855_v45, %v1854_v32  ;;  %v3561_v52 = vld [vmem:[#allocation2 + $0x81] sm:$0xff] }
 0x290   : > { %2338 = vmatmul.mubr.bf16.gmra.mrb[32].mxu0 %v2110_v55  ;;  %v3485_v41 = vunpack.i.l.bf16 %v5098_v25  ;;  %v3481_v35 = vunpack.i.h.bf16 %v5074_v4  ;;  %v3480_v15 = vunpack.i.l.bf16 %v5074_v4 }
 0x291   : > { %2378 = vmatmul.mubr.bf16.gmra.mrb[16].mxu1 %v2120_v12  ;;  %v2090_v12 = vsel %vm1303_vm10, %v2082_v17, %v3395_v33  ;;  %v2068_v34 = vsel %vm1276_vm7, %v2060_v61, %v3455_v10  ;;  %v2069_v7 = vsel %vm1276_vm7, %v2061_v37, %v3456_v27  ;;  %v3562_v37 = vld [vmem:[#allocation2 + $0x71] sm:$0xff] }
 0x292   : > { %v3464_v50 = vpop.permute.xlu0 %3463  ;;  %2918 = vmatprep.mubr.msk.bf16.mxu1 %vm429_vm2, %v2123_v58  ;;  %v2122_v21 = vpack.c.bf16 %v2091_v20, %v2090_v12  ;;  %v2076_v31 = vsel %vm1285_vm9, %v2068_v34, %v3460_v1  ;;  %v2077_v38 = vsel %vm1285_vm9, %v2069_v7, %v3461_v48  ;;  %v3475_v58 = vunpack.i.l.bf16 %v5045_v49  ;;  %v1856_v48 = vld [vmem:[#allocation2 + $0x82] sm:$0xff]  ;;  %v1857_v1 = vld [vmem:[#allocation2 + $0x92] sm:$0xff] }
 0x293   : > { %v3466_v28 = vunpack.i.h.bf16 %v3464_v50  ;;  %v3465_v36 = vunpack.i.l.bf16 %v3464_v50  ;;  %v3504_v43 = vpop.permute.xlu1 %3503  ;;  %v3486_v49 = vunpack.i.h.bf16 %v5098_v25  ;;  %v2048_v12 = vsel %vm429_vm2, %v3562_v37, %v3485_v41 }
 0x294   : > { %v3506_v33 = vunpack.i.h.bf16 %v3504_v43  ;;  %v3505_v11 = vunpack.i.l.bf16 %v3504_v43 }
 0x295   : > { %v2084_v3 = vsel %vm1294_vm8, %v2076_v31, %v3465_v36  ;;  %v2085_v56 = vsel %vm1294_vm8, %v2077_v38, %v3466_v28  ;;  %v2049_v61 = vsel %vm429_vm2, %v3561_v52, %v3486_v49 }
 0x296   : > { %v5102_v22 = vpop.permute.xlu0 %3488  ;;  %v2092_v6 = vsel %vm1303_vm10, %v2084_v3, %v3470_v26  ;;  %v2093_v5 = vsel %vm1303_vm10, %v2085_v56, %v3471_v8  ;;  %v2129_v56 = vpack.c.bf16 %v1857_v1, %v1856_v48 }
 0x297   : > { %v2124_v9 = vpack.c.bf16 %v2093_v5, %v2092_v6  ;;  %v3509_v44 = vpop.permute.xlu1 %3508  ;;  %v3491_v18 = vunpack.i.h.bf16 %v5102_v22  ;;  %v3490_v14 = vunpack.i.l.bf16 %v5102_v22 }
 0x298   : > { %v3511_v25 = vunpack.i.h.bf16 %v3509_v44  ;;  %v3510_v28 = vunpack.i.l.bf16 %v3509_v44 }
 0x299   : > { %2386 = vmatmul.mubr.bf16.gmra.mrb[20].mxu1 %v2122_v21  ;;  %v2056_v4 = vsel %vm1258_vm5, %v2048_v12, %v3490_v14  ;;  %v2057_v22 = vsel %vm1258_vm5, %v2049_v61, %v3491_v18 }
 0x29a   : > { %v3494_v42 = vpop.permute.xlu0 %3493  ;;  %2919 = vmatprep.mubr.msk.bf16.mxu1 %vm429_vm2, %v2125_v16  ;;  %v2064_v8 = vsel %vm1267_vm6, %v2056_v4, %v3510_v28  ;;  %v2065_v26 = vsel %vm1267_vm6, %v2057_v22, %v3511_v25 }
 0x29b   : > { %v3496_v40 = vunpack.i.h.bf16 %v3494_v42  ;;  %v3495_v47 = vunpack.i.l.bf16 %v3494_v42  ;;  %v3529_v20 = vpop.permute.xlu1 %3528 }
 0x29c   : > { %v3530_v6 = vunpack.i.l.bf16 %v3529_v20 }
 0x29d   : > { %v2047_v19 = vsel %vm429_vm2, %v3559_v54, %v3496_v40  ;;  %v2046_v30 = vsel %vm429_vm2, %v3560_v51, %v3495_v47  ;;  %v3531_v47 = vunpack.i.h.bf16 %v3529_v20 }
 0x29e   : > { %v3499_v46 = vpop.permute.xlu0 %3498  ;;  %v2054_v55 = vsel %vm1258_vm5, %v2046_v30, %v3475_v58  ;;  %v2055_v2 = vsel %vm1258_vm5, %v2047_v19, %v3476_v62 }
 0x29f   : > { %v3501_v57 = vunpack.i.h.bf16 %v3499_v46  ;;  %v3500_v24 = vunpack.i.l.bf16 %v3499_v46 }
 0x2a1   : > { %v2062_v29 = vsel %vm1267_vm6, %v2054_v55, %v3500_v24  ;;  %v2063_v39 = vsel %vm1267_vm6, %v2055_v2, %v3501_v57  ;;  %2394 = vmatmul.mubr.bf16.gmra.mrb[24].mxu1 %v2124_v9  ;;  %v3539_v42 = vpop.permute.xlu1 %3538 }
 0x2a2   : > { %2920 = vmatprep.mubr.msk.bf16.mxu1 %vm429_vm2, %v2127_v53  ;;  %v2070_v10 = vsel %vm1276_vm7, %v2062_v29, %v3505_v11  ;;  %v2071_v63 = vsel %vm1276_vm7, %v2063_v39, %v3506_v33  ;;  %v3541_v51 = vunpack.i.h.bf16 %v3539_v42  ;;  %v3540_v30 = vunpack.i.l.bf16 %v3539_v42  ;;  %v5154_v11 = vld [vmem:[%s5560_s5] ss:$0 sm:$0xff] }
 0x2a5   : > { %v3514_v0 = vpop.permute.xlu0 %3513 }
 0x2a6   : > { %v3516_v23 = vunpack.i.h.bf16 %v3514_v0  ;;  %v3515_v27 = vunpack.i.l.bf16 %v3514_v0 }
 0x2a8   : > { %v2078_v60 = vsel %vm1285_vm9, %v2070_v10, %v3515_v27  ;;  %v2079_v50 = vsel %vm1285_vm9, %v2071_v63, %v3516_v23 }
 0x2a9   : > { %v3519_v17 = vpop.permute.xlu0 %3518  ;;  %v2086_v36 = vsel %vm1294_vm8, %v2078_v60, %v3480_v15  ;;  %v2087_v13 = vsel %vm1294_vm8, %v2079_v50, %v3481_v35 }
 0x2aa   : > { %v3521_v34 = vunpack.i.h.bf16 %v3519_v17  ;;  %v3520_v7 = vunpack.i.l.bf16 %v3519_v17 }
 0x2ac   : > { %v2094_v21 = vsel %vm1303_vm10, %v2086_v36, %v3520_v7  ;;  %v2095_v59 = vsel %vm1303_vm10, %v2087_v13, %v3521_v34 }
 0x2ad   : > { %v3524_v31 = vpop.permute.xlu0 %3523  ;;  %v2126_v38 = vpack.c.bf16 %v2095_v59, %v2094_v21 }
 0x2ae   : > { %v3526_v16 = vunpack.i.h.bf16 %v3524_v31  ;;  %v3525_v3 = vunpack.i.l.bf16 %v3524_v31 }
 0x2af   : > { %2402 = vmatmul.mubr.bf16.gmra.mrb[28].mxu1 %v2126_v38 }
 0x2b0   : > { %v2072_v43 = vsel %vm1276_vm7, %v2064_v8, %v3525_v3  ;;  %v2073_v40 = vsel %vm1276_vm7, %v2065_v26, %v3526_v16  ;;  %2921 = vmatprep.mubr.msk.bf16.mxu1 %vm429_vm2, %v2129_v56 }
 0x2b1   : > { %v3534_v5 = vpop.permute.xlu0 %3533  ;;  %v2080_v32 = vsel %vm1285_vm9, %v2072_v43, %v3530_v6  ;;  %v2081_v45 = vsel %vm1285_vm9, %v2073_v40, %v3531_v47 }
 0x2b2   : > { %v3536_v54 = vunpack.i.h.bf16 %v3534_v5  ;;  %v3535_v19 = vunpack.i.l.bf16 %v3534_v5 }
 0x2b4   : > { %v2088_v62 = vsel %vm1294_vm8, %v2080_v32, %v3535_v19  ;;  %v2089_v58 = vsel %vm1294_vm8, %v2081_v45, %v3536_v54 }
 0x2b5   : > { %v2096_v46 = vsel %vm1303_vm10, %v2088_v62, %v3540_v30  ;;  %v2097_v57 = vsel %vm1303_vm10, %v2089_v58, %v3541_v51 }
 0x2b6   : > { %v2128_v24 = vpack.c.bf16 %v2097_v57, %v2096_v46 }
 0x2b8   : > { %2410 = vmatmul.mubr.bf16.gmra.mrb[32].mxu1 %v2128_v24 }
 0x2f5   : > { %v2291_v9 = vpop.f32.mrb[8].mxu0 }
 0x2f6   : > { %v2293_v55 = vpop.f32.mrb[9].mxu0  ;;  %v5178_v17 = vadd.f32 %v5154_v11, %v2291_v9 }
 0x2f7   : > { %v2294_v2 = vpop.f32.mrb[10].mxu0 }
 0x2f8   : > { %v2296_v53 = vpop.f32.mrb[11].mxu0  ;;  %v5170_v50 = vadd.f32 %v5154_v11, %v2294_v2  ;;  %v2547_v7 = vsel %vm347_vm1, %v5178_v17, 0.0 }
 0x2fa   : > { %v2548_v37 = vsel %vm347_vm1, %v5170_v50, 0.0 }
 0x2fb   : > { %v2549_v1 = vadd.f32 %v2548_v37, %v2547_v7 }
 0x2fd   : > { %v2299_v44 = vpop.f32.mrb[12].mxu0 }
 0x2fe   : > { %v2301_v29 = vpop.f32.mrb[13].mxu0  ;;  %v5181_v52 = vadd.f32 %v5154_v11, %v2299_v44 }
 0x2ff   : > { %v2302_v39 = vpop.f32.mrb[14].mxu0 }
 0x300   : > { %v2304_v33 = vpop.f32.mrb[15].mxu0  ;;  %v2550_v25 = vsel %vm347_vm1, %v5181_v52, 0.0  ;;  %v5192_v28 = vadd.f32 %v5154_v11, %v2302_v39 }
 0x301   : > { %v2551_v31 = vadd.f32 %v2550_v25, %v2549_v1 }
 0x302   : > { %v2552_v38 = vsel %vm347_vm1, %v5192_v28, 0.0 }
 0x303   : > { %v2553_v26 = vadd.f32 %v2552_v38, %v2551_v31 }
 0x335   : > { %v2347_v0 = vpop.f32.mrb[0].mxu1 }
 0x336   : > { %v5157_v49 = vadd.f32 %v5154_v11, %v2347_v0  ;;  %v2349_v41 = vpop.f32.mrb[1].mxu1 }
 0x337   : > { %v2350_v23 = vpop.f32.mrb[2].mxu1 }
 0x338   : > { %v5160_v27 = vadd.f32 %v5154_v11, %v2350_v23  ;;  %v2352_v10 = vpop.f32.mrb[3].mxu1  ;;  %2438 = vrot.lane.b32.xlu0 %v5157_v49, %s3571_s13 }
 0x33a   : > { %2440 = vrot.lane.b32.xlu1 %v5160_v27, %s3571_s13 }
 0x33d   : > { %v2355_v63 = vpop.f32.mrb[4].mxu1 }
 0x33e   : > { %v5167_v18 = vadd.f32 %v5154_v11, %v2355_v63  ;;  %v2357_v14 = vpop.f32.mrb[5].mxu1 }
 0x33f   : > { %v2358_v60 = vpop.f32.mrb[6].mxu1 }
 0x340   : > { %v5173_v35 = vadd.f32 %v5154_v11, %v2358_v60  ;;  %v2360_v15 = vpop.f32.mrb[7].mxu1  ;;  %2458 = vrot.lane.b32.xlu0 %v5167_v18, %s3576_s19 }
 0x342   : > { %2460 = vrot.lane.b32.xlu1 %v5173_v35, %s3576_s19 }
 0x343   : > { %v2307_v61 = vpop.f32.mrb[16].mxu0 }
 0x344   : > { %v2309_v12 = vpop.f32.mrb[17].mxu0  ;;  %v5198_v22 = vadd.f32 %v5154_v11, %v2307_v61 }
 0x345   : > { %v2363_v20 = vpop.f32.mrb[8].mxu1  ;;  %v2310_v34 = vpop.f32.mrb[18].mxu0 }
 0x346   : > { %v5195_v36 = vadd.f32 %v5154_v11, %v2363_v20  ;;  %v2365_v13 = vpop.f32.mrb[9].mxu1  ;;  %v2312_v48 = vpop.f32.mrb[19].mxu0  ;;  %v2554_v3 = vsel %vm347_vm1, %v5198_v22, 0.0  ;;  %v5212_v56 = vadd.f32 %v5154_v11, %v2310_v34 }
 0x347   : > { %v2366_v4 = vpop.f32.mrb[10].mxu1  ;;  %v2555_v47 = vadd.f32 %v2554_v3, %v2553_v26 }
 0x348   : > { %v5201_v21 = vadd.f32 %v5154_v11, %v2366_v4  ;;  %v2368_v59 = vpop.f32.mrb[11].mxu1  ;;  %2462 = vrot.lane.b32.xlu0 %v5195_v36, %s3576_s19  ;;  %v2556_v6 = vsel %vm347_vm1, %v5212_v56, 0.0 }
 0x349   : > { %v2557_v19 = vadd.f32 %v2556_v6, %v2555_v47  ;;  %v2574_v47 = vsel %vm347_vm1, %v5157_v49, 0.0 }
 0x34a   : > { %2464 = vrot.lane.b32.xlu1 %v5201_v21, %s3576_s19 }
 0x34b   : > { %v2315_v16 = vpop.f32.mrb[20].mxu0 }
 0x34c   : > { %v2317_v8 = vpop.f32.mrb[21].mxu0  ;;  %v5215_v43 = vadd.f32 %v5154_v11, %v2315_v16 }
 0x34d   : > { %v2318_v42 = vpop.f32.mrb[22].mxu0 }
 0x34e   : > { %v2320_v40 = vpop.f32.mrb[23].mxu0  ;;  %v2558_v5 = vsel %vm347_vm1, %v5215_v43, 0.0  ;;  %v5222_v54 = vadd.f32 %v5154_v11, %v2318_v42 }
 0x34f   : > { %v2559_v45 = vadd.f32 %v2558_v5, %v2557_v19  ;;  %v2576_v5 = vsel %vm347_vm1, %v5160_v27, 0.0 }
 0x350   : > { %v2560_v58 = vsel %vm347_vm1, %v5222_v54, 0.0 }
 0x351   : > { %v2561_v9 = vadd.f32 %v2560_v58, %v2559_v45 }
 0x353   : > { %v2323_v51 = vpop.f32.mrb[24].mxu0 }
 0x354   : > { %v5225_v30 = vadd.f32 %v5154_v11, %v2323_v51  ;;  %v2325_v32 = vpop.f32.mrb[25].mxu0 }
 0x355   : > { %v2326_v62 = vpop.f32.mrb[26].mxu0 }
 0x356   : > { %v5230_v46 = vadd.f32 %v5154_v11, %v2326_v62  ;;  %v2328_v57 = vpop.f32.mrb[27].mxu0  ;;  %2426 = vrot.lane.b32.xlu0 %v5225_v30, %s3571_s13  ;;  %v2562_v24 = vsel %vm347_vm1, %v5225_v30, 0.0  ;;  %v2578_v62 = vsel %vm347_vm1, %v5167_v18, 0.0 }
 0x357   : > { %v2563_v55 = vadd.f32 %v2562_v24, %v2561_v9 }
 0x358   : > { %2428 = vrot.lane.b32.xlu1 %v5230_v46, %s3571_s13  ;;  %v2564_v53 = vsel %vm347_vm1, %v5230_v46, 0.0 }
 0x359   : > { %v2565_v60 = vadd.f32 %v2564_v53, %v2563_v55  ;;  %v2580_v55 = vsel %vm347_vm1, %v5173_v35, 0.0  ;;  %v2582_v53 = vsel %vm347_vm1, %v5195_v36, 0.0 }
 0x35b   : > { %v2331_v2 = vpop.f32.mrb[28].mxu0 }
 0x35c   : > { %v5241_v44 = vadd.f32 %v5154_v11, %v2331_v2  ;;  %v2333_v29 = vpop.f32.mrb[29].mxu0  ;;  %v2371_v39 = vpop.f32.mrb[12].mxu1 }
 0x35d   : > { %v5244_v33 = vadd.f32 %v5154_v11, %v2371_v39  ;;  %v2334_v0 = vpop.f32.mrb[30].mxu0  ;;  %v2373_v41 = vpop.f32.mrb[13].mxu1  ;;  %v2584_v39 = vsel %vm347_vm1, %v5201_v21, 0.0 }
 0x35e   : > { %v2566_v23 = vsel %vm347_vm1, %v5241_v44, 0.0  ;;  %v5249_v10 = vadd.f32 %v5154_v11, %v2334_v0  ;;  %v2336_v63 = vpop.f32.mrb[31].mxu0  ;;  %v2374_v14 = vpop.f32.mrb[14].mxu1 }
 0x35f   : > { %v5252_v15 = vadd.f32 %v5154_v11, %v2374_v14  ;;  %v2376_v61 = vpop.f32.mrb[15].mxu1  ;;  %2466 = vrot.lane.b32.xlu0 %v5244_v33, %s3576_s19  ;;  %v2567_v37 = vadd.f32 %v2566_v23, %v2565_v60  ;;  %v2586_v14 = vsel %vm347_vm1, %v5244_v33, 0.0 }
 0x360   : > { %v2568_v12 = vsel %vm347_vm1, %v5249_v10, 0.0 }
 0x361   : > { %2468 = vrot.lane.b32.xlu1 %v5252_v15, %s3576_s19  ;;  %v2569_v13 = vadd.f32 %v2568_v12, %v2567_v37 }
 0x363   : > { %v2339_v20 = vpop.f32.mrb[32].mxu0  ;;  %2430 = vrot.lane.b32.xlu0 %v5241_v44, %s3571_s13 }
 0x364   : > { %v5263_v34 = vadd.f32 %v5154_v11, %v2339_v20  ;;  %v2341_v7 = vpop.f32.mrb[33].mxu0  ;;  %v2379_v25 = vpop.f32.mrb[16].mxu1  ;;  %v2588_v20 = vsel %vm347_vm1, %v5252_v15, 0.0 }
 0x365   : > { %v5266_v48 = vadd.f32 %v5154_v11, %v2379_v25  ;;  %v2342_v1 = vpop.f32.mrb[34].mxu0  ;;  %v2381_v4 = vpop.f32.mrb[17].mxu1  ;;  %2432 = vrot.lane.b32.xlu1 %v5249_v10, %s3571_s13 }
 0x366   : > { %v2570_v59 = vsel %vm347_vm1, %v5263_v34, 0.0  ;;  %v5273_v31 = vadd.f32 %v5154_v11, %v2342_v1  ;;  %v2344_v38 = vpop.f32.mrb[35].mxu0  ;;  %v2382_v16 = vpop.f32.mrb[18].mxu1 }
 0x367   : > { %v2571_v3 = vadd.f32 %v2570_v59, %v2569_v13  ;;  %v5276_v8 = vadd.f32 %v5154_v11, %v2382_v16  ;;  %v2384_v26 = vpop.f32.mrb[19].mxu1  ;;  %2470 = vrot.lane.b32.xlu0 %v5266_v48, %s3576_s19  ;;  %v2590_v25 = vsel %vm347_vm1, %v5266_v48, 0.0 }
 0x368   : > { %v2572_v42 = vsel %vm347_vm1, %v5273_v31, 0.0 }
 0x369   : > { %v2573_v40 = vadd.f32 %v2572_v42, %v2571_v3  ;;  %2472 = vrot.lane.b32.xlu1 %v5276_v8, %s3576_s19  ;;  %s3583_s19 = smov 24   ;;  %v2592_v1 = vsel %vm347_vm1, %v5276_v8, 0.0 }
 0x36b   : > { %v2575_v6 = vadd.f32 %v2574_v47, %v2573_v40  ;;  %2434 = vrot.lane.b32.xlu0 %v5263_v34, %s3571_s13 }
 0x36c   : > { %v2387_v19 = vpop.f32.mrb[20].mxu1 }
 0x36d   : > { %v2577_v51 = vadd.f32 %v2576_v5, %v2575_v6  ;;  %v5291_v32 = vadd.f32 %v5154_v11, %v2387_v19  ;;  %2436 = vrot.lane.b32.xlu1 %v5273_v31, %s3571_s13  ;;  %v2389_v45 = vpop.f32.mrb[21].mxu1  ;;  %s2926_s13 = sshll.u32 %s5722_s25, 6 }
 0x36e   : > { %v2390_v58 = vpop.f32.mrb[22].mxu1  ;;  %s5483_s27 = scalar_lea.vmem %s5561_s6, %s2926_s13 }
 0x36f   : > { %v2579_v57 = vadd.f32 %v2578_v62, %v2577_v51  ;;  %v5298_v24 = vadd.f32 %v5154_v11, %v2390_v58  ;;  %v2392_v9 = vpop.f32.mrb[23].mxu1  ;;  %2490 = vrot.lane.b32.xlu0 %v5291_v32, %s3583_s19  ;;  %v2594_v59 = vsel %vm347_vm1, %v5291_v32, 0.0 }
 0x371   : > { %v2581_v2 = vadd.f32 %v2580_v55, %v2579_v57  ;;  %2492 = vrot.lane.b32.xlu1 %v5298_v24, %s3583_s19  ;;  %v2596_v3 = vsel %vm347_vm1, %v5298_v24, 0.0 }
 0x373   : > { %v2583_v29 = vadd.f32 %v2582_v53, %v2581_v2 }
 0x374   : > { %v2395_v0 = vpop.f32.mrb[24].mxu1 }
 0x375   : > { %v2585_v41 = vadd.f32 %v2584_v39, %v2583_v29  ;;  %v5311_v23 = vadd.f32 %v5154_v11, %v2395_v0  ;;  %v2397_v63 = vpop.f32.mrb[25].mxu1 }
 0x376   : > { %v2398_v60 = vpop.f32.mrb[26].mxu1 }
 0x377   : > { %v2587_v61 = vadd.f32 %v2586_v14, %v2585_v41  ;;  %v5316_v37 = vadd.f32 %v5154_v11, %v2398_v60  ;;  %v2400_v12 = vpop.f32.mrb[27].mxu1  ;;  %2494 = vrot.lane.b32.xlu0 %v5311_v23, %s3583_s19  ;;  %v2598_v6 = vsel %vm347_vm1, %v5311_v23, 0.0 }
 0x379   : > { %v2589_v7 = vadd.f32 %v2588_v20, %v2587_v61  ;;  %2496 = vrot.lane.b32.xlu1 %v5316_v37, %s3583_s19  ;;  %v2600_v45 = vsel %vm347_vm1, %v5316_v37, 0.0 }
 0x37b   : > { %v2591_v13 = vadd.f32 %v2590_v25, %v2589_v7 }
 0x37d   : > { %v2593_v4 = vadd.f32 %v2592_v1, %v2591_v13 }
 0x37f   : > { %v2595_v38 = vadd.f32 %v2594_v59, %v2593_v4 }
 0x381   : > { %v2597_v40 = vadd.f32 %v2596_v3, %v2595_v38 }
 0x382   : > { %v2403_v16 = vpop.f32.mrb[28].mxu1 }
 0x383   : > { %v5333_v26 = vadd.f32 %v5154_v11, %v2403_v16  ;;  %v2405_v42 = vpop.f32.mrb[29].mxu1  ;;  %v2599_v51 = vadd.f32 %v2598_v6, %v2597_v40 }
 0x384   : > { %v2406_v47 = vpop.f32.mrb[30].mxu1 }
 0x385   : > { %v5338_v5 = vadd.f32 %v5154_v11, %v2406_v47  ;;  %v2408_v19 = vpop.f32.mrb[31].mxu1  ;;  %2498 = vrot.lane.b32.xlu0 %v5333_v26, %s3583_s19  ;;  %v2601_v62 = vadd.f32 %v2600_v45, %v2599_v51  ;;  %v2602_v58 = vsel %vm347_vm1, %v5333_v26, 0.0 }
 0x387   : > { %2500 = vrot.lane.b32.xlu1 %v5338_v5, %s3583_s19  ;;  %v2603_v57 = vadd.f32 %v2602_v58, %v2601_v62  ;;  %v2604_v9 = vsel %vm347_vm1, %v5338_v5, 0.0 }
 0x389   : > { %v2605_v2 = vadd.f32 %v2604_v9, %v2603_v57 }
 0x38b   : > { %v2411_v55 = vpop.f32.mrb[32].mxu1 }
 0x38c   : > { %v5351_v53 = vadd.f32 %v5154_v11, %v2411_v55  ;;  %v2413_v29 = vpop.f32.mrb[33].mxu1 }
 0x38d   : > { %v2414_v39 = vpop.f32.mrb[34].mxu1 }
 0x38e   : > { %v2606_v0 = vsel %vm347_vm1, %v5351_v53, 0.0  ;;  %v5356_v41 = vadd.f32 %v5154_v11, %v2414_v39  ;;  %v2416_v63 = vpop.f32.mrb[35].mxu1  ;;  %2502 = vrot.lane.b32.xlu0 %v5351_v53, %s3583_s19 }
 0x38f   : > { %v2607_v14 = vadd.f32 %v2606_v0, %v2605_v2 }
 0x390   : > { %v2608_v60 = vsel %vm347_vm1, %v5356_v41, 0.0  ;;  %2504 = vrot.lane.b32.xlu1 %v5356_v41, %s3583_s19 }
 0x391   : > { %v2609_v61 = vadd.f32 %v2608_v60, %v2607_v14 }
 0x393   : > { %v2610_v12 = vrot.slane %v2609_v61, 4 }
 0x395   : > { %v2611_v20 = vadd.f32 %v2610_v12, %v2609_v61 }
 0x397   : > { %v2612_v7 = vrot.slane %v2611_v20, 2 }
 0x399   : > { %v2613_v25 = vadd.f32 %v2612_v7, %v2611_v20 }
 0x39b   : > { %v2614_v13 = vrot.slane %v2613_v25, 1 }
 0x39d   : > { %v2615_v1 = vadd.f32 %v2614_v13, %v2613_v25 }
 0x39f   : > { %v5364_v11 = vmul.f32 0.00390625, %v2615_v1 }
 0x3a1   : > { %v2617_v4 = vsub.f32 %v5178_v17, %v5364_v11  ;;  %v2618_v59 = vsub.f32 %v5170_v50, %v5364_v11  ;;  %v2619_v38 = vsub.f32 %v5181_v52, %v5364_v11  ;;  %v2620_v16 = vsub.f32 %v5192_v28, %v5364_v11 }
 0x3a2   : > { %v2621_v40 = vsub.f32 %v5198_v22, %v5364_v11  ;;  %v2622_v6 = vsub.f32 %v5212_v56, %v5364_v11  ;;  %v2623_v58 = vsub.f32 %v5215_v43, %v5364_v11  ;;  %v2624_v2 = vsub.f32 %v5222_v54, %v5364_v11 }
 0x3a3   : > { %v2649_v3 = vmul.f32 %v2617_v4, %v2617_v4  ;;  %v2650_v42 = vmul.f32 %v2618_v59, %v2618_v59  ;;  %v2651_v47 = vmul.f32 %v2619_v38, %v2619_v38  ;;  %v2652_v19 = vmul.f32 %v2620_v16, %v2620_v16 }
 0x3a4   : > { %v2653_v57 = vmul.f32 %v2621_v40, %v2621_v40  ;;  %v2654_v29 = vmul.f32 %v2622_v6, %v2622_v6  ;;  %v2625_v63 = vsub.f32 %v5225_v30, %v5364_v11  ;;  %v2655_v14 = vmul.f32 %v2623_v58, %v2623_v58 }
 0x3a5   : > { %v2681_v51 = vsel %vm347_vm1, %v2649_v3, 0.0  ;;  %v2682_v45 = vsel %vm347_vm1, %v2650_v42, 0.0  ;;  %v2684_v9 = vsel %vm347_vm1, %v2651_v47, 0.0  ;;  %v2686_v39 = vsel %vm347_vm1, %v2652_v19, 0.0 }
 0x3a6   : > { %v2683_v62 = vadd.f32 %v2682_v45, %v2681_v51  ;;  %v2688_v60 = vsel %vm347_vm1, %v2653_v57, 0.0  ;;  %v2626_v12 = vsub.f32 %v5230_v46, %v5364_v11  ;;  %v2656_v20 = vmul.f32 %v2624_v2, %v2624_v2 }
 0x3a7   : > { %v2690_v7 = vsel %vm347_vm1, %v2654_v29, 0.0  ;;  %v2627_v13 = vsub.f32 %v5241_v44, %v5364_v11  ;;  %v2657_v1 = vmul.f32 %v2625_v63, %v2625_v63  ;;  %v2692_v4 = vsel %vm347_vm1, %v2655_v14, 0.0 }
 0x3a8   : > { %v2685_v55 = vadd.f32 %v2684_v9, %v2683_v62  ;;  %v2628_v30 = vsub.f32 %v5249_v10, %v5364_v11  ;;  %v2658_v38 = vmul.f32 %v2626_v12, %v2626_v12  ;;  %v2694_v16 = vsel %vm347_vm1, %v2656_v20, 0.0 }
 0x3a9   : > { %v2629_v46 = vsub.f32 %v5263_v34, %v5364_v11  ;;  %v2659_v42 = vmul.f32 %v2627_v13, %v2627_v13  ;;  %v2696_v40 = vsel %vm347_vm1, %v2657_v1, 0.0  ;;  %v2630_v44 = vsub.f32 %v5273_v31, %v5364_v11 }
 0x3aa   : > { %v2687_v0 = vadd.f32 %v2686_v39, %v2685_v55  ;;  %v2660_v6 = vmul.f32 %v2628_v30, %v2628_v30  ;;  %v2698_v19 = vsel %vm347_vm1, %v2658_v38, 0.0  ;;  %v2631_v10 = vsub.f32 %v5157_v49, %v5364_v11  ;;  %v5407_v57 = vpop.permute.xlu0 %2438 }
 0x3ab   : > { %v2661_v45 = vmul.f32 %v2629_v46, %v2629_v46  ;;  %v2700_v62 = vsel %vm347_vm1, %v2659_v42, 0.0  ;;  %v2632_v34 = vsub.f32 %v5160_v27, %v5364_v11  ;;  %v2662_v9 = vmul.f32 %v2630_v44, %v2630_v44 }
 0x3ac   : > { %v2689_v61 = vadd.f32 %v2688_v60, %v2687_v0  ;;  %v2702_v55 = vsel %vm347_vm1, %v2660_v6, 0.0  ;;  %v5412_v2 = vpop.permute.xlu1 %2440  ;;  %v2633_v29 = vsub.f32 %v5167_v18, %v5364_v11  ;;  %v2663_v39 = vmul.f32 %v2631_v10, %v2631_v10 }
 0x3ad   : > { %v2704_v49 = vsel %vm347_vm1, %v2661_v45, 0.0  ;;  %v2634_v14 = vsub.f32 %v5173_v35, %v5364_v11  ;;  %v2664_v60 = vmul.f32 %v2632_v34, %v2632_v34  ;;  %v2706_v27 = vsel %vm347_vm1, %v2662_v9, 0.0 }
 0x3ae   : > { %v2691_v25 = vadd.f32 %v2690_v7, %v2689_v61  ;;  %v2635_v20 = vsub.f32 %v5195_v36, %v5364_v11  ;;  %v2665_v7 = vmul.f32 %v2633_v29, %v2633_v29  ;;  %v2708_v18 = vsel %vm347_vm1, %v2663_v39, 0.0 }
 0x3af   : > { %v2636_v1 = vsub.f32 %v5201_v21, %v5364_v11  ;;  %v2710_v35 = vsel %vm347_vm1, %v2664_v60, 0.0  ;;  %v2637_v38 = vsub.f32 %v5244_v33, %v5364_v11  ;;  %v2638_v42 = vsub.f32 %v5252_v15, %v5364_v11 }
 0x3b0   : > { %v2693_v59 = vadd.f32 %v2692_v4, %v2691_v25  ;;  %v2666_v4 = vmul.f32 %v2634_v14, %v2634_v14  ;;  %v2712_v36 = vsel %vm347_vm1, %v2665_v7, 0.0  ;;  %v2639_v6 = vsub.f32 %v5266_v48, %v5364_v11 }
 0x3b1   : > { %v2640_v45 = vsub.f32 %v5276_v8, %v5364_v11  ;;  %v2641_v9 = vsub.f32 %v5291_v32, %v5364_v11  ;;  %v2642_v39 = vsub.f32 %v5298_v24, %v5364_v11  ;;  %v2643_v60 = vsub.f32 %v5311_v23, %v5364_v11 }
 0x3b2   : > { %v2695_v3 = vadd.f32 %v2694_v16, %v2693_v59  ;;  %v5417_v63 = vpop.permute.xlu0 %2458  ;;  %v2667_v16 = vmul.f32 %v2635_v20, %v2635_v20  ;;  %v2714_v21 = vsel %vm347_vm1, %v2666_v4, 0.0  ;;  %v2644_v7 = vsub.f32 %v5316_v37, %v5364_v11 }
 0x3b3   : > { %v2645_v4 = vsub.f32 %v5333_v26, %v5364_v11  ;;  %v2647_v26 = vsub.f32 %v5351_v53, %v5364_v11  ;;  %v2648_v53 = vsub.f32 %v5356_v41, %v5364_v11 }
 0x3b4   : > { %v2697_v47 = vadd.f32 %v2696_v40, %v2695_v3  ;;  %v5422_v12 = vpop.permute.xlu1 %2460  ;;  %v2668_v40 = vmul.f32 %v2636_v1, %v2636_v1 }
 0x3b5   : > { %v2680_v41 = vmul.f32 %v2648_v53, %v2648_v53 }
 0x3b6   : > { %v2699_v51 = vadd.f32 %v2698_v19, %v2697_v47  ;;  %v2669_v19 = vmul.f32 %v2637_v38, %v2637_v38  ;;  %v2718_v15 = vsel %vm347_vm1, %v2668_v40, 0.0 }
 0x3b8   : > { %v2701_v58 = vadd.f32 %v2700_v62, %v2699_v51  ;;  %v2716_v51 = vsel %vm347_vm1, %v2667_v16, 0.0  ;;  %v2670_v62 = vmul.f32 %v2638_v42, %v2638_v42  ;;  %v2720_v48 = vsel %vm347_vm1, %v2669_v19, 0.0 }
 0x3b9   : > { %v2646_v16 = vsub.f32 %v5338_v5, %v5364_v11 }
 0x3ba   : > { %v2703_v31 = vadd.f32 %v2702_v55, %v2701_v58  ;;  %v5427_v13 = vpop.permute.xlu0 %2462  ;;  %v2671_v55 = vmul.f32 %v2639_v6, %v2639_v6  ;;  %v2722_v8 = vsel %vm347_vm1, %v2670_v62, 0.0  ;;  %v2679_v62 = vmul.f32 %v2647_v26, %v2647_v26 }
 0x3bb   : > { %v2678_v19 = vmul.f32 %v2646_v16, %v2646_v16  ;;  %v2521_v16 = vsel %vm347_vm1, %v5222_v54, %v5412_v2 }
 0x3bc   : > { %v2705_v0 = vadd.f32 %v2704_v49, %v2703_v31  ;;  %v5432_v30 = vpop.permute.xlu1 %2464  ;;  %v2672_v49 = vmul.f32 %v2640_v45, %v2640_v45  ;;  %v2724_v32 = vsel %vm347_vm1, %v2671_v55, 0.0 }
 0x3be   : > { %v2707_v61 = vadd.f32 %v2706_v27, %v2705_v0  ;;  %v2673_v27 = vmul.f32 %v2641_v9, %v2641_v9  ;;  %v2726_v24 = vsel %vm347_vm1, %v2672_v49, 0.0  ;;  %v2738_v9 = vsel %vm347_vm1, %v2678_v19, 0.0 }
 0x3c0   : > { %v2709_v25 = vadd.f32 %v2708_v18, %v2707_v61  ;;  %v2674_v18 = vmul.f32 %v2642_v39, %v2642_v39  ;;  %v2728_v23 = vsel %vm347_vm1, %v2673_v27, 0.0 }
 0x3c2   : > { %v2711_v59 = vadd.f32 %v2710_v35, %v2709_v25  ;;  %v2675_v35 = vmul.f32 %v2643_v60, %v2643_v60  ;;  %v2730_v37 = vsel %vm347_vm1, %v2674_v18, 0.0 }
 0x3c4   : > { %v2713_v3 = vadd.f32 %v2712_v36, %v2711_v59  ;;  %v2676_v36 = vmul.f32 %v2644_v7, %v2644_v7 }
 0x3c6   : > { %v2715_v47 = vadd.f32 %v2714_v21, %v2713_v3  ;;  %v2677_v21 = vmul.f32 %v2645_v4, %v2645_v4 }
 0x3c8   : > { %v2427_v46 = vpop.permute.xlu0 %2426  ;;  %v2717_v33 = vadd.f32 %v2716_v51, %v2715_v47  ;;  %v2732_v47 = vsel %vm347_vm1, %v2675_v35, 0.0  ;;  %v2734_v51 = vsel %vm347_vm1, %v2676_v36, 0.0 }
 0x3c9   : > { %v2514_v3 = vsel %vm347_vm1, %v5178_v17, %v2427_v46 }
 0x3ca   : > { %v2429_v44 = vpop.permute.xlu1 %2428  ;;  %v2719_v58 = vadd.f32 %v2718_v15, %v2717_v33  ;;  %v2522_v5 = vsel %vm429_vm2, %v2514_v3, %v5417_v63  ;;  %v2736_v15 = vsel %vm347_vm1, %v2677_v21, 0.0 }
 0x3cb   : > { %v2515_v6 = vsel %vm347_vm1, %v5170_v50, %v2429_v44 }
 0x3cc   : > { %v2721_v31 = vadd.f32 %v2720_v48, %v2719_v58  ;;  %v2523_v33 = vsel %vm429_vm2, %v2515_v6, %v5422_v12  ;;  %v2740_v12 = vsel %vm347_vm1, %v2679_v62, 0.0 }
 0x3ce   : > { %v2723_v0 = vadd.f32 %v2722_v8, %v2721_v31 }
 0x3d0   : > { %v2725_v61 = vadd.f32 %v2724_v32, %v2723_v0  ;;  %v2742_v0 = vsel %vm347_vm1, %v2680_v41, 0.0 }
 0x3d1   : > { %v5443_v10 = vpop.permute.xlu0 %2466 }
 0x3d2   : > { %v2727_v25 = vadd.f32 %v2726_v24, %v2725_v61 }
 0x3d3   : > { %v5448_v34 = vpop.permute.xlu1 %2468 }
 0x3d4   : > { %v2729_v59 = vadd.f32 %v2728_v23, %v2727_v25 }
 0x3d5   : > { %v2431_v29 = vpop.permute.xlu0 %2430 }
 0x3d6   : > { %v2731_v42 = vadd.f32 %v2730_v37, %v2729_v59  ;;  %v2516_v55 = vsel %vm347_vm1, %v5181_v52, %v2431_v29 }
 0x3d7   : > { %v2433_v14 = vpop.permute.xlu1 %2432  ;;  %v2524_v49 = vsel %vm429_vm2, %v2516_v55, %v5427_v13 }
 0x3d8   : > { %v2733_v17 = vadd.f32 %v2732_v47, %v2731_v42  ;;  %v2517_v31 = vsel %vm347_vm1, %v5192_v28, %v2433_v14 }
 0x3d9   : > { %v5459_v20 = vpop.permute.xlu0 %2470  ;;  %v2525_v52 = vsel %vm429_vm2, %v2517_v31, %v5432_v30 }
 0x3da   : > { %v2735_v44 = vadd.f32 %v2734_v51, %v2733_v17 }
 0x3db   : > { %v5464_v1 = vpop.permute.xlu1 %2472 }
 0x3dc   : > { %v2737_v58 = vadd.f32 %v2736_v15, %v2735_v44  ;;  %v2529_v37 = vsel %vm429_vm2, %v2521_v16, %v5464_v1 }
 0x3dd   : > { %v2435_v38 = vpop.permute.xlu0 %2434 }
 0x3de   : > { %v2739_v48 = vadd.f32 %v2738_v9, %v2737_v58  ;;  %v2518_v61 = vsel %vm347_vm1, %v5198_v22, %v2435_v38 }
 0x3df   : > { %v2437_v40 = vpop.permute.xlu1 %2436  ;;  %v2526_v30 = vsel %vm429_vm2, %v2518_v61, %v5443_v10 }
 0x3e0   : > { %v2741_v39 = vadd.f32 %v2740_v12, %v2739_v48  ;;  %v2519_v18 = vsel %vm347_vm1, %v5212_v56, %v2437_v40 }
 0x3e1   : > { %v2491_v46 = vpop.permute.xlu0 %2490  ;;  %v2527_v35 = vsel %vm429_vm2, %v2519_v18, %v5448_v34  ;;  %v2520_v34 = vsel %vm347_vm1, %v5215_v43, %v5407_v57 }
 0x3e2   : > { %v2531_v50 = vsel %vm2530_vm11, %v2522_v5, %v2491_v46  ;;  %v2743_v27 = vadd.f32 %v2742_v0, %v2741_v39  ;;  %v2528_v59 = vsel %vm429_vm2, %v2520_v34, %v5459_v20 }
 0x3e3   : > { %2539 = vst.msk [vmem:[%s5483_s27] sm:$0xff] %vm1258_vm5, %v2531_v50  ;;  %v2493_v45 = vpop.permute.xlu1 %2492 }
 0x3e4   : > { %v2532_v63 = vsel %vm2530_vm11, %v2523_v33, %v2493_v45  ;;  %v2744_v14 = vrot.slane %v2743_v27, 4 }
 0x3e5   : > { %2540 = vst.msk [vmem:[%s5483_s27 + $0x8] sm:$0xff] %vm1258_vm5, %v2532_v63 }
 0x3e6   : > { %v2745_v13 = vadd.f32 %v2744_v14, %v2743_v27 }
 0x3e8   : > { %v2746_v32 = vrot.slane %v2745_v13, 2 }
 0x3e9   : > { %v2495_v8 = vpop.permute.xlu0 %2494 }
 0x3ea   : > { %v2533_v60 = vsel %vm2530_vm11, %v2524_v49, %v2495_v8  ;;  %v2747_v7 = vadd.f32 %v2746_v32, %v2745_v13 }
 0x3eb   : > { %2541 = vst.msk [vmem:[%s5483_s27 + $0x10] sm:$0xff] %vm1258_vm5, %v2533_v60  ;;  %v2497_v29 = vpop.permute.xlu1 %2496 }
 0x3ec   : > { %v2534_v28 = vsel %vm2530_vm11, %v2525_v52, %v2497_v29  ;;  %v2748_v25 = vrot.slane %v2747_v7, 1 }
 0x3ed   : > { %2542 = vst.msk [vmem:[%s5483_s27 + $0x18] sm:$0xff] %vm1258_vm5, %v2534_v28 }
 0x3ee   : > { %v2749_v22 = vadd.f32 %v2748_v25, %v2747_v7 }
 0x3f0   : > { %v2750_v10 = vsel %vm520_vm4, %v5364_v11, %v2749_v22 }
 0x3f1   : > { %2752 = vst.msk [vmem:[%s309_s11] sm:$0x3] %vm2751_vm12, %v2750_v10 }
 0x3f7   : > { %v2499_v24 = vpop.permute.xlu0 %2498 }
 0x3f8   : > { %v2535_v4 = vsel %vm2530_vm11, %v2526_v30, %v2499_v24 }
 0x3f9   : > { %2543 = vst.msk [vmem:[%s5483_s27 + $0x20] sm:$0xff] %vm1258_vm5, %v2535_v4  ;;  %v2501_v23 = vpop.permute.xlu1 %2500 }
 0x3fa   : > { %v2536_v56 = vsel %vm2530_vm11, %v2527_v35, %v2501_v23 }
 0x3fb   : > { %2544 = vst.msk [vmem:[%s5483_s27 + $0x28] sm:$0xff] %vm1258_vm5, %v2536_v56 }
 0x400   : > { %v2503_v38 = vpop.permute.xlu0 %2502 }
 0x401   : > { %v2537_v36 = vsel %vm2530_vm11, %v2528_v59, %v2503_v38 }
 0x402   : > { %2545 = vst.msk [vmem:[%s5483_s27 + $0x30] sm:$0xff] %vm1258_vm5, %v2537_v36  ;;  %v2505_v11 = vpop.permute.xlu1 %2504 }
 0x403   : > { %v2538_v3 = vsel %vm2530_vm11, %v2529_v37, %v2505_v11 }
 0x404   : > { %2546 = vst.msk [vmem:[%s5483_s27 + $0x38] sm:$0xff] %vm1258_vm5, %v2538_v3 }
 0x405 PF: > { %s18_s24 = sadd.s32 1, %s3569_s24  }
 0x406   : > { %p15_p4 = scmp.ge.s32.totalorder %s18_s24, 4  }
 0x408   :  { %17 = sbr.rel (!%p15_p4) target bundleno = 1 (0x1), region = 101 }

</bundles_post_ra>
